<compile_context>
chip_gen: v7x
topology: tpu7x:2x2x1
jax: 0.10.0
libtpu: 0.0.40
codegen_flags: <defaults>
</compile_context>

<pallas_src>
import jax
import jax.numpy as jnp
from jax.experimental import pallas as pl
from jax.experimental.pallas import tpu as pltpu


def dnn_kernel(x_ref, w1_ref, b1_ref, w2_ref, b2_ref, o_ref):
    # x: (TB, 3), w1: (3, 32), b1: (1, 32), w2 (pre-transposed row): (1, 32),
    # b2: (1, 1) in SMEM, o: (TB, 1)
    x = x_ref[...]
    w1 = w1_ref[...]

    # fc1 with K=3: unrolled VPU broadcast-FMAs (no MXU round-trip).
    h = (x[:, 0:1] * w1[0:1, :]
         + x[:, 1:2] * w1[1:2, :]
         + x[:, 2:3] * w1[2:3, :]
         + b1_ref[...])                      # (TB, 32)
    h = jnp.maximum(h, 0.0)                  # ReLU

    # Dropout(p=0.2): identity in inference mode (PyTorch eval semantics).
    # TODO(synk): training-mode dropout would use pltpu.prng_seed / prng_random_bits.

    # fc2 with N=1: elementwise multiply + lane reduction (XLU) + SMEM scalar bias.
    out = jnp.sum(h * w2_ref[...], axis=1, keepdims=True) + b2_ref[0, 0]
    o_ref[...] = out.astype(o_ref.dtype)


def _round_up(n, m):
    return ((n + m - 1) // m) * m


def dnn_forward(x, w1, b1, w2, b2, *, tile_b=1024):
    # NOTE: for tiny batches (B ~ tens) a plain jnp expression beats any
    # pallas_call (launch + DMA setup overhead >> ~500 FLOPs of work).
    B = x.shape[0]
    tb = min(tile_b, _round_up(B, 8))        # tile must be a multiple of 8 sublanes
    B_pad = _round_up(B, tb)
    if B_pad != B:
        x = jnp.pad(x, ((0, B_pad - B), (0, 0)))

    w2_row = w2.reshape(1, 32)               # (32,1) -> (1,32): lane-broadcast friendly
    b2_s = b2.reshape(1, 1)

    grid = (B_pad // tb,)
    cost = pl.CostEstimate(
        flops=2 * B_pad * (3 * 32 + 32),
        transcendentals=0,
        bytes_accessed=B_pad * 3 * 4 + B_pad * 4 + 4 * (3 * 32 + 32 + 32 + 1),
    )

    out = pl.pallas_call(
        dnn_kernel,
        out_shape=jax.ShapeDtypeStruct((B_pad, 1), jnp.float32),
        grid_spec=pltpu.PrefetchScalarGridSpec(
            num_scalar_prefetch=0,
            grid=grid,
            in_specs=[
                pl.BlockSpec((tb, 3), lambda i: (i, 0)),    # x: tiled over batch
                pl.BlockSpec((3, 32), lambda i: (0, 0)),    # w1: resident
                pl.BlockSpec((1, 32), lambda i: (0, 0)),    # b1: resident
                pl.BlockSpec((1, 32), lambda i: (0, 0)),    # w2 row: resident
                pl.BlockSpec(memory_space=pltpu.MemorySpace.SMEM),  # b2 scalar
            ],
            out_specs=pl.BlockSpec((tb, 1), lambda i: (i, 0)),
        ),
        compiler_params=pltpu.CompilerParams(
            dimension_semantics=("parallel",),
        ),
        cost_estimate=cost,
    )(x, w1, b1, w2_row, b2_s)
    return out[:B]


def init_params(key):
    # Deterministic init mimicking nn.Linear shapes (stored transposed: (in, out)).
    k1, k2, k3, k4 = jax.random.split(key, 4)
    w1 = jax.random.normal(k1, (3, 32), jnp.float32) * 0.1
    b1 = jax.random.normal(k2, (1, 32), jnp.float32) * 0.1
    w2 = jax.random.normal(k3, (32, 1), jnp.float32) * 0.1
    b2 = jax.random.normal(k4, (1, 1), jnp.float32) * 0.1
    return w1, b1, w2, b2


if __name__ == "__main__":
    key = jax.random.PRNGKey(0)
    kx, kp = jax.random.split(key)
    B = 2048                                   # two grid steps at TILE_B=1024
    x = jax.random.normal(kx, (B, 3), jnp.float32)
    w1, b1, w2, b2 = init_params(kp)

    out = dnn_forward(x, w1, b1, w2, b2)
    jax.block_until_ready(out)

    # Reference check in plain JAX (PyTorch eval-mode semantics).
    ref = jnp.maximum(x @ w1 + b1, 0.0) @ w2 + b2
    assert out.shape == (B, 1)
    assert jnp.allclose(out, ref, atol=1e-5, rtol=1e-5), "mismatch vs reference"
    print("KERNEL_OK")
</pallas_src>

<mosaic_0001>
module attributes {stable_mosaic.version = 11 : i64} {
  func.func @dnn_kernel(%arg0: i32, %arg1: memref<1024x3xf32, #tpu.memory_space<vmem>>, %arg2: memref<3x32xf32, #tpu.memory_space<vmem>>, %arg3: memref<1x32xf32, #tpu.memory_space<vmem>>, %arg4: memref<1x32xf32, #tpu.memory_space<vmem>>, %arg5: memref<1x1xf32, #tpu.memory_space<smem>>, %arg6: memref<1024x1xf32, #tpu.memory_space<vmem>>) attributes {dimension_semantics = [#tpu.dimension_semantics<parallel>], iteration_bounds = array<i64: 2>, scalar_prefetch = 0 : i64, scratch_operands = 0 : i64, tpu.core_type = #tpu.core_type<tc>, window_params = [{transform_indices = @transform_0, window_bounds = array<i64: 1024, 3>}, {pipeline_mode = #tpu.pipeline_mode<synchronous>, transform_indices = @transform_1, window_bounds = array<i64: 3, 32>}, {pipeline_mode = #tpu.pipeline_mode<synchronous>, transform_indices = @transform_2, window_bounds = array<i64: 1, 32>}, {pipeline_mode = #tpu.pipeline_mode<synchronous>, transform_indices = @transform_3, window_bounds = array<i64: 1, 32>}, {transform_indices = @transform_4, window_bounds = array<i64: 1, 1>}, {transform_indices = @transform_5, window_bounds = array<i64: 1024, 1>}]} {
    %c0 = arith.constant 0 : index
    %c0_0 = arith.constant 0 : index
    %0 = vector.load %arg1[%c0, %c0_0] : memref<1024x3xf32, #tpu.memory_space<vmem>>, vector<1024x3xf32>
    %c0_1 = arith.constant 0 : index
    %c0_2 = arith.constant 0 : index
    %1 = vector.load %arg2[%c0_1, %c0_2] : memref<3x32xf32, #tpu.memory_space<vmem>>, vector<3x32xf32>
    %2 = vector.extract_strided_slice %0 {offsets = [0, 0], sizes = [1024, 1], strides = [1, 1]} : vector<1024x3xf32> to vector<1024x1xf32>
    %3 = vector.extract_strided_slice %1 {offsets = [0, 0], sizes = [1, 32], strides = [1, 1]} : vector<3x32xf32> to vector<1x32xf32>
    %4 = vector.broadcast %2 : vector<1024x1xf32> to vector<1024x32xf32>
    %5 = vector.broadcast %3 : vector<1x32xf32> to vector<1024x32xf32>
    %6 = arith.mulf %4, %5 : vector<1024x32xf32>
    %7 = vector.extract_strided_slice %0 {offsets = [0, 1], sizes = [1024, 1], strides = [1, 1]} : vector<1024x3xf32> to vector<1024x1xf32>
    %8 = vector.extract_strided_slice %1 {offsets = [1, 0], sizes = [1, 32], strides = [1, 1]} : vector<3x32xf32> to vector<1x32xf32>
    %9 = vector.broadcast %7 : vector<1024x1xf32> to vector<1024x32xf32>
    %10 = vector.broadcast %8 : vector<1x32xf32> to vector<1024x32xf32>
    %11 = arith.mulf %9, %10 : vector<1024x32xf32>
    %12 = arith.addf %6, %11 : vector<1024x32xf32>
    %13 = vector.extract_strided_slice %0 {offsets = [0, 2], sizes = [1024, 1], strides = [1, 1]} : vector<1024x3xf32> to vector<1024x1xf32>
    %14 = vector.extract_strided_slice %1 {offsets = [2, 0], sizes = [1, 32], strides = [1, 1]} : vector<3x32xf32> to vector<1x32xf32>
    %15 = vector.broadcast %13 : vector<1024x1xf32> to vector<1024x32xf32>
    %16 = vector.broadcast %14 : vector<1x32xf32> to vector<1024x32xf32>
    %17 = arith.mulf %15, %16 : vector<1024x32xf32>
    %18 = arith.addf %12, %17 : vector<1024x32xf32>
    %c0_3 = arith.constant 0 : index
    %c0_4 = arith.constant 0 : index
    %19 = vector.load %arg3[%c0_3, %c0_4] : memref<1x32xf32, #tpu.memory_space<vmem>>, vector<1x32xf32>
    %20 = vector.broadcast %19 : vector<1x32xf32> to vector<1024x32xf32>
    %21 = arith.addf %18, %20 : vector<1024x32xf32>
    %cst = arith.constant 0.000000e+00 : f32
    %22 = vector.broadcast %cst : f32 to vector<1024x32xf32>
    %23 = arith.maximumf %21, %22 : vector<1024x32xf32>
    %c0_5 = arith.constant 0 : index
    %c0_6 = arith.constant 0 : index
    %24 = vector.load %arg4[%c0_5, %c0_6] : memref<1x32xf32, #tpu.memory_space<vmem>>, vector<1x32xf32>
    %25 = vector.broadcast %24 : vector<1x32xf32> to vector<1024x32xf32>
    %26 = arith.mulf %23, %25 : vector<1024x32xf32>
    %cst_7 = arith.constant dense<0.000000e+00> : vector<1024xf32>
    %27 = vector.multi_reduction <add>, %26, %cst_7 [1] : vector<1024x32xf32> to vector<1024xf32>
    %28 = vector.shape_cast %27 : vector<1024xf32> to vector<1024x1xf32>
    %c0_8 = arith.constant 0 : index
    %c0_9 = arith.constant 0 : index
    %29 = memref.load %arg5[%c0_8, %c0_9] : memref<1x1xf32, #tpu.memory_space<smem>>
    %30 = vector.broadcast %29 : f32 to vector<1024x1xf32>
    %31 = arith.addf %28, %30 : vector<1024x1xf32>
    %c0_10 = arith.constant 0 : index
    %c0_11 = arith.constant 0 : index
    %32 = vector.load %arg6[%c0_10, %c0_11] : memref<1024x1xf32, #tpu.memory_space<vmem>>, vector<1024x1xf32>
    tpu.vector_store %arg6[%c0_10, %c0_11], %31 {strides = array<i32>} : memref<1024x1xf32, #tpu.memory_space<vmem>>, vector<1024x1xf32>,
    return
  }
  func.func @transform_0(%arg0: i32) -> (i32, i32) {
    %c0_i32 = arith.constant 0 : i32
    %c0_i32_0 = arith.constant 0 : i32
    return %arg0, %c0_i32 : i32, i32
  }
  func.func @transform_1(%arg0: i32) -> (i32, i32) {
    %c0_i32 = arith.constant 0 : i32
    %c0_i32_0 = arith.constant 0 : i32
    %c0_i32_1 = arith.constant 0 : i32
    return %c0_i32, %c0_i32_0 : i32, i32
  }
  func.func @transform_2(%arg0: i32) -> (i32, i32) {
    %c0_i32 = arith.constant 0 : i32
    %c0_i32_0 = arith.constant 0 : i32
    %c0_i32_1 = arith.constant 0 : i32
    return %c0_i32, %c0_i32_0 : i32, i32
  }
  func.func @transform_3(%arg0: i32) -> (i32, i32) {
    %c0_i32 = arith.constant 0 : i32
    %c0_i32_0 = arith.constant 0 : i32
    %c0_i32_1 = arith.constant 0 : i32
    return %c0_i32, %c0_i32_0 : i32, i32
  }
  func.func @transform_4(%arg0: i32) -> (i32, i32) {
    %c0_i32 = arith.constant 0 : i32
    %c0_i32_0 = arith.constant 0 : i32
    %c0_i32_1 = arith.constant 0 : i32
    return %c0_i32, %c0_i32_0 : i32, i32
  }
  func.func @transform_5(%arg0: i32) -> (i32, i32) {
    %c0_i32 = arith.constant 0 : i32
    %c0_i32_0 = arith.constant 0 : i32
    return %arg0, %c0_i32 : i32, i32
  }
}

</mosaic_0001>

<bundles_post_ra>
// kernel: tpu_custom_call.1
= control target key start
LH: loop header
LB: loop body
LE: loop exit
PB: predicated region body
PF: predicated region fallthrough
CT: control target
= control target key end

     0   :  { %s3978_s20 = smov 0   ;;  %s7882_s0 = inlined_call_operand.vmem [shape: f32[2048,3], index: 0, kind: input, shape index: {}]   ;;  %s7883_s1 = inlined_call_operand.vmem [shape: f32[3,32], index: 1, kind: input, shape index: {}]   ;;  %s7884_s2 = inlined_call_operand.vmem [shape: f32[1,32], index: 2, kind: input, shape index: {}]   ;;  %s7885_s3 = inlined_call_operand.vmem [shape: f32[1,32], index: 3, kind: input, shape index: {}]   ;;  %s7886_s4 = inlined_call_operand.<no memory space> [shape: f32[1,1], index: 4, kind: input, shape index: {}]   ;;  %s7887_s5 = inlined_call_operand.vmem [shape: f32[2048,1], index: 5, kind: output, shape index: {}]  }
   0x1   :  { %10 = sst [smem:[#allocation2]] %s7886_s4 }
   0x2 LB: > { %s3772_s21 = sadd.s32 4294967295, %s3940_s20   ;;  %p3776_p0 = scmp.ge.s32.totalorder %s3940_s20, 1  ;;  %s3940_s20 = sphi %s3978_s20, %s16_s20  }
   0x3   : > { %p189_p1 = scmp.lt.s32.totalorder %s3940_s20, 3 }
   0x5   : > { %p190_p2 = pnand %p3776_p0, %p189_p1 }
   0x7   : > { %193 = sbr.rel (%p190_p2) target bundleno = 1254 (0x4e6), region = 40 }
   0xe   : > { %s3777_s22 = sshll.u32 %s3772_s21, 7  ;;  %v3942_v0 = vmov 0   ;;  %vm3072_vm0 = vcmask 261120   ;;  %s7008_s11 = sld [smem:[#allocation2]]  ;;  %vm3587_vm1 = vcmask 7168  }
   0xf   : > { %3797 = vset.pattern.permute.xlu1 %v3942_v0  ;;  %3796 = vset.pattern.permute.xlu0 %v3942_v0  ;;  %p218_p3 = scmp.lt.s32.totalorder %s3777_s22, 255 }
  0x11   : > { %s9033_s22 = smov (!%p218_p3, %s3777_s22), 255 }
  0x12   : > { %s3778_s4 = sshll.u32 %s9033_s22, 3 }
  0x13   : > { %s3994_s25 = scalar_lea.vmem %s7882_s0, %s3778_s4  ;;  %s7070_s14 = scalar_lea.vmem %s7887_s5, %s3778_s4 }
  0x14   : > { %v3997_v1 = vld [vmem:[%s3994_s25 + $0x10] sm:$0xff]  ;;  %v4000_v2 = vld [vmem:[%s3994_s25] sm:$0xff]  ;;  %v4005_v3 = vld [vmem:[%s3994_s25 + $0x18] sm:$0xff] }
  0x15   : > { %370 = vperm.xlu1 %3797, %v3997_v1   ;;  %360 = vperm.xlu0 %3796, %v4000_v2   ;;  %v4008_v4 = vld [vmem:[%s3994_s25 + $0x8] sm:$0xff]  ;;  %v4016_v6 = vld [vmem:[%s3994_s25 + $0x20] sm:$0xff]  ;;  %v4021_v7 = vld [vmem:[%s3994_s25 + $0x38] sm:$0xff] }
  0x16   : > { %v4013_v5 = vld [vmem:[%s3994_s25 + $0x28] sm:$0xff]  ;;  %v4024_v8 = vld [vmem:[%s3994_s25 + $0x30] sm:$0xff]  ;;  %v4032_v10 = vld [vmem:[%s3994_s25 + $0x40] sm:$0xff] }
  0x17   : > { %v4029_v9 = vld [vmem:[%s3994_s25 + $0x48] sm:$0xff]  ;;  %v4037_v11 = vld [vmem:[%s3994_s25 + $0x58] sm:$0xff]  ;;  %v4040_v12 = vld [vmem:[%s3994_s25 + $0x50] sm:$0xff] }
  0x18   : > { %v4045_v13 = vld [vmem:[%s3994_s25 + $0x68] sm:$0xff]  ;;  %v4048_v14 = vld [vmem:[%s3994_s25 + $0x60] sm:$0xff]  ;;  %v4053_v15 = vld [vmem:[%s3994_s25 + $0x78] sm:$0xff] }
  0x19   : > { %375 = vperm.xlu1 %3797, %v4005_v3   ;;  %365 = vperm.xlu0 %3796, %v4008_v4   ;;  %v4056_v16 = vld [vmem:[%s3994_s25 + $0x70] sm:$0xff]  ;;  %v4061_v17 = vld [vmem:[%s3994_s25 + $0x88] sm:$0xff]  ;;  %v4064_v18 = vld [vmem:[%s3994_s25 + $0x80] sm:$0xff] }
  0x1a   : > { %v4069_v19 = vld [vmem:[%s3994_s25 + $0x98] sm:$0xff]  ;;  %v4072_v20 = vld [vmem:[%s3994_s25 + $0x90] sm:$0xff]  ;;  %v4077_v21 = vld [vmem:[%s3994_s25 + $0xa8] sm:$0xff] }
  0x1b   : > { %v4080_v22 = vld [vmem:[%s3994_s25 + $0xa0] sm:$0xff]  ;;  %v4085_v23 = vld [vmem:[%s3994_s25 + $0xb8] sm:$0xff]  ;;  %v4088_v24 = vld [vmem:[%s3994_s25 + $0xb0] sm:$0xff] }
  0x1c   : > { %v4093_v25 = vld [vmem:[%s3994_s25 + $0xc8] sm:$0xff]  ;;  %v4096_v26 = vld [vmem:[%s3994_s25 + $0xc0] sm:$0xff]  ;;  %v4101_v27 = vld [vmem:[%s3994_s25 + $0xd8] sm:$0xff] }
  0x1d   : > { %385 = vperm.xlu1 %3797, %v4013_v5   ;;  %380 = vperm.xlu0 %3796, %v4016_v6   ;;  %v4104_v28 = vld [vmem:[%s3994_s25 + $0xd0] sm:$0xff]  ;;  %v4109_v29 = vld [vmem:[%s3994_s25 + $0xe8] sm:$0xff]  ;;  %v4112_v30 = vld [vmem:[%s3994_s25 + $0xe0] sm:$0xff] }
  0x1e   : > { %v4117_v31 = vld [vmem:[%s3994_s25 + $0xf8] sm:$0xff]  ;;  %v4120_v32 = vld [vmem:[%s3994_s25 + $0xf0] sm:$0xff]  ;;  %v4125_v33 = vld [vmem:[%s3994_s25 + $0x108] sm:$0xff] }
  0x1f   : > { %v4128_v34 = vld [vmem:[%s3994_s25 + $0x100] sm:$0xff]  ;;  %v4133_v35 = vld [vmem:[%s3994_s25 + $0x118] sm:$0xff]  ;;  %v4136_v36 = vld [vmem:[%s3994_s25 + $0x110] sm:$0xff] }
  0x20   : > { %v4141_v37 = vld [vmem:[%s3994_s25 + $0x128] sm:$0xff]  ;;  %v4144_v38 = vld [vmem:[%s3994_s25 + $0x120] sm:$0xff]  ;;  %v4149_v39 = vld [vmem:[%s3994_s25 + $0x138] sm:$0xff] }
  0x21   : > { %395 = vperm.xlu1 %3797, %v4021_v7   ;;  %390 = vperm.xlu0 %3796, %v4024_v8   ;;  %v4152_v40 = vld [vmem:[%s3994_s25 + $0x130] sm:$0xff]  ;;  %v4157_v41 = vld [vmem:[%s3994_s25 + $0x148] sm:$0xff]  ;;  %v4160_v42 = vld [vmem:[%s3994_s25 + $0x140] sm:$0xff] }
  0x22   : > { %v4165_v43 = vld [vmem:[%s3994_s25 + $0x158] sm:$0xff]  ;;  %v4168_v44 = vld [vmem:[%s3994_s25 + $0x150] sm:$0xff]  ;;  %v4173_v45 = vld [vmem:[%s3994_s25 + $0x168] sm:$0xff] }
  0x23   : > { %v4176_v46 = vld [vmem:[%s3994_s25 + $0x160] sm:$0xff]  ;;  %v4181_v47 = vld [vmem:[%s3994_s25 + $0x178] sm:$0xff]  ;;  %v4184_v48 = vld [vmem:[%s3994_s25 + $0x170] sm:$0xff] }
  0x24   : > { %v4189_v49 = vld [vmem:[%s3994_s25 + $0x188] sm:$0xff]  ;;  %v4192_v50 = vld [vmem:[%s3994_s25 + $0x180] sm:$0xff]  ;;  %v4197_v51 = vld [vmem:[%s3994_s25 + $0x198] sm:$0xff] }
  0x25   : > { %405 = vperm.xlu1 %3797, %v4029_v9   ;;  %400 = vperm.xlu0 %3796, %v4032_v10   ;;  %v4200_v52 = vld [vmem:[%s3994_s25 + $0x190] sm:$0xff]  ;;  %v4205_v53 = vld [vmem:[%s3994_s25 + $0x1a8] sm:$0xff]  ;;  %v4208_v54 = vld [vmem:[%s3994_s25 + $0x1a0] sm:$0xff] }
  0x26   : > { %v4213_v55 = vld [vmem:[%s3994_s25 + $0x1b8] sm:$0xff]  ;;  %v4216_v56 = vld [vmem:[%s3994_s25 + $0x1b0] sm:$0xff]  ;;  %v4221_v57 = vld [vmem:[%s3994_s25 + $0x1c8] sm:$0xff] }
  0x27   : > { %7960 = vst [vmem:[#allocation3_spill] sm:$0xff] %v4213_v55  ;;  %7961 = vst [vmem:[#allocation4_spill] sm:$0xff] %v4221_v57  ;;  %v4224_v58 = vld [vmem:[%s3994_s25 + $0x1c0] sm:$0xff]  ;;  %v4229_v59 = vld [vmem:[%s3994_s25 + $0x1d8] sm:$0xff] }
  0x28   : > { %7962 = vst [vmem:[#allocation5_spill] sm:$0xff] %v4224_v58  ;;  %7963 = vst [vmem:[#allocation6_spill] sm:$0xff] %v4229_v59  ;;  %v4232_v60 = vld [vmem:[%s3994_s25 + $0x1d0] sm:$0xff]  ;;  %v4237_v61 = vld [vmem:[%s3994_s25 + $0x1e8] sm:$0xff] }
  0x29   : > { %415 = vperm.xlu1 %3797, %v4037_v11   ;;  %410 = vperm.xlu0 %3796, %v4040_v12   ;;  %7964 = vst [vmem:[#allocation7_spill] sm:$0xff] %v4232_v60  ;;  %7965 = vst [vmem:[#allocation8_spill] sm:$0xff] %v4237_v61  ;;  %v4240_v62 = vld [vmem:[%s3994_s25 + $0x1e0] sm:$0xff]  ;;  %v4245_v63 = vld [vmem:[%s3994_s25 + $0x1f8] sm:$0xff] }
  0x2a   : > { %7966 = vst [vmem:[#allocation9_spill] sm:$0xff] %v4240_v62  ;;  %7967 = vst [vmem:[#allocation10_spill] sm:$0xff] %v4245_v63  ;;  %v4248_v0 = vld [vmem:[%s3994_s25 + $0x1f0] sm:$0xff] }
  0x2b   : > { %7968 = vst [vmem:[#allocation11_spill] sm:$0xff] %v4248_v0 }
  0x2d   : > { %425 = vperm.xlu1 %3797, %v4045_v13   ;;  %420 = vperm.xlu0 %3796, %v4048_v14  }
  0x31   : > { %435 = vperm.xlu1 %3797, %v4053_v15   ;;  %430 = vperm.xlu0 %3796, %v4056_v16  }
  0x35   : > { %445 = vperm.xlu1 %3797, %v4061_v17   ;;  %440 = vperm.xlu0 %3796, %v4064_v18  }
  0x39   : > { %455 = vperm.xlu1 %3797, %v4069_v19   ;;  %450 = vperm.xlu0 %3796, %v4072_v20  }
  0x3d   : > { %465 = vperm.xlu1 %3797, %v4077_v21   ;;  %460 = vperm.xlu0 %3796, %v4080_v22  }
  0x41   : > { %475 = vperm.xlu1 %3797, %v4085_v23   ;;  %470 = vperm.xlu0 %3796, %v4088_v24  }
  0x45   : > { %485 = vperm.xlu1 %3797, %v4093_v25   ;;  %480 = vperm.xlu0 %3796, %v4096_v26  }
  0x49   : > { %495 = vperm.xlu1 %3797, %v4101_v27   ;;  %490 = vperm.xlu0 %3796, %v4104_v28  }
  0x4d   : > { %505 = vperm.xlu1 %3797, %v4109_v29   ;;  %500 = vperm.xlu0 %3796, %v4112_v30  }
  0x51   : > { %515 = vperm.xlu1 %3797, %v4117_v31   ;;  %510 = vperm.xlu0 %3796, %v4120_v32  }
  0x55   : > { %525 = vperm.xlu1 %3797, %v4125_v33   ;;  %520 = vperm.xlu0 %3796, %v4128_v34  }
  0x59   : > { %535 = vperm.xlu1 %3797, %v4133_v35   ;;  %530 = vperm.xlu0 %3796, %v4136_v36  }
  0x5d   : > { %545 = vperm.xlu1 %3797, %v4141_v37   ;;  %540 = vperm.xlu0 %3796, %v4144_v38  }
  0x61   : > { %555 = vperm.xlu1 %3797, %v4149_v39   ;;  %550 = vperm.xlu0 %3796, %v4152_v40  }
  0x65   : > { %565 = vperm.xlu1 %3797, %v4157_v41   ;;  %560 = vperm.xlu0 %3796, %v4160_v42  }
  0x69   : > { %575 = vperm.xlu1 %3797, %v4165_v43   ;;  %570 = vperm.xlu0 %3796, %v4168_v44  }
  0x6d   : > { %585 = vperm.xlu1 %3797, %v4173_v45   ;;  %580 = vperm.xlu0 %3796, %v4176_v46  }
  0x71   : > { %595 = vperm.xlu1 %3797, %v4181_v47   ;;  %590 = vperm.xlu0 %3796, %v4184_v48  }
  0x75   : > { %605 = vperm.xlu1 %3797, %v4189_v49   ;;  %600 = vperm.xlu0 %3796, %v4192_v50  }
  0x79   : > { %615 = vperm.xlu1 %3797, %v4197_v51   ;;  %610 = vperm.xlu0 %3796, %v4200_v52  }
  0x7d   : > { %625 = vperm.xlu1 %3797, %v4205_v53   ;;  %620 = vperm.xlu0 %3796, %v4208_v54  }
  0x81   : > { %635 = vperm.xlu1 %3797, %v4213_v55   ;;  %630 = vperm.xlu0 %3796, %v4216_v56  }
  0x85   : > { %645 = vperm.xlu1 %3797, %v4221_v57   ;;  %640 = vperm.xlu0 %3796, %v4224_v58   ;;  %v4268_v58 = vld [vmem:[%s3994_s25 + $0x210] sm:$0xff] }
  0x86   : > { %7974 = vst [vmem:[#allocation17_spill] sm:$0xff] %v4268_v58 }
  0x89   : > { %655 = vperm.xlu1 %3797, %v4229_v59   ;;  %650 = vperm.xlu0 %3796, %v4232_v60   ;;  %v4253_v59 = vld [vmem:[%s3994_s25 + $0x208] sm:$0xff]  ;;  %v4256_v60 = vld [vmem:[%s3994_s25 + $0x200] sm:$0xff] }
  0x8a   : > { %7969 = vst [vmem:[#allocation12_spill] sm:$0xff] %v4253_v59  ;;  %7970 = vst [vmem:[#allocation13_spill] sm:$0xff] %v4256_v60 }
  0x8d   : > { %665 = vperm.xlu1 %3797, %v4237_v61   ;;  %660 = vperm.xlu0 %3796, %v4240_v62   ;;  %v4265_v62 = vld [vmem:[%s3994_s25 + $0x218] sm:$0xff] }
  0x8e   : > { %7973 = vst [vmem:[#allocation16_spill] sm:$0xff] %v4265_v62 }
  0x91   : > { %675 = vperm.xlu1 %3797, %v4245_v63   ;;  %670 = vperm.xlu0 %3796, %v4248_v0  }
  0x94   : > { %v4258_v57 = vpop.permute.xlu1 %370  ;;  %v4260_v61 = vpop.permute.xlu0 %360 }
  0x95   : > { %7971 = vst [vmem:[#allocation14_spill] sm:$0xff] %v4258_v57  ;;  %7972 = vst [vmem:[#allocation15_spill] sm:$0xff] %v4260_v61  ;;  %685 = vperm.xlu1 %3797, %v4253_v59   ;;  %680 = vperm.xlu0 %3796, %v4256_v60   ;;  %v4277_v61 = vld [vmem:[%s3994_s25 + $0x228] sm:$0xff]  ;;  %v4280_v57 = vld [vmem:[%s3994_s25 + $0x220] sm:$0xff] }
  0x96   : > { %7977 = vst [vmem:[#allocation20_spill] sm:$0xff] %v4277_v61  ;;  %7978 = vst [vmem:[#allocation21_spill] sm:$0xff] %v4280_v57 }
  0x98   : > { %v4270_v63 = vpop.permute.xlu1 %375  ;;  %v4272_v0 = vpop.permute.xlu0 %365 }
  0x99   : > { %7975 = vst [vmem:[#allocation18_spill] sm:$0xff] %v4270_v63  ;;  %7976 = vst [vmem:[#allocation19_spill] sm:$0xff] %v4272_v0  ;;  %695 = vperm.xlu1 %3797, %v4265_v62   ;;  %690 = vperm.xlu0 %3796, %v4268_v58   ;;  %v4289_v0 = vld [vmem:[%s3994_s25 + $0x238] sm:$0xff]  ;;  %v4292_v63 = vld [vmem:[%s3994_s25 + $0x230] sm:$0xff] }
  0x9a   : > { %7981 = vst [vmem:[#allocation24_spill] sm:$0xff] %v4289_v0  ;;  %7982 = vst [vmem:[#allocation25_spill] sm:$0xff] %v4292_v63 }
  0x9c   : > { %v4282_v59 = vpop.permute.xlu1 %385  ;;  %v4284_v60 = vpop.permute.xlu0 %380 }
  0x9d   : > { %7979 = vst [vmem:[#allocation22_spill] sm:$0xff] %v4282_v59  ;;  %7980 = vst [vmem:[#allocation23_spill] sm:$0xff] %v4284_v60  ;;  %705 = vperm.xlu1 %3797, %v4277_v61   ;;  %700 = vperm.xlu0 %3796, %v4280_v57   ;;  %v4301_v60 = vld [vmem:[%s3994_s25 + $0x248] sm:$0xff]  ;;  %v4304_v59 = vld [vmem:[%s3994_s25 + $0x240] sm:$0xff] }
  0x9e   : > { %7985 = vst [vmem:[#allocation28_spill] sm:$0xff] %v4301_v60  ;;  %7986 = vst [vmem:[#allocation29_spill] sm:$0xff] %v4304_v59 }
  0xa0   : > { %v4294_v62 = vpop.permute.xlu1 %395  ;;  %v4296_v58 = vpop.permute.xlu0 %390 }
  0xa1   : > { %7983 = vst [vmem:[#allocation26_spill] sm:$0xff] %v4294_v62  ;;  %7984 = vst [vmem:[#allocation27_spill] sm:$0xff] %v4296_v58  ;;  %715 = vperm.xlu1 %3797, %v4289_v0   ;;  %710 = vperm.xlu0 %3796, %v4292_v63   ;;  %v4313_v58 = vld [vmem:[%s3994_s25 + $0x258] sm:$0xff]  ;;  %v4316_v62 = vld [vmem:[%s3994_s25 + $0x250] sm:$0xff] }
  0xa2   : > { %7989 = vst [vmem:[#allocation32_spill] sm:$0xff] %v4313_v58  ;;  %7990 = vst [vmem:[#allocation33_spill] sm:$0xff] %v4316_v62 }
  0xa4   : > { %v4306_v61 = vpop.permute.xlu1 %405  ;;  %v4308_v57 = vpop.permute.xlu0 %400 }
  0xa5   : > { %7987 = vst [vmem:[#allocation30_spill] sm:$0xff] %v4306_v61  ;;  %7988 = vst [vmem:[#allocation31_spill] sm:$0xff] %v4308_v57  ;;  %725 = vperm.xlu1 %3797, %v4301_v60   ;;  %720 = vperm.xlu0 %3796, %v4304_v59   ;;  %v4325_v57 = vld [vmem:[%s3994_s25 + $0x268] sm:$0xff]  ;;  %v4328_v61 = vld [vmem:[%s3994_s25 + $0x260] sm:$0xff] }
  0xa6   : > { %7993 = vst [vmem:[#allocation36_spill] sm:$0xff] %v4325_v57  ;;  %7994 = vst [vmem:[#allocation37_spill] sm:$0xff] %v4328_v61 }
  0xa8   : > { %v4318_v0 = vpop.permute.xlu1 %415  ;;  %v4320_v63 = vpop.permute.xlu0 %410 }
  0xa9   : > { %7991 = vst [vmem:[#allocation34_spill] sm:$0xff] %v4318_v0  ;;  %7992 = vst [vmem:[#allocation35_spill] sm:$0xff] %v4320_v63  ;;  %735 = vperm.xlu1 %3797, %v4313_v58   ;;  %730 = vperm.xlu0 %3796, %v4316_v62   ;;  %v4337_v63 = vld [vmem:[%s3994_s25 + $0x278] sm:$0xff]  ;;  %v4340_v0 = vld [vmem:[%s3994_s25 + $0x270] sm:$0xff] }
  0xaa   : > { %7997 = vst [vmem:[#allocation40_spill] sm:$0xff] %v4337_v63  ;;  %7998 = vst [vmem:[#allocation41_spill] sm:$0xff] %v4340_v0 }
  0xac   : > { %v4330_v60 = vpop.permute.xlu1 %425  ;;  %v4332_v59 = vpop.permute.xlu0 %420 }
  0xad   : > { %7995 = vst [vmem:[#allocation38_spill] sm:$0xff] %v4330_v60  ;;  %7996 = vst [vmem:[#allocation39_spill] sm:$0xff] %v4332_v59  ;;  %745 = vperm.xlu1 %3797, %v4325_v57   ;;  %740 = vperm.xlu0 %3796, %v4328_v61   ;;  %v4349_v59 = vld [vmem:[%s3994_s25 + $0x288] sm:$0xff]  ;;  %v4352_v60 = vld [vmem:[%s3994_s25 + $0x280] sm:$0xff] }
  0xae   : > { %8001 = vst [vmem:[#allocation44_spill] sm:$0xff] %v4349_v59  ;;  %8002 = vst [vmem:[#allocation45_spill] sm:$0xff] %v4352_v60 }
  0xb0   : > { %v4342_v58 = vpop.permute.xlu1 %435  ;;  %v4344_v62 = vpop.permute.xlu0 %430 }
  0xb1   : > { %7999 = vst [vmem:[#allocation42_spill] sm:$0xff] %v4342_v58  ;;  %8000 = vst [vmem:[#allocation43_spill] sm:$0xff] %v4344_v62  ;;  %755 = vperm.xlu1 %3797, %v4337_v63   ;;  %750 = vperm.xlu0 %3796, %v4340_v0   ;;  %v4361_v62 = vld [vmem:[%s3994_s25 + $0x298] sm:$0xff]  ;;  %v4364_v58 = vld [vmem:[%s3994_s25 + $0x290] sm:$0xff] }
  0xb2   : > { %8005 = vst [vmem:[#allocation48_spill] sm:$0xff] %v4361_v62  ;;  %8006 = vst [vmem:[#allocation49_spill] sm:$0xff] %v4364_v58 }
  0xb4   : > { %v4354_v57 = vpop.permute.xlu1 %445  ;;  %v4356_v61 = vpop.permute.xlu0 %440 }
  0xb5   : > { %8003 = vst [vmem:[#allocation46_spill] sm:$0xff] %v4354_v57  ;;  %8004 = vst [vmem:[#allocation47_spill] sm:$0xff] %v4356_v61  ;;  %765 = vperm.xlu1 %3797, %v4349_v59   ;;  %760 = vperm.xlu0 %3796, %v4352_v60   ;;  %v4373_v61 = vld [vmem:[%s3994_s25 + $0x2a8] sm:$0xff]  ;;  %v4376_v57 = vld [vmem:[%s3994_s25 + $0x2a0] sm:$0xff] }
  0xb6   : > { %8009 = vst [vmem:[#allocation52_spill] sm:$0xff] %v4373_v61  ;;  %8010 = vst [vmem:[#allocation53_spill] sm:$0xff] %v4376_v57 }
  0xb8   : > { %v4366_v63 = vpop.permute.xlu1 %455  ;;  %v4368_v0 = vpop.permute.xlu0 %450 }
  0xb9   : > { %8007 = vst [vmem:[#allocation50_spill] sm:$0xff] %v4366_v63  ;;  %8008 = vst [vmem:[#allocation51_spill] sm:$0xff] %v4368_v0  ;;  %775 = vperm.xlu1 %3797, %v4361_v62   ;;  %770 = vperm.xlu0 %3796, %v4364_v58   ;;  %v4385_v0 = vld [vmem:[%s3994_s25 + $0x2b8] sm:$0xff]  ;;  %v4388_v63 = vld [vmem:[%s3994_s25 + $0x2b0] sm:$0xff] }
  0xba   : > { %8013 = vst [vmem:[#allocation56_spill] sm:$0xff] %v4385_v0  ;;  %8014 = vst [vmem:[#allocation57_spill] sm:$0xff] %v4388_v63 }
  0xbc   : > { %v4378_v59 = vpop.permute.xlu1 %465  ;;  %v4380_v60 = vpop.permute.xlu0 %460 }
  0xbd   : > { %8011 = vst [vmem:[#allocation54_spill] sm:$0xff] %v4378_v59  ;;  %8012 = vst [vmem:[#allocation55_spill] sm:$0xff] %v4380_v60  ;;  %785 = vperm.xlu1 %3797, %v4373_v61   ;;  %780 = vperm.xlu0 %3796, %v4376_v57   ;;  %v4397_v60 = vld [vmem:[%s3994_s25 + $0x2c8] sm:$0xff]  ;;  %v4400_v59 = vld [vmem:[%s3994_s25 + $0x2c0] sm:$0xff] }
  0xbe   : > { %8017 = vst [vmem:[#allocation60_spill] sm:$0xff] %v4397_v60  ;;  %8018 = vst [vmem:[#allocation61_spill] sm:$0xff] %v4400_v59 }
  0xc0   : > { %v4390_v62 = vpop.permute.xlu1 %475  ;;  %v4392_v58 = vpop.permute.xlu0 %470 }
  0xc1   : > { %8015 = vst [vmem:[#allocation58_spill] sm:$0xff] %v4390_v62  ;;  %8016 = vst [vmem:[#allocation59_spill] sm:$0xff] %v4392_v58  ;;  %795 = vperm.xlu1 %3797, %v4385_v0   ;;  %790 = vperm.xlu0 %3796, %v4388_v63   ;;  %v4409_v58 = vld [vmem:[%s3994_s25 + $0x2d8] sm:$0xff]  ;;  %v4412_v62 = vld [vmem:[%s3994_s25 + $0x2d0] sm:$0xff] }
  0xc2   : > { %8021 = vst [vmem:[#allocation64_spill] sm:$0xff] %v4409_v58  ;;  %8022 = vst [vmem:[#allocation65_spill] sm:$0xff] %v4412_v62 }
  0xc4   : > { %v4402_v61 = vpop.permute.xlu1 %485  ;;  %v4404_v57 = vpop.permute.xlu0 %480 }
  0xc5   : > { %8019 = vst [vmem:[#allocation62_spill] sm:$0xff] %v4402_v61  ;;  %8020 = vst [vmem:[#allocation63_spill] sm:$0xff] %v4404_v57  ;;  %805 = vperm.xlu1 %3797, %v4397_v60   ;;  %800 = vperm.xlu0 %3796, %v4400_v59   ;;  %v4421_v57 = vld [vmem:[%s3994_s25 + $0x2e8] sm:$0xff]  ;;  %v4424_v61 = vld [vmem:[%s3994_s25 + $0x2e0] sm:$0xff] }
  0xc6   : > { %8025 = vst [vmem:[#allocation68_spill] sm:$0xff] %v4421_v57  ;;  %8026 = vst [vmem:[#allocation69_spill] sm:$0xff] %v4424_v61 }
  0xc8   : > { %v4414_v0 = vpop.permute.xlu1 %495  ;;  %v4416_v63 = vpop.permute.xlu0 %490 }
  0xc9   : > { %8023 = vst [vmem:[#allocation66_spill] sm:$0xff] %v4414_v0  ;;  %8024 = vst [vmem:[#allocation67_spill] sm:$0xff] %v4416_v63  ;;  %815 = vperm.xlu1 %3797, %v4409_v58   ;;  %810 = vperm.xlu0 %3796, %v4412_v62   ;;  %v4433_v63 = vld [vmem:[%s3994_s25 + $0x2f8] sm:$0xff]  ;;  %v4436_v0 = vld [vmem:[%s3994_s25 + $0x2f0] sm:$0xff] }
  0xca   : > { %8029 = vst [vmem:[#allocation72_spill] sm:$0xff] %v4433_v63  ;;  %8030 = vst [vmem:[#allocation73_spill] sm:$0xff] %v4436_v0 }
  0xcc   : > { %v4426_v60 = vpop.permute.xlu1 %505  ;;  %v4428_v59 = vpop.permute.xlu0 %500 }
  0xcd   : > { %8027 = vst [vmem:[#allocation70_spill] sm:$0xff] %v4426_v60  ;;  %8028 = vst [vmem:[#allocation71_spill] sm:$0xff] %v4428_v59  ;;  %825 = vperm.xlu1 %3797, %v4421_v57   ;;  %820 = vperm.xlu0 %3796, %v4424_v61   ;;  %v4445_v59 = vld [vmem:[%s3994_s25 + $0x308] sm:$0xff]  ;;  %v4448_v60 = vld [vmem:[%s3994_s25 + $0x300] sm:$0xff] }
  0xce   : > { %8033 = vst [vmem:[#allocation76_spill] sm:$0xff] %v4445_v59  ;;  %8034 = vst [vmem:[#allocation77_spill] sm:$0xff] %v4448_v60 }
  0xd0   : > { %v4438_v58 = vpop.permute.xlu1 %515  ;;  %v4440_v62 = vpop.permute.xlu0 %510 }
  0xd1   : > { %8031 = vst [vmem:[#allocation74_spill] sm:$0xff] %v4438_v58  ;;  %8032 = vst [vmem:[#allocation75_spill] sm:$0xff] %v4440_v62  ;;  %835 = vperm.xlu1 %3797, %v4433_v63   ;;  %830 = vperm.xlu0 %3796, %v4436_v0   ;;  %v4457_v62 = vld [vmem:[%s3994_s25 + $0x318] sm:$0xff]  ;;  %v4460_v58 = vld [vmem:[%s3994_s25 + $0x310] sm:$0xff] }
  0xd2   : > { %8037 = vst [vmem:[#allocation80_spill] sm:$0xff] %v4457_v62  ;;  %8038 = vst [vmem:[#allocation81_spill] sm:$0xff] %v4460_v58 }
  0xd4   : > { %v4450_v57 = vpop.permute.xlu1 %525  ;;  %v4452_v61 = vpop.permute.xlu0 %520 }
  0xd5   : > { %8035 = vst [vmem:[#allocation78_spill] sm:$0xff] %v4450_v57  ;;  %8036 = vst [vmem:[#allocation79_spill] sm:$0xff] %v4452_v61  ;;  %845 = vperm.xlu1 %3797, %v4445_v59   ;;  %840 = vperm.xlu0 %3796, %v4448_v60   ;;  %v4469_v61 = vld [vmem:[%s3994_s25 + $0x328] sm:$0xff]  ;;  %v4472_v57 = vld [vmem:[%s3994_s25 + $0x320] sm:$0xff] }
  0xd6   : > { %8041 = vst [vmem:[#allocation84_spill] sm:$0xff] %v4469_v61  ;;  %8042 = vst [vmem:[#allocation85_spill] sm:$0xff] %v4472_v57 }
  0xd8   : > { %v4462_v63 = vpop.permute.xlu1 %535  ;;  %v4464_v0 = vpop.permute.xlu0 %530 }
  0xd9   : > { %8039 = vst [vmem:[#allocation82_spill] sm:$0xff] %v4462_v63  ;;  %8040 = vst [vmem:[#allocation83_spill] sm:$0xff] %v4464_v0  ;;  %855 = vperm.xlu1 %3797, %v4457_v62   ;;  %850 = vperm.xlu0 %3796, %v4460_v58   ;;  %v4481_v0 = vld [vmem:[%s3994_s25 + $0x338] sm:$0xff]  ;;  %v4484_v63 = vld [vmem:[%s3994_s25 + $0x330] sm:$0xff] }
  0xda   : > { %8045 = vst [vmem:[#allocation88_spill] sm:$0xff] %v4481_v0  ;;  %8046 = vst [vmem:[#allocation89_spill] sm:$0xff] %v4484_v63 }
  0xdc   : > { %v4474_v59 = vpop.permute.xlu1 %545  ;;  %v4476_v60 = vpop.permute.xlu0 %540 }
  0xdd   : > { %8043 = vst [vmem:[#allocation86_spill] sm:$0xff] %v4474_v59  ;;  %8044 = vst [vmem:[#allocation87_spill] sm:$0xff] %v4476_v60  ;;  %865 = vperm.xlu1 %3797, %v4469_v61   ;;  %860 = vperm.xlu0 %3796, %v4472_v57   ;;  %v4493_v60 = vld [vmem:[%s3994_s25 + $0x348] sm:$0xff]  ;;  %v4496_v59 = vld [vmem:[%s3994_s25 + $0x340] sm:$0xff] }
  0xde   : > { %8049 = vst [vmem:[#allocation92_spill] sm:$0xff] %v4493_v60  ;;  %8050 = vst [vmem:[#allocation93_spill] sm:$0xff] %v4496_v59 }
  0xe0   : > { %v4486_v62 = vpop.permute.xlu1 %555  ;;  %v4488_v58 = vpop.permute.xlu0 %550 }
  0xe1   : > { %8047 = vst [vmem:[#allocation90_spill] sm:$0xff] %v4486_v62  ;;  %8048 = vst [vmem:[#allocation91_spill] sm:$0xff] %v4488_v58  ;;  %875 = vperm.xlu1 %3797, %v4481_v0   ;;  %870 = vperm.xlu0 %3796, %v4484_v63   ;;  %v4505_v58 = vld [vmem:[%s3994_s25 + $0x358] sm:$0xff]  ;;  %v4508_v62 = vld [vmem:[%s3994_s25 + $0x350] sm:$0xff] }
  0xe2   : > { %8053 = vst [vmem:[#allocation96_spill] sm:$0xff] %v4505_v58  ;;  %8054 = vst [vmem:[#allocation97_spill] sm:$0xff] %v4508_v62 }
  0xe4   : > { %v4498_v61 = vpop.permute.xlu1 %565  ;;  %v4500_v57 = vpop.permute.xlu0 %560 }
  0xe5   : > { %8051 = vst [vmem:[#allocation94_spill] sm:$0xff] %v4498_v61  ;;  %8052 = vst [vmem:[#allocation95_spill] sm:$0xff] %v4500_v57  ;;  %885 = vperm.xlu1 %3797, %v4493_v60   ;;  %880 = vperm.xlu0 %3796, %v4496_v59   ;;  %v4517_v57 = vld [vmem:[%s3994_s25 + $0x368] sm:$0xff]  ;;  %v4520_v61 = vld [vmem:[%s3994_s25 + $0x360] sm:$0xff] }
  0xe6   : > { %8057 = vst [vmem:[#allocation100_spill] sm:$0xff] %v4517_v57  ;;  %8058 = vst [vmem:[#allocation101_spill] sm:$0xff] %v4520_v61 }
  0xe8   : > { %v4510_v0 = vpop.permute.xlu1 %575  ;;  %v4512_v63 = vpop.permute.xlu0 %570 }
  0xe9   : > { %8055 = vst [vmem:[#allocation98_spill] sm:$0xff] %v4510_v0  ;;  %8056 = vst [vmem:[#allocation99_spill] sm:$0xff] %v4512_v63  ;;  %895 = vperm.xlu1 %3797, %v4505_v58   ;;  %890 = vperm.xlu0 %3796, %v4508_v62   ;;  %v4529_v63 = vld [vmem:[%s3994_s25 + $0x378] sm:$0xff]  ;;  %v4532_v0 = vld [vmem:[%s3994_s25 + $0x370] sm:$0xff] }
  0xea   : > { %8061 = vst [vmem:[#allocation104_spill] sm:$0xff] %v4529_v63  ;;  %8062 = vst [vmem:[#allocation105_spill] sm:$0xff] %v4532_v0 }
  0xec   : > { %v4522_v60 = vpop.permute.xlu1 %585  ;;  %v4524_v59 = vpop.permute.xlu0 %580 }
  0xed   : > { %8059 = vst [vmem:[#allocation102_spill] sm:$0xff] %v4522_v60  ;;  %8060 = vst [vmem:[#allocation103_spill] sm:$0xff] %v4524_v59  ;;  %905 = vperm.xlu1 %3797, %v4517_v57   ;;  %900 = vperm.xlu0 %3796, %v4520_v61   ;;  %v4541_v59 = vld [vmem:[%s3994_s25 + $0x388] sm:$0xff]  ;;  %v4544_v60 = vld [vmem:[%s3994_s25 + $0x380] sm:$0xff] }
  0xee   : > { %8065 = vst [vmem:[#allocation108_spill] sm:$0xff] %v4541_v59  ;;  %8066 = vst [vmem:[#allocation109_spill] sm:$0xff] %v4544_v60 }
  0xf0   : > { %v4534_v58 = vpop.permute.xlu1 %595  ;;  %v4536_v62 = vpop.permute.xlu0 %590 }
  0xf1   : > { %8063 = vst [vmem:[#allocation106_spill] sm:$0xff] %v4534_v58  ;;  %8064 = vst [vmem:[#allocation107_spill] sm:$0xff] %v4536_v62  ;;  %915 = vperm.xlu1 %3797, %v4529_v63   ;;  %910 = vperm.xlu0 %3796, %v4532_v0   ;;  %v4553_v62 = vld [vmem:[%s3994_s25 + $0x398] sm:$0xff]  ;;  %v4556_v58 = vld [vmem:[%s3994_s25 + $0x390] sm:$0xff] }
  0xf2   : > { %8069 = vst [vmem:[#allocation112_spill] sm:$0xff] %v4553_v62  ;;  %8070 = vst [vmem:[#allocation113_spill] sm:$0xff] %v4556_v58 }
  0xf4   : > { %v4546_v57 = vpop.permute.xlu1 %605  ;;  %v4548_v61 = vpop.permute.xlu0 %600 }
  0xf5   : > { %8067 = vst [vmem:[#allocation110_spill] sm:$0xff] %v4546_v57  ;;  %8068 = vst [vmem:[#allocation111_spill] sm:$0xff] %v4548_v61  ;;  %925 = vperm.xlu1 %3797, %v4541_v59   ;;  %920 = vperm.xlu0 %3796, %v4544_v60   ;;  %v4565_v61 = vld [vmem:[%s3994_s25 + $0x3a8] sm:$0xff]  ;;  %v4568_v57 = vld [vmem:[%s3994_s25 + $0x3a0] sm:$0xff] }
  0xf6   : > { %8073 = vst [vmem:[#allocation116_spill] sm:$0xff] %v4565_v61  ;;  %8074 = vst [vmem:[#allocation117_spill] sm:$0xff] %v4568_v57 }
  0xf8   : > { %v4558_v63 = vpop.permute.xlu1 %615  ;;  %v4560_v0 = vpop.permute.xlu0 %610 }
  0xf9   : > { %8071 = vst [vmem:[#allocation114_spill] sm:$0xff] %v4558_v63  ;;  %8072 = vst [vmem:[#allocation115_spill] sm:$0xff] %v4560_v0  ;;  %935 = vperm.xlu1 %3797, %v4553_v62   ;;  %930 = vperm.xlu0 %3796, %v4556_v58   ;;  %v4577_v0 = vld [vmem:[%s3994_s25 + $0x3b8] sm:$0xff]  ;;  %v4580_v63 = vld [vmem:[%s3994_s25 + $0x3b0] sm:$0xff] }
  0xfa   : > { %8077 = vst [vmem:[#allocation120_spill] sm:$0xff] %v4577_v0  ;;  %8078 = vst [vmem:[#allocation121_spill] sm:$0xff] %v4580_v63 }
  0xfc   : > { %v4570_v59 = vpop.permute.xlu1 %625  ;;  %v4572_v60 = vpop.permute.xlu0 %620 }
  0xfd   : > { %8075 = vst [vmem:[#allocation118_spill] sm:$0xff] %v4570_v59  ;;  %8076 = vst [vmem:[#allocation119_spill] sm:$0xff] %v4572_v60  ;;  %945 = vperm.xlu1 %3797, %v4565_v61   ;;  %940 = vperm.xlu0 %3796, %v4568_v57   ;;  %v4589_v60 = vld [vmem:[%s3994_s25 + $0x3c8] sm:$0xff]  ;;  %v4592_v59 = vld [vmem:[%s3994_s25 + $0x3c0] sm:$0xff] }
  0xfe   : > { %8081 = vst [vmem:[#allocation124_spill] sm:$0xff] %v4589_v60  ;;  %8082 = vst [vmem:[#allocation125_spill] sm:$0xff] %v4592_v59 }
 0x100   : > { %v4582_v62 = vpop.permute.xlu1 %635  ;;  %v4584_v58 = vpop.permute.xlu0 %630 }
 0x101   : > { %8079 = vst [vmem:[#allocation122_spill] sm:$0xff] %v4582_v62  ;;  %8080 = vst [vmem:[#allocation123_spill] sm:$0xff] %v4584_v58  ;;  %955 = vperm.xlu1 %3797, %v4577_v0   ;;  %950 = vperm.xlu0 %3796, %v4580_v63   ;;  %v4601_v58 = vld [vmem:[%s3994_s25 + $0x3d8] sm:$0xff]  ;;  %v4604_v62 = vld [vmem:[%s3994_s25 + $0x3d0] sm:$0xff] }
 0x102   : > { %8085 = vst [vmem:[#allocation128_spill] sm:$0xff] %v4601_v58  ;;  %8086 = vst [vmem:[#allocation129_spill] sm:$0xff] %v4604_v62 }
 0x104   : > { %v4594_v61 = vpop.permute.xlu1 %645  ;;  %v4596_v57 = vpop.permute.xlu0 %640 }
 0x105   : > { %8083 = vst [vmem:[#allocation126_spill] sm:$0xff] %v4594_v61  ;;  %8084 = vst [vmem:[#allocation127_spill] sm:$0xff] %v4596_v57  ;;  %965 = vperm.xlu1 %3797, %v4589_v60   ;;  %960 = vperm.xlu0 %3796, %v4592_v59   ;;  %v4613_v61 = vld [vmem:[%s3994_s25 + $0x3e8] sm:$0xff]  ;;  %v4616_v57 = vld [vmem:[%s3994_s25 + $0x3e0] sm:$0xff] }
 0x106   : > { %8089 = vst [vmem:[#allocation132_spill] sm:$0xff] %v4613_v61  ;;  %v4625_v59 = vld [vmem:[%s3994_s25 + $0x3f8] sm:$0xff] }
 0x108   : > { %v4606_v0 = vpop.permute.xlu1 %655  ;;  %v4608_v63 = vpop.permute.xlu0 %650 }
 0x109   : > { %8087 = vst [vmem:[#allocation130_spill] sm:$0xff] %v4606_v0  ;;  %8088 = vst [vmem:[#allocation131_spill] sm:$0xff] %v4608_v63  ;;  %975 = vperm.xlu1 %3797, %v4601_v58   ;;  %970 = vperm.xlu0 %3796, %v4604_v62   ;;  %v4628_v0 = vld [vmem:[%s3994_s25 + $0x3f0] sm:$0xff] }
 0x10c   : > { %v4618_v55 = vpop.permute.xlu1 %665  ;;  %v4620_v60 = vpop.permute.xlu0 %660 }
 0x10d   : > { %8090 = vst [vmem:[#allocation133_spill] sm:$0xff] %v4618_v55  ;;  %8091 = vst [vmem:[#allocation134_spill] sm:$0xff] %v4620_v60  ;;  %985 = vperm.xlu1 %3797, %v4613_v61   ;;  %980 = vperm.xlu0 %3796, %v4616_v57   ;;  %v3943_v60 = vmov 1  }
 0x110   : > { %v4630_v63 = vpop.permute.xlu1 %675  ;;  %v4632_v58 = vpop.permute.xlu0 %670 }
 0x111   : > { %8092 = vst [vmem:[#allocation135_spill] sm:$0xff] %v4630_v63  ;;  %8093 = vst [vmem:[#allocation136_spill] sm:$0xff] %v4632_v58  ;;  %995 = vperm.xlu1 %3797, %v4625_v59   ;;  %990 = vperm.xlu0 %3796, %v4628_v0  }
 0x114   : > { %v4636_v62 = vpop.permute.xlu1 %685  ;;  %v4638_v55 = vpop.permute.xlu0 %680 }
 0x115   : > { %8094 = vst [vmem:[#allocation137_spill] sm:$0xff] %v4636_v62  ;;  %3799 = vset.pattern.permute.xlu1 %v3943_v60  ;;  %3798 = vset.pattern.permute.xlu0 %v3943_v60 }
 0x116   : > { %1135 = vperm.xlu1 %3799, %v4008_v4   ;;  %1131 = vperm.xlu0 %3798, %v4000_v2  }
 0x118   : > { %v4642_v61 = vpop.permute.xlu1 %695  ;;  %v4644_v63 = vpop.permute.xlu0 %690 }
 0x11a   : > { %1139 = vperm.xlu1 %3799, %v3997_v1   ;;  %1143 = vperm.xlu0 %3798, %v4005_v3  }
 0x11c   : > { %v4648_v58 = vpop.permute.xlu1 %705  ;;  %v4650_v62 = vpop.permute.xlu0 %700 }
 0x11e   : > { %1147 = vperm.xlu1 %3799, %v4016_v6   ;;  %1151 = vperm.xlu0 %3798, %v4013_v5  }
 0x120   : > { %v4654_v60 = vpop.permute.xlu1 %715  ;;  %v4656_v4 = vpop.permute.xlu0 %710 }
 0x122   : > { %1155 = vperm.xlu1 %3799, %v4024_v8   ;;  %1159 = vperm.xlu0 %3798, %v4021_v7  }
 0x124   : > { %v4660_v2 = vpop.permute.xlu1 %725  ;;  %v4662_v1 = vpop.permute.xlu0 %720 }
 0x126   : > { %1163 = vperm.xlu1 %3799, %v4032_v10   ;;  %1167 = vperm.xlu0 %3798, %v4029_v9  }
 0x128   : > { %v4666_v3 = vpop.permute.xlu1 %735  ;;  %v4668_v6 = vpop.permute.xlu0 %730 }
 0x12a   : > { %1171 = vperm.xlu1 %3799, %v4040_v12   ;;  %1175 = vperm.xlu0 %3798, %v4037_v11  }
 0x12c   : > { %v4672_v5 = vpop.permute.xlu1 %745  ;;  %v4674_v8 = vpop.permute.xlu0 %740 }
 0x12e   : > { %1179 = vperm.xlu1 %3799, %v4048_v14   ;;  %1183 = vperm.xlu0 %3798, %v4045_v13  }
 0x130   : > { %v4678_v7 = vpop.permute.xlu1 %755  ;;  %v4680_v10 = vpop.permute.xlu0 %750 }
 0x132   : > { %1187 = vperm.xlu1 %3799, %v4056_v16   ;;  %1191 = vperm.xlu0 %3798, %v4053_v15  }
 0x134   : > { %v4684_v9 = vpop.permute.xlu1 %765  ;;  %v4686_v12 = vpop.permute.xlu0 %760 }
 0x136   : > { %1195 = vperm.xlu1 %3799, %v4064_v18   ;;  %1199 = vperm.xlu0 %3798, %v4061_v17  }
 0x138   : > { %v4690_v11 = vpop.permute.xlu1 %775  ;;  %v4692_v14 = vpop.permute.xlu0 %770 }
 0x13a   : > { %1203 = vperm.xlu1 %3799, %v4072_v20   ;;  %1207 = vperm.xlu0 %3798, %v4069_v19  }
 0x13c   : > { %v4696_v13 = vpop.permute.xlu1 %785  ;;  %v4698_v16 = vpop.permute.xlu0 %780 }
 0x13e   : > { %1211 = vperm.xlu1 %3799, %v4080_v22   ;;  %1215 = vperm.xlu0 %3798, %v4077_v21  }
 0x140   : > { %v4702_v15 = vpop.permute.xlu1 %795  ;;  %v4704_v18 = vpop.permute.xlu0 %790 }
 0x142   : > { %1219 = vperm.xlu1 %3799, %v4088_v24   ;;  %1223 = vperm.xlu0 %3798, %v4085_v23  }
 0x144   : > { %v4708_v17 = vpop.permute.xlu1 %805  ;;  %v4710_v20 = vpop.permute.xlu0 %800 }
 0x146   : > { %1227 = vperm.xlu1 %3799, %v4096_v26   ;;  %1231 = vperm.xlu0 %3798, %v4093_v25  }
 0x148   : > { %v4714_v19 = vpop.permute.xlu1 %815  ;;  %v4716_v22 = vpop.permute.xlu0 %810 }
 0x14a   : > { %1235 = vperm.xlu1 %3799, %v4104_v28   ;;  %1239 = vperm.xlu0 %3798, %v4101_v27  }
 0x14c   : > { %v4720_v21 = vpop.permute.xlu1 %825  ;;  %v4722_v24 = vpop.permute.xlu0 %820 }
 0x14e   : > { %1243 = vperm.xlu1 %3799, %v4112_v30   ;;  %1247 = vperm.xlu0 %3798, %v4109_v29  }
 0x150   : > { %v4726_v23 = vpop.permute.xlu1 %835  ;;  %v4728_v26 = vpop.permute.xlu0 %830 }
 0x152   : > { %1251 = vperm.xlu1 %3799, %v4120_v32   ;;  %1255 = vperm.xlu0 %3798, %v4117_v31  }
 0x154   : > { %v4732_v25 = vpop.permute.xlu1 %845  ;;  %v4734_v28 = vpop.permute.xlu0 %840 }
 0x156   : > { %1259 = vperm.xlu1 %3799, %v4128_v34   ;;  %1263 = vperm.xlu0 %3798, %v4125_v33  }
 0x158   : > { %v4738_v27 = vpop.permute.xlu1 %855  ;;  %v4740_v30 = vpop.permute.xlu0 %850 }
 0x15a   : > { %1267 = vperm.xlu1 %3799, %v4136_v36   ;;  %1271 = vperm.xlu0 %3798, %v4133_v35  }
 0x15c   : > { %v4744_v29 = vpop.permute.xlu1 %865  ;;  %v4746_v32 = vpop.permute.xlu0 %860 }
 0x15e   : > { %1275 = vperm.xlu1 %3799, %v4144_v38   ;;  %1279 = vperm.xlu0 %3798, %v4141_v37  }
 0x160   : > { %v4750_v31 = vpop.permute.xlu1 %875  ;;  %v4752_v34 = vpop.permute.xlu0 %870 }
 0x162   : > { %1283 = vperm.xlu1 %3799, %v4152_v40   ;;  %1287 = vperm.xlu0 %3798, %v4149_v39  }
 0x164   : > { %v4756_v33 = vpop.permute.xlu1 %885  ;;  %v4758_v36 = vpop.permute.xlu0 %880 }
 0x166   : > { %1291 = vperm.xlu1 %3799, %v4160_v42   ;;  %1295 = vperm.xlu0 %3798, %v4157_v41  }
 0x168   : > { %v4762_v35 = vpop.permute.xlu1 %895  ;;  %v4764_v38 = vpop.permute.xlu0 %890 }
 0x16a   : > { %1299 = vperm.xlu1 %3799, %v4168_v44   ;;  %1303 = vperm.xlu0 %3798, %v4165_v43  }
 0x16c   : > { %v4768_v37 = vpop.permute.xlu1 %905  ;;  %v4770_v40 = vpop.permute.xlu0 %900 }
 0x16e   : > { %1307 = vperm.xlu1 %3799, %v4176_v46   ;;  %1311 = vperm.xlu0 %3798, %v4173_v45  }
 0x170   : > { %v4774_v39 = vpop.permute.xlu1 %915  ;;  %v4776_v42 = vpop.permute.xlu0 %910 }
 0x172   : > { %1315 = vperm.xlu1 %3799, %v4184_v48   ;;  %1319 = vperm.xlu0 %3798, %v4181_v47  }
 0x174   : > { %v4780_v41 = vpop.permute.xlu1 %925  ;;  %v4782_v44 = vpop.permute.xlu0 %920 }
 0x176   : > { %1323 = vperm.xlu1 %3799, %v4192_v50   ;;  %1327 = vperm.xlu0 %3798, %v4189_v49   ;;  %v8100_v49 = vld [vmem:[#allocation3_spill] sm:$0xff] }
 0x178   : > { %v4786_v43 = vpop.permute.xlu1 %935  ;;  %v4788_v46 = vpop.permute.xlu0 %930 }
 0x179   : > { %8095 = vst [vmem:[#allocation138_spill] sm:$0xff] %v4788_v46 }
 0x17a   : > { %1331 = vperm.xlu1 %3799, %v4200_v52   ;;  %1335 = vperm.xlu0 %3798, %v4197_v51   ;;  %v8103_v51 = vld [vmem:[#allocation5_spill] sm:$0xff] }
 0x17c   : > { %v4792_v45 = vpop.permute.xlu1 %945  ;;  %v4794_v48 = vpop.permute.xlu0 %940 }
 0x17d   : > { %8096 = vst [vmem:[#allocation139_spill] sm:$0xff] %v4792_v45  ;;  %8097 = vst [vmem:[#allocation140_spill] sm:$0xff] %v4794_v48  ;;  %v8104_v45 = vld [vmem:[#allocation4_spill] sm:$0xff] }
 0x17e   : > { %1339 = vperm.xlu1 %3799, %v4208_v54   ;;  %1343 = vperm.xlu0 %3798, %v4205_v53   ;;  %v8107_v53 = vld [vmem:[#allocation7_spill] sm:$0xff] }
 0x180   : > { %v4798_v47 = vpop.permute.xlu1 %955  ;;  %v4800_v50 = vpop.permute.xlu0 %950 }
 0x181   : > { %8098 = vst [vmem:[#allocation141_spill] sm:$0xff] %v4798_v47  ;;  %8099 = vst [vmem:[#allocation142_spill] sm:$0xff] %v4800_v50  ;;  %v8108_v47 = vld [vmem:[#allocation6_spill] sm:$0xff] }
 0x182   : > { %1347 = vperm.xlu1 %3799, %v4216_v56   ;;  %1351 = vperm.xlu0 %3798, %v8100_v49   ;;  %v8111_v49 = vld [vmem:[#allocation9_spill] sm:$0xff] }
 0x184   : > { %v4804_v46 = vpop.permute.xlu1 %965  ;;  %v4806_v52 = vpop.permute.xlu0 %960 }
 0x185   : > { %8101 = vst [vmem:[#allocation3_spill] sm:$0xff] %v4804_v46  ;;  %8102 = vst [vmem:[#allocation143_spill] sm:$0xff] %v4806_v52  ;;  %v8112_v46 = vld [vmem:[#allocation8_spill] sm:$0xff] }
 0x186   : > { %1355 = vperm.xlu1 %3799, %v8103_v51   ;;  %1359 = vperm.xlu0 %3798, %v8104_v45   ;;  %v8115_v45 = vld [vmem:[#allocation11_spill] sm:$0xff] }
 0x188   : > { %v4810_v48 = vpop.permute.xlu1 %975  ;;  %v4812_v54 = vpop.permute.xlu0 %970 }
 0x189   : > { %8105 = vst [vmem:[#allocation5_spill] sm:$0xff] %v4810_v48  ;;  %8106 = vst [vmem:[#allocation4_spill] sm:$0xff] %v4812_v54  ;;  %v8116_v48 = vld [vmem:[#allocation10_spill] sm:$0xff] }
 0x18a   : > { %1363 = vperm.xlu1 %3799, %v8107_v53   ;;  %1367 = vperm.xlu0 %3798, %v8108_v47   ;;  %v8119_v47 = vld [vmem:[#allocation13_spill] sm:$0xff] }
 0x18c   : > { %v4816_v50 = vpop.permute.xlu1 %985  ;;  %v4818_v56 = vpop.permute.xlu0 %980 }
 0x18d   : > { %8109 = vst [vmem:[#allocation7_spill] sm:$0xff] %v4816_v50  ;;  %8110 = vst [vmem:[#allocation6_spill] sm:$0xff] %v4818_v56  ;;  %v8120_v50 = vld [vmem:[#allocation12_spill] sm:$0xff] }
 0x18e   : > { %1371 = vperm.xlu1 %3799, %v8111_v49   ;;  %1375 = vperm.xlu0 %3798, %v8112_v46   ;;  %v8123_v46 = vld [vmem:[#allocation17_spill] sm:$0xff] }
 0x190   : > { %v4822_v52 = vpop.permute.xlu1 %995  ;;  %v4824_v51 = vpop.permute.xlu0 %990 }
 0x191   : > { %8113 = vst [vmem:[#allocation9_spill] sm:$0xff] %v4822_v52  ;;  %8114 = vst [vmem:[#allocation8_spill] sm:$0xff] %v4824_v51  ;;  %v8124_v52 = vld [vmem:[#allocation16_spill] sm:$0xff] }
 0x192   : > { %1379 = vperm.xlu1 %3799, %v8115_v45   ;;  %1383 = vperm.xlu0 %3798, %v8116_v48   ;;  %v8127_v48 = vld [vmem:[#allocation21_spill] sm:$0xff] }
 0x195   : > { %v4828_v54 = vpop.permute.xlu1 %1135  ;;  %v4830_v53 = vpop.permute.xlu0 %1131 }
 0x196   : > { %8117 = vst [vmem:[#allocation11_spill] sm:$0xff] %v4828_v54  ;;  %8118 = vst [vmem:[#allocation10_spill] sm:$0xff] %v4830_v53  ;;  %1387 = vperm.xlu1 %3799, %v8119_v47   ;;  %1391 = vperm.xlu0 %3798, %v8120_v50   ;;  %v8128_v54 = vld [vmem:[#allocation20_spill] sm:$0xff]  ;;  %v8131_v50 = vld [vmem:[#allocation25_spill] sm:$0xff] }
 0x199   : > { %v4834_v56 = vpop.permute.xlu1 %1139  ;;  %v4836_v49 = vpop.permute.xlu0 %1143 }
 0x19a   : > { %8121 = vst [vmem:[#allocation13_spill] sm:$0xff] %v4834_v56  ;;  %8122 = vst [vmem:[#allocation12_spill] sm:$0xff] %v4836_v49  ;;  %1395 = vperm.xlu1 %3799, %v8123_v46   ;;  %1399 = vperm.xlu0 %3798, %v8124_v52   ;;  %v8132_v56 = vld [vmem:[#allocation24_spill] sm:$0xff]  ;;  %v8135_v52 = vld [vmem:[#allocation29_spill] sm:$0xff] }
 0x19d   : > { %v4840_v51 = vpop.permute.xlu1 %1147  ;;  %v4842_v45 = vpop.permute.xlu0 %1151 }
 0x19e   : > { %8125 = vst [vmem:[#allocation17_spill] sm:$0xff] %v4840_v51  ;;  %8126 = vst [vmem:[#allocation16_spill] sm:$0xff] %v4842_v45  ;;  %1403 = vperm.xlu1 %3799, %v8127_v48   ;;  %1407 = vperm.xlu0 %3798, %v8128_v54   ;;  %v8136_v51 = vld [vmem:[#allocation28_spill] sm:$0xff]  ;;  %v8139_v54 = vld [vmem:[#allocation33_spill] sm:$0xff] }
 0x1a1   : > { %v4846_v53 = vpop.permute.xlu1 %1155  ;;  %v4848_v47 = vpop.permute.xlu0 %1159 }
 0x1a2   : > { %8129 = vst [vmem:[#allocation21_spill] sm:$0xff] %v4846_v53  ;;  %8130 = vst [vmem:[#allocation20_spill] sm:$0xff] %v4848_v47  ;;  %1411 = vperm.xlu1 %3799, %v8131_v50   ;;  %1415 = vperm.xlu0 %3798, %v8132_v56   ;;  %v8140_v53 = vld [vmem:[#allocation32_spill] sm:$0xff]  ;;  %v8143_v56 = vld [vmem:[#allocation37_spill] sm:$0xff] }
 0x1a5   : > { %v4852_v49 = vpop.permute.xlu1 %1163  ;;  %v4854_v46 = vpop.permute.xlu0 %1167 }
 0x1a6   : > { %8133 = vst [vmem:[#allocation25_spill] sm:$0xff] %v4852_v49  ;;  %8134 = vst [vmem:[#allocation24_spill] sm:$0xff] %v4854_v46  ;;  %1419 = vperm.xlu1 %3799, %v8135_v52   ;;  %1423 = vperm.xlu0 %3798, %v8136_v51   ;;  %v8144_v49 = vld [vmem:[#allocation36_spill] sm:$0xff]  ;;  %v8147_v51 = vld [vmem:[#allocation41_spill] sm:$0xff] }
 0x1a9   : > { %v4858_v45 = vpop.permute.xlu1 %1171  ;;  %v4860_v48 = vpop.permute.xlu0 %1175 }
 0x1aa   : > { %8137 = vst [vmem:[#allocation29_spill] sm:$0xff] %v4858_v45  ;;  %8138 = vst [vmem:[#allocation28_spill] sm:$0xff] %v4860_v48  ;;  %1427 = vperm.xlu1 %3799, %v8139_v54   ;;  %1431 = vperm.xlu0 %3798, %v8140_v53   ;;  %v8148_v45 = vld [vmem:[#allocation40_spill] sm:$0xff]  ;;  %v8151_v53 = vld [vmem:[#allocation45_spill] sm:$0xff] }
 0x1ad   : > { %v4864_v47 = vpop.permute.xlu1 %1179  ;;  %v4866_v50 = vpop.permute.xlu0 %1183 }
 0x1ae   : > { %8141 = vst [vmem:[#allocation33_spill] sm:$0xff] %v4864_v47  ;;  %8142 = vst [vmem:[#allocation32_spill] sm:$0xff] %v4866_v50  ;;  %1435 = vperm.xlu1 %3799, %v8143_v56   ;;  %1439 = vperm.xlu0 %3798, %v8144_v49   ;;  %v8152_v47 = vld [vmem:[#allocation44_spill] sm:$0xff]  ;;  %v8155_v49 = vld [vmem:[#allocation49_spill] sm:$0xff] }
 0x1b1   : > { %v4870_v46 = vpop.permute.xlu1 %1187  ;;  %v4872_v52 = vpop.permute.xlu0 %1191 }
 0x1b2   : > { %8145 = vst [vmem:[#allocation37_spill] sm:$0xff] %v4870_v46  ;;  %8146 = vst [vmem:[#allocation36_spill] sm:$0xff] %v4872_v52  ;;  %1443 = vperm.xlu1 %3799, %v8147_v51   ;;  %1447 = vperm.xlu0 %3798, %v8148_v45   ;;  %v8156_v46 = vld [vmem:[#allocation48_spill] sm:$0xff]  ;;  %v8159_v45 = vld [vmem:[#allocation53_spill] sm:$0xff] }
 0x1b5   : > { %v4876_v48 = vpop.permute.xlu1 %1195  ;;  %v4878_v54 = vpop.permute.xlu0 %1199 }
 0x1b6   : > { %8149 = vst [vmem:[#allocation41_spill] sm:$0xff] %v4876_v48  ;;  %8150 = vst [vmem:[#allocation40_spill] sm:$0xff] %v4878_v54  ;;  %1451 = vperm.xlu1 %3799, %v8151_v53   ;;  %1455 = vperm.xlu0 %3798, %v8152_v47   ;;  %v8160_v48 = vld [vmem:[#allocation52_spill] sm:$0xff]  ;;  %v8163_v47 = vld [vmem:[#allocation57_spill] sm:$0xff] }
 0x1b9   : > { %v4882_v50 = vpop.permute.xlu1 %1203  ;;  %v4884_v56 = vpop.permute.xlu0 %1207 }
 0x1ba   : > { %8153 = vst [vmem:[#allocation45_spill] sm:$0xff] %v4882_v50  ;;  %8154 = vst [vmem:[#allocation44_spill] sm:$0xff] %v4884_v56  ;;  %1459 = vperm.xlu1 %3799, %v8155_v49   ;;  %1463 = vperm.xlu0 %3798, %v8156_v46   ;;  %v8164_v50 = vld [vmem:[#allocation56_spill] sm:$0xff]  ;;  %v8167_v46 = vld [vmem:[#allocation61_spill] sm:$0xff] }
 0x1bd   : > { %v4888_v52 = vpop.permute.xlu1 %1211  ;;  %v4890_v51 = vpop.permute.xlu0 %1215 }
 0x1be   : > { %8157 = vst [vmem:[#allocation49_spill] sm:$0xff] %v4888_v52  ;;  %8158 = vst [vmem:[#allocation48_spill] sm:$0xff] %v4890_v51  ;;  %1467 = vperm.xlu1 %3799, %v8159_v45   ;;  %1471 = vperm.xlu0 %3798, %v8160_v48   ;;  %v8168_v52 = vld [vmem:[#allocation60_spill] sm:$0xff]  ;;  %v8171_v48 = vld [vmem:[#allocation65_spill] sm:$0xff] }
 0x1c1   : > { %v4894_v54 = vpop.permute.xlu1 %1219  ;;  %v4896_v53 = vpop.permute.xlu0 %1223 }
 0x1c2   : > { %8161 = vst [vmem:[#allocation53_spill] sm:$0xff] %v4894_v54  ;;  %8162 = vst [vmem:[#allocation52_spill] sm:$0xff] %v4896_v53  ;;  %1475 = vperm.xlu1 %3799, %v8163_v47   ;;  %1479 = vperm.xlu0 %3798, %v8164_v50   ;;  %v8172_v54 = vld [vmem:[#allocation64_spill] sm:$0xff]  ;;  %v8175_v50 = vld [vmem:[#allocation69_spill] sm:$0xff] }
 0x1c5   : > { %v4900_v56 = vpop.permute.xlu1 %1227  ;;  %v4902_v49 = vpop.permute.xlu0 %1231 }
 0x1c6   : > { %8165 = vst [vmem:[#allocation57_spill] sm:$0xff] %v4900_v56  ;;  %8166 = vst [vmem:[#allocation56_spill] sm:$0xff] %v4902_v49  ;;  %1483 = vperm.xlu1 %3799, %v8167_v46   ;;  %1487 = vperm.xlu0 %3798, %v8168_v52   ;;  %v8176_v56 = vld [vmem:[#allocation68_spill] sm:$0xff]  ;;  %v8179_v52 = vld [vmem:[#allocation73_spill] sm:$0xff] }
 0x1c9   : > { %v4906_v51 = vpop.permute.xlu1 %1235  ;;  %v4908_v45 = vpop.permute.xlu0 %1239 }
 0x1ca   : > { %8169 = vst [vmem:[#allocation61_spill] sm:$0xff] %v4906_v51  ;;  %8170 = vst [vmem:[#allocation60_spill] sm:$0xff] %v4908_v45  ;;  %1491 = vperm.xlu1 %3799, %v8171_v48   ;;  %1495 = vperm.xlu0 %3798, %v8172_v54   ;;  %v8180_v51 = vld [vmem:[#allocation72_spill] sm:$0xff]  ;;  %v8183_v54 = vld [vmem:[#allocation77_spill] sm:$0xff] }
 0x1cd   : > { %v4912_v53 = vpop.permute.xlu1 %1243  ;;  %v4914_v47 = vpop.permute.xlu0 %1247 }
 0x1ce   : > { %8173 = vst [vmem:[#allocation65_spill] sm:$0xff] %v4912_v53  ;;  %8174 = vst [vmem:[#allocation64_spill] sm:$0xff] %v4914_v47  ;;  %1499 = vperm.xlu1 %3799, %v8175_v50   ;;  %1503 = vperm.xlu0 %3798, %v8176_v56   ;;  %v8184_v53 = vld [vmem:[#allocation76_spill] sm:$0xff]  ;;  %v8187_v56 = vld [vmem:[#allocation81_spill] sm:$0xff] }
 0x1d1   : > { %v4918_v49 = vpop.permute.xlu1 %1251  ;;  %v4920_v46 = vpop.permute.xlu0 %1255 }
 0x1d2   : > { %8177 = vst [vmem:[#allocation69_spill] sm:$0xff] %v4918_v49  ;;  %8178 = vst [vmem:[#allocation68_spill] sm:$0xff] %v4920_v46  ;;  %1507 = vperm.xlu1 %3799, %v8179_v52   ;;  %1511 = vperm.xlu0 %3798, %v8180_v51   ;;  %v8188_v49 = vld [vmem:[#allocation80_spill] sm:$0xff]  ;;  %v8191_v51 = vld [vmem:[#allocation85_spill] sm:$0xff] }
 0x1d5   : > { %v4924_v45 = vpop.permute.xlu1 %1259  ;;  %v4926_v48 = vpop.permute.xlu0 %1263 }
 0x1d6   : > { %8181 = vst [vmem:[#allocation73_spill] sm:$0xff] %v4924_v45  ;;  %8182 = vst [vmem:[#allocation72_spill] sm:$0xff] %v4926_v48  ;;  %1515 = vperm.xlu1 %3799, %v8183_v54   ;;  %1519 = vperm.xlu0 %3798, %v8184_v53   ;;  %v8192_v45 = vld [vmem:[#allocation84_spill] sm:$0xff]  ;;  %v8195_v53 = vld [vmem:[#allocation89_spill] sm:$0xff] }
 0x1d9   : > { %v4930_v47 = vpop.permute.xlu1 %1267  ;;  %v4932_v50 = vpop.permute.xlu0 %1271 }
 0x1da   : > { %8185 = vst [vmem:[#allocation77_spill] sm:$0xff] %v4930_v47  ;;  %8186 = vst [vmem:[#allocation76_spill] sm:$0xff] %v4932_v50  ;;  %1523 = vperm.xlu1 %3799, %v8187_v56   ;;  %1527 = vperm.xlu0 %3798, %v8188_v49   ;;  %v8196_v47 = vld [vmem:[#allocation88_spill] sm:$0xff]  ;;  %v8199_v49 = vld [vmem:[#allocation93_spill] sm:$0xff] }
 0x1dd   : > { %v4936_v46 = vpop.permute.xlu1 %1275  ;;  %v4938_v52 = vpop.permute.xlu0 %1279 }
 0x1de   : > { %8189 = vst [vmem:[#allocation81_spill] sm:$0xff] %v4936_v46  ;;  %8190 = vst [vmem:[#allocation80_spill] sm:$0xff] %v4938_v52  ;;  %1531 = vperm.xlu1 %3799, %v8191_v51   ;;  %1535 = vperm.xlu0 %3798, %v8192_v45   ;;  %v8200_v46 = vld [vmem:[#allocation92_spill] sm:$0xff]  ;;  %v8203_v45 = vld [vmem:[#allocation97_spill] sm:$0xff] }
 0x1e1   : > { %v4942_v48 = vpop.permute.xlu1 %1283  ;;  %v4944_v54 = vpop.permute.xlu0 %1287 }
 0x1e2   : > { %8193 = vst [vmem:[#allocation85_spill] sm:$0xff] %v4942_v48  ;;  %8194 = vst [vmem:[#allocation84_spill] sm:$0xff] %v4944_v54  ;;  %1539 = vperm.xlu1 %3799, %v8195_v53   ;;  %1543 = vperm.xlu0 %3798, %v8196_v47   ;;  %v8204_v48 = vld [vmem:[#allocation96_spill] sm:$0xff]  ;;  %v8207_v47 = vld [vmem:[#allocation101_spill] sm:$0xff] }
 0x1e5   : > { %v4948_v50 = vpop.permute.xlu1 %1291  ;;  %v4950_v56 = vpop.permute.xlu0 %1295 }
 0x1e6   : > { %8197 = vst [vmem:[#allocation89_spill] sm:$0xff] %v4948_v50  ;;  %8198 = vst [vmem:[#allocation88_spill] sm:$0xff] %v4950_v56  ;;  %1547 = vperm.xlu1 %3799, %v8199_v49   ;;  %1551 = vperm.xlu0 %3798, %v8200_v46   ;;  %v8208_v50 = vld [vmem:[#allocation100_spill] sm:$0xff]  ;;  %v8211_v46 = vld [vmem:[#allocation105_spill] sm:$0xff] }
 0x1e9   : > { %v4954_v52 = vpop.permute.xlu1 %1299  ;;  %v4956_v51 = vpop.permute.xlu0 %1303 }
 0x1ea   : > { %8201 = vst [vmem:[#allocation93_spill] sm:$0xff] %v4954_v52  ;;  %8202 = vst [vmem:[#allocation92_spill] sm:$0xff] %v4956_v51  ;;  %1555 = vperm.xlu1 %3799, %v8203_v45   ;;  %1559 = vperm.xlu0 %3798, %v8204_v48   ;;  %v8212_v52 = vld [vmem:[#allocation104_spill] sm:$0xff]  ;;  %v8215_v48 = vld [vmem:[#allocation109_spill] sm:$0xff] }
 0x1ed   : > { %v4960_v54 = vpop.permute.xlu1 %1307  ;;  %v4962_v53 = vpop.permute.xlu0 %1311 }
 0x1ee   : > { %8205 = vst [vmem:[#allocation97_spill] sm:$0xff] %v4960_v54  ;;  %8206 = vst [vmem:[#allocation96_spill] sm:$0xff] %v4962_v53  ;;  %1563 = vperm.xlu1 %3799, %v8207_v47   ;;  %1567 = vperm.xlu0 %3798, %v8208_v50   ;;  %v8216_v54 = vld [vmem:[#allocation108_spill] sm:$0xff]  ;;  %v8219_v50 = vld [vmem:[#allocation113_spill] sm:$0xff] }
 0x1f1   : > { %v4966_v56 = vpop.permute.xlu1 %1315  ;;  %v4968_v49 = vpop.permute.xlu0 %1319 }
 0x1f2   : > { %8209 = vst [vmem:[#allocation101_spill] sm:$0xff] %v4966_v56  ;;  %8210 = vst [vmem:[#allocation100_spill] sm:$0xff] %v4968_v49  ;;  %1571 = vperm.xlu1 %3799, %v8211_v46   ;;  %1575 = vperm.xlu0 %3798, %v8212_v52   ;;  %v8220_v56 = vld [vmem:[#allocation112_spill] sm:$0xff]  ;;  %v8223_v52 = vld [vmem:[#allocation117_spill] sm:$0xff] }
 0x1f5   : > { %v4972_v51 = vpop.permute.xlu1 %1323  ;;  %v4974_v45 = vpop.permute.xlu0 %1327 }
 0x1f6   : > { %8213 = vst [vmem:[#allocation105_spill] sm:$0xff] %v4972_v51  ;;  %8214 = vst [vmem:[#allocation104_spill] sm:$0xff] %v4974_v45  ;;  %1579 = vperm.xlu1 %3799, %v8215_v48   ;;  %1583 = vperm.xlu0 %3798, %v8216_v54   ;;  %v8224_v51 = vld [vmem:[#allocation116_spill] sm:$0xff]  ;;  %v8227_v54 = vld [vmem:[#allocation121_spill] sm:$0xff] }
 0x1f9   : > { %v4978_v53 = vpop.permute.xlu1 %1331  ;;  %v4980_v47 = vpop.permute.xlu0 %1335 }
 0x1fa   : > { %8217 = vst [vmem:[#allocation109_spill] sm:$0xff] %v4978_v53  ;;  %8218 = vst [vmem:[#allocation108_spill] sm:$0xff] %v4980_v47  ;;  %1587 = vperm.xlu1 %3799, %v8219_v50   ;;  %1591 = vperm.xlu0 %3798, %v8220_v56   ;;  %v8228_v53 = vld [vmem:[#allocation120_spill] sm:$0xff]  ;;  %v8231_v56 = vld [vmem:[#allocation125_spill] sm:$0xff] }
 0x1fd   : > { %v4984_v49 = vpop.permute.xlu1 %1339  ;;  %v4986_v46 = vpop.permute.xlu0 %1343 }
 0x1fe   : > { %8221 = vst [vmem:[#allocation113_spill] sm:$0xff] %v4984_v49  ;;  %8222 = vst [vmem:[#allocation112_spill] sm:$0xff] %v4986_v46  ;;  %1595 = vperm.xlu1 %3799, %v8223_v52   ;;  %1599 = vperm.xlu0 %3798, %v8224_v51   ;;  %v8232_v49 = vld [vmem:[#allocation124_spill] sm:$0xff]  ;;  %v8235_v51 = vld [vmem:[#allocation129_spill] sm:$0xff] }
 0x201   : > { %v4990_v45 = vpop.permute.xlu1 %1347  ;;  %v4992_v48 = vpop.permute.xlu0 %1351 }
 0x202   : > { %8225 = vst [vmem:[#allocation117_spill] sm:$0xff] %v4990_v45  ;;  %8226 = vst [vmem:[#allocation116_spill] sm:$0xff] %v4992_v48  ;;  %1603 = vperm.xlu1 %3799, %v8227_v54   ;;  %1607 = vperm.xlu0 %3798, %v8228_v53   ;;  %v8236_v48 = vld [vmem:[#allocation128_spill] sm:$0xff] }
 0x205   : > { %v4996_v47 = vpop.permute.xlu1 %1355  ;;  %v4998_v50 = vpop.permute.xlu0 %1359 }
 0x206   : > { %8229 = vst [vmem:[#allocation121_spill] sm:$0xff] %v4996_v47  ;;  %8230 = vst [vmem:[#allocation120_spill] sm:$0xff] %v4998_v50  ;;  %1611 = vperm.xlu1 %3799, %v8231_v56   ;;  %1615 = vperm.xlu0 %3798, %v8232_v49   ;;  %v8239_v50 = vld [vmem:[#allocation132_spill] sm:$0xff] }
 0x207   : > { %v3872_v47 = vld [vmem:[%s3994_s25 + $0x228] sm:$0xff] }
 0x209   : > { %v5002_v46 = vpop.permute.xlu1 %1363  ;;  %v5004_v52 = vpop.permute.xlu0 %1367 }
 0x20a   : > { %8233 = vst [vmem:[#allocation125_spill] sm:$0xff] %v5002_v46  ;;  %8234 = vst [vmem:[#allocation124_spill] sm:$0xff] %v5004_v52  ;;  %1619 = vperm.xlu1 %3799, %v8235_v51   ;;  %1623 = vperm.xlu0 %3798, %v8236_v48   ;;  %v3870_v52 = vld [vmem:[%s3994_s25 + $0x218] sm:$0xff] }
 0x20d   : > { %v5008_v54 = vpop.permute.xlu1 %1371  ;;  %v5010_v53 = vpop.permute.xlu0 %1375 }
 0x20e   : > { %8237 = vst [vmem:[#allocation129_spill] sm:$0xff] %v5008_v54  ;;  %8238 = vst [vmem:[#allocation128_spill] sm:$0xff] %v5010_v53  ;;  %1627 = vperm.xlu1 %3799, %v4616_v57   ;;  %1631 = vperm.xlu0 %3798, %v8239_v50   ;;  %v3944_v53 = vmov 2   ;;  %v3802_v57 = vld [vmem:[%s3994_s25] sm:$0xff]  ;;  %v3803_v50 = vld [vmem:[%s3994_s25 + $0x8] sm:$0xff] }
 0x211   : > { %v5014_v49 = vpop.permute.xlu1 %1379  ;;  %v5016_v56 = vpop.permute.xlu0 %1383 }
 0x212   : > { %8240 = vst [vmem:[#allocation132_spill] sm:$0xff] %v5014_v49  ;;  %8241 = vst [vmem:[#allocation144_spill] sm:$0xff] %v5016_v56  ;;  %1635 = vperm.xlu1 %3799, %v4628_v0   ;;  %1639 = vperm.xlu0 %3798, %v4625_v59   ;;  %v3804_v59 = vld [vmem:[%s3994_s25 + $0x10] sm:$0xff] }
 0x215   : > { %v5020_v48 = vpop.permute.xlu1 %1387  ;;  %v5022_v51 = vpop.permute.xlu0 %1391 }
 0x216   : > { %8242 = vst [vmem:[#allocation145_spill] sm:$0xff] %v5020_v48  ;;  %8243 = vst [vmem:[#allocation146_spill] sm:$0xff] %v5022_v51  ;;  %3800 = vset.pattern.permute.xlu1 %v3944_v53  ;;  %3801 = vset.pattern.permute.xlu0 %v3944_v53  ;;  %v3805_v48 = vld [vmem:[%s3994_s25 + $0x20] sm:$0xff]  ;;  %v3806_v53 = vld [vmem:[%s3994_s25 + $0x18] sm:$0xff] }
 0x217   : > { %1903 = vperm.xlu1 %3800, %v3802_v57   ;;  %1907 = vperm.xlu0 %3801, %v3803_v50   ;;  %v3807_v57 = vld [vmem:[%s3994_s25 + $0x30] sm:$0xff] }
 0x219   : > { %v5026_v56 = vpop.permute.xlu1 %1395  ;;  %v5028_v0 = vpop.permute.xlu0 %1399 }
 0x21a   : > { %8244 = vst [vmem:[#allocation147_spill] sm:$0xff] %v5026_v56  ;;  %8245 = vst [vmem:[#allocation148_spill] sm:$0xff] %v5028_v0  ;;  %v3808_v0 = vld [vmem:[%s3994_s25 + $0x28] sm:$0xff] }
 0x21b   : > { %1911 = vperm.xlu1 %3800, %v3804_v59   ;;  %1919 = vperm.xlu0 %3801, %v3805_v48   ;;  %v3809_v59 = vld [vmem:[%s3994_s25 + $0x40] sm:$0xff] }
 0x21d   : > { %v5032_v51 = vpop.permute.xlu1 %1403  ;;  %v5034_v49 = vpop.permute.xlu0 %1407 }
 0x21e   : > { %8246 = vst [vmem:[#allocation149_spill] sm:$0xff] %v5032_v51  ;;  %8247 = vst [vmem:[#allocation150_spill] sm:$0xff] %v5034_v49  ;;  %v3810_v49 = vld [vmem:[%s3994_s25 + $0x38] sm:$0xff] }
 0x21f   : > { %1915 = vperm.xlu1 %3800, %v3806_v53   ;;  %1927 = vperm.xlu0 %3801, %v3807_v57   ;;  %v3811_v53 = vld [vmem:[%s3994_s25 + $0x50] sm:$0xff] }
 0x221   : > { %v5038_v50 = vpop.permute.xlu1 %1411  ;;  %v5040_v56 = vpop.permute.xlu0 %1415 }
 0x222   : > { %8248 = vst [vmem:[#allocation151_spill] sm:$0xff] %v5038_v50  ;;  %8249 = vst [vmem:[#allocation152_spill] sm:$0xff] %v5040_v56  ;;  %v3812_v56 = vld [vmem:[%s3994_s25 + $0x48] sm:$0xff] }
 0x223   : > { %1923 = vperm.xlu1 %3800, %v3808_v0   ;;  %1935 = vperm.xlu0 %3801, %v3809_v59   ;;  %v3813_v0 = vld [vmem:[%s3994_s25 + $0x60] sm:$0xff] }
 0x225   : > { %v5044_v48 = vpop.permute.xlu1 %1419  ;;  %v5046_v51 = vpop.permute.xlu0 %1423 }
 0x226   : > { %8250 = vst [vmem:[#allocation153_spill] sm:$0xff] %v5044_v48  ;;  %8251 = vst [vmem:[#allocation154_spill] sm:$0xff] %v5046_v51  ;;  %v3814_v51 = vld [vmem:[%s3994_s25 + $0x58] sm:$0xff] }
 0x227   : > { %1931 = vperm.xlu1 %3800, %v3810_v49   ;;  %1943 = vperm.xlu0 %3801, %v3811_v53   ;;  %v3815_v49 = vld [vmem:[%s3994_s25 + $0x70] sm:$0xff] }
 0x229   : > { %v5050_v57 = vpop.permute.xlu1 %1427  ;;  %v5052_v50 = vpop.permute.xlu0 %1431 }
 0x22a   : > { %8252 = vst [vmem:[#allocation155_spill] sm:$0xff] %v5050_v57  ;;  %8253 = vst [vmem:[#allocation156_spill] sm:$0xff] %v5052_v50  ;;  %v3816_v50 = vld [vmem:[%s3994_s25 + $0x68] sm:$0xff] }
 0x22b   : > { %1939 = vperm.xlu1 %3800, %v3812_v56   ;;  %1951 = vperm.xlu0 %3801, %v3813_v0   ;;  %v3817_v56 = vld [vmem:[%s3994_s25 + $0x80] sm:$0xff] }
 0x22d   : > { %v5056_v59 = vpop.permute.xlu1 %1435  ;;  %v5058_v48 = vpop.permute.xlu0 %1439 }
 0x22e   : > { %8254 = vst [vmem:[#allocation157_spill] sm:$0xff] %v5056_v59  ;;  %8255 = vst [vmem:[#allocation158_spill] sm:$0xff] %v5058_v48  ;;  %v3818_v48 = vld [vmem:[%s3994_s25 + $0x78] sm:$0xff] }
 0x22f   : > { %1947 = vperm.xlu1 %3800, %v3814_v51   ;;  %1959 = vperm.xlu0 %3801, %v3815_v49   ;;  %v3819_v51 = vld [vmem:[%s3994_s25 + $0x90] sm:$0xff] }
 0x231   : > { %v5062_v53 = vpop.permute.xlu1 %1443  ;;  %v5064_v57 = vpop.permute.xlu0 %1447 }
 0x232   : > { %8256 = vst [vmem:[#allocation159_spill] sm:$0xff] %v5062_v53  ;;  %8257 = vst [vmem:[#allocation160_spill] sm:$0xff] %v5064_v57  ;;  %v3820_v57 = vld [vmem:[%s3994_s25 + $0x88] sm:$0xff] }
 0x233   : > { %1955 = vperm.xlu1 %3800, %v3816_v50   ;;  %1967 = vperm.xlu0 %3801, %v3817_v56   ;;  %v3821_v50 = vld [vmem:[%s3994_s25 + $0xa0] sm:$0xff] }
 0x235   : > { %v5068_v0 = vpop.permute.xlu1 %1451  ;;  %v5070_v59 = vpop.permute.xlu0 %1455 }
 0x236   : > { %8258 = vst [vmem:[#allocation161_spill] sm:$0xff] %v5068_v0  ;;  %8259 = vst [vmem:[#allocation162_spill] sm:$0xff] %v5070_v59  ;;  %v3822_v59 = vld [vmem:[%s3994_s25 + $0x98] sm:$0xff] }
 0x237   : > { %1963 = vperm.xlu1 %3800, %v3818_v48   ;;  %1975 = vperm.xlu0 %3801, %v3819_v51   ;;  %v3823_v48 = vld [vmem:[%s3994_s25 + $0xb0] sm:$0xff] }
 0x239   : > { %v5074_v49 = vpop.permute.xlu1 %1459  ;;  %v5076_v53 = vpop.permute.xlu0 %1463 }
 0x23a   : > { %8260 = vst [vmem:[#allocation163_spill] sm:$0xff] %v5074_v49  ;;  %8261 = vst [vmem:[#allocation164_spill] sm:$0xff] %v5076_v53  ;;  %v3824_v53 = vld [vmem:[%s3994_s25 + $0xa8] sm:$0xff] }
 0x23b   : > { %1971 = vperm.xlu1 %3800, %v3820_v57   ;;  %1983 = vperm.xlu0 %3801, %v3821_v50   ;;  %v3825_v57 = vld [vmem:[%s3994_s25 + $0xc0] sm:$0xff] }
 0x23d   : > { %v5080_v56 = vpop.permute.xlu1 %1467  ;;  %v5082_v0 = vpop.permute.xlu0 %1471 }
 0x23e   : > { %8262 = vst [vmem:[#allocation165_spill] sm:$0xff] %v5080_v56  ;;  %8263 = vst [vmem:[#allocation166_spill] sm:$0xff] %v5082_v0  ;;  %v3826_v0 = vld [vmem:[%s3994_s25 + $0xb8] sm:$0xff] }
 0x23f   : > { %1979 = vperm.xlu1 %3800, %v3822_v59   ;;  %1991 = vperm.xlu0 %3801, %v3823_v48   ;;  %v3827_v59 = vld [vmem:[%s3994_s25 + $0xd0] sm:$0xff] }
 0x241   : > { %v5086_v51 = vpop.permute.xlu1 %1475  ;;  %v5088_v49 = vpop.permute.xlu0 %1479 }
 0x242   : > { %8264 = vst [vmem:[#allocation167_spill] sm:$0xff] %v5086_v51  ;;  %8265 = vst [vmem:[#allocation168_spill] sm:$0xff] %v5088_v49  ;;  %v3828_v49 = vld [vmem:[%s3994_s25 + $0xc8] sm:$0xff] }
 0x243   : > { %1987 = vperm.xlu1 %3800, %v3824_v53   ;;  %1999 = vperm.xlu0 %3801, %v3825_v57   ;;  %v3829_v53 = vld [vmem:[%s3994_s25 + $0xe0] sm:$0xff] }
 0x245   : > { %v5092_v50 = vpop.permute.xlu1 %1483  ;;  %v5094_v56 = vpop.permute.xlu0 %1487 }
 0x246   : > { %8266 = vst [vmem:[#allocation169_spill] sm:$0xff] %v5092_v50  ;;  %8267 = vst [vmem:[#allocation170_spill] sm:$0xff] %v5094_v56  ;;  %v3830_v56 = vld [vmem:[%s3994_s25 + $0xd8] sm:$0xff] }
 0x247   : > { %1995 = vperm.xlu1 %3800, %v3826_v0   ;;  %2007 = vperm.xlu0 %3801, %v3827_v59   ;;  %v3831_v0 = vld [vmem:[%s3994_s25 + $0xf0] sm:$0xff] }
 0x249   : > { %v5098_v48 = vpop.permute.xlu1 %1491  ;;  %v5100_v51 = vpop.permute.xlu0 %1495 }
 0x24a   : > { %8268 = vst [vmem:[#allocation171_spill] sm:$0xff] %v5098_v48  ;;  %8269 = vst [vmem:[#allocation172_spill] sm:$0xff] %v5100_v51  ;;  %v3832_v51 = vld [vmem:[%s3994_s25 + $0xe8] sm:$0xff] }
 0x24b   : > { %2003 = vperm.xlu1 %3800, %v3828_v49   ;;  %2015 = vperm.xlu0 %3801, %v3829_v53   ;;  %v3833_v49 = vld [vmem:[%s3994_s25 + $0x100] sm:$0xff] }
 0x24d   : > { %v5104_v57 = vpop.permute.xlu1 %1499  ;;  %v5106_v50 = vpop.permute.xlu0 %1503 }
 0x24e   : > { %8270 = vst [vmem:[#allocation173_spill] sm:$0xff] %v5104_v57  ;;  %8271 = vst [vmem:[#allocation174_spill] sm:$0xff] %v5106_v50  ;;  %v3834_v50 = vld [vmem:[%s3994_s25 + $0xf8] sm:$0xff] }
 0x24f   : > { %2011 = vperm.xlu1 %3800, %v3830_v56   ;;  %2023 = vperm.xlu0 %3801, %v3831_v0   ;;  %v3835_v56 = vld [vmem:[%s3994_s25 + $0x110] sm:$0xff] }
 0x251   : > { %v5110_v59 = vpop.permute.xlu1 %1507  ;;  %v5112_v48 = vpop.permute.xlu0 %1511 }
 0x252   : > { %8272 = vst [vmem:[#allocation175_spill] sm:$0xff] %v5110_v59  ;;  %8273 = vst [vmem:[#allocation176_spill] sm:$0xff] %v5112_v48  ;;  %v3836_v48 = vld [vmem:[%s3994_s25 + $0x108] sm:$0xff] }
 0x253   : > { %2019 = vperm.xlu1 %3800, %v3832_v51   ;;  %2031 = vperm.xlu0 %3801, %v3833_v49   ;;  %v3837_v51 = vld [vmem:[%s3994_s25 + $0x120] sm:$0xff] }
 0x255   : > { %v5116_v53 = vpop.permute.xlu1 %1515  ;;  %v5118_v57 = vpop.permute.xlu0 %1519 }
 0x256   : > { %8274 = vst [vmem:[#allocation177_spill] sm:$0xff] %v5116_v53  ;;  %8275 = vst [vmem:[#allocation178_spill] sm:$0xff] %v5118_v57  ;;  %v3838_v57 = vld [vmem:[%s3994_s25 + $0x118] sm:$0xff] }
 0x257   : > { %2027 = vperm.xlu1 %3800, %v3834_v50   ;;  %2039 = vperm.xlu0 %3801, %v3835_v56   ;;  %v3839_v50 = vld [vmem:[%s3994_s25 + $0x130] sm:$0xff] }
 0x259   : > { %v5122_v0 = vpop.permute.xlu1 %1523  ;;  %v5124_v59 = vpop.permute.xlu0 %1527 }
 0x25a   : > { %8276 = vst [vmem:[#allocation179_spill] sm:$0xff] %v5122_v0  ;;  %8277 = vst [vmem:[#allocation180_spill] sm:$0xff] %v5124_v59  ;;  %v3840_v59 = vld [vmem:[%s3994_s25 + $0x128] sm:$0xff] }
 0x25b   : > { %2035 = vperm.xlu1 %3800, %v3836_v48   ;;  %2047 = vperm.xlu0 %3801, %v3837_v51   ;;  %v3841_v48 = vld [vmem:[%s3994_s25 + $0x140] sm:$0xff] }
 0x25d   : > { %v5128_v49 = vpop.permute.xlu1 %1531  ;;  %v5130_v53 = vpop.permute.xlu0 %1535 }
 0x25e   : > { %8278 = vst [vmem:[#allocation181_spill] sm:$0xff] %v5128_v49  ;;  %8279 = vst [vmem:[#allocation182_spill] sm:$0xff] %v5130_v53  ;;  %v3842_v53 = vld [vmem:[%s3994_s25 + $0x138] sm:$0xff] }
 0x25f   : > { %2043 = vperm.xlu1 %3800, %v3838_v57   ;;  %2055 = vperm.xlu0 %3801, %v3839_v50   ;;  %v3843_v57 = vld [vmem:[%s3994_s25 + $0x150] sm:$0xff] }
 0x261   : > { %v5134_v56 = vpop.permute.xlu1 %1539  ;;  %v5136_v0 = vpop.permute.xlu0 %1543 }
 0x262   : > { %8280 = vst [vmem:[#allocation183_spill] sm:$0xff] %v5134_v56  ;;  %8281 = vst [vmem:[#allocation184_spill] sm:$0xff] %v5136_v0  ;;  %v3844_v0 = vld [vmem:[%s3994_s25 + $0x148] sm:$0xff] }
 0x263   : > { %2051 = vperm.xlu1 %3800, %v3840_v59   ;;  %2063 = vperm.xlu0 %3801, %v3841_v48   ;;  %v3845_v59 = vld [vmem:[%s3994_s25 + $0x160] sm:$0xff] }
 0x265   : > { %v5140_v51 = vpop.permute.xlu1 %1547  ;;  %v5142_v49 = vpop.permute.xlu0 %1551 }
 0x266   : > { %8282 = vst [vmem:[#allocation185_spill] sm:$0xff] %v5140_v51  ;;  %8283 = vst [vmem:[#allocation186_spill] sm:$0xff] %v5142_v49  ;;  %v3846_v49 = vld [vmem:[%s3994_s25 + $0x158] sm:$0xff] }
 0x267   : > { %2059 = vperm.xlu1 %3800, %v3842_v53   ;;  %2071 = vperm.xlu0 %3801, %v3843_v57   ;;  %v3847_v53 = vld [vmem:[%s3994_s25 + $0x170] sm:$0xff] }
 0x269   : > { %v5146_v50 = vpop.permute.xlu1 %1555  ;;  %v5148_v56 = vpop.permute.xlu0 %1559 }
 0x26a   : > { %8284 = vst [vmem:[#allocation187_spill] sm:$0xff] %v5146_v50  ;;  %8285 = vst [vmem:[#allocation188_spill] sm:$0xff] %v5148_v56  ;;  %v3848_v56 = vld [vmem:[%s3994_s25 + $0x168] sm:$0xff] }
 0x26b   : > { %2067 = vperm.xlu1 %3800, %v3844_v0   ;;  %2079 = vperm.xlu0 %3801, %v3845_v59   ;;  %v3849_v0 = vld [vmem:[%s3994_s25 + $0x180] sm:$0xff] }
 0x26d   : > { %v5152_v48 = vpop.permute.xlu1 %1563  ;;  %v5154_v51 = vpop.permute.xlu0 %1567 }
 0x26e   : > { %8286 = vst [vmem:[#allocation189_spill] sm:$0xff] %v5152_v48  ;;  %8287 = vst [vmem:[#allocation190_spill] sm:$0xff] %v5154_v51  ;;  %v3850_v51 = vld [vmem:[%s3994_s25 + $0x178] sm:$0xff] }
 0x26f   : > { %2075 = vperm.xlu1 %3800, %v3846_v49   ;;  %2087 = vperm.xlu0 %3801, %v3847_v53   ;;  %v3851_v49 = vld [vmem:[%s3994_s25 + $0x190] sm:$0xff] }
 0x271   : > { %v5158_v57 = vpop.permute.xlu1 %1571  ;;  %v5160_v50 = vpop.permute.xlu0 %1575 }
 0x272   : > { %8288 = vst [vmem:[#allocation191_spill] sm:$0xff] %v5158_v57  ;;  %8289 = vst [vmem:[#allocation192_spill] sm:$0xff] %v5160_v50  ;;  %v3852_v50 = vld [vmem:[%s3994_s25 + $0x188] sm:$0xff] }
 0x273   : > { %2083 = vperm.xlu1 %3800, %v3848_v56   ;;  %2095 = vperm.xlu0 %3801, %v3849_v0   ;;  %v3853_v56 = vld [vmem:[%s3994_s25 + $0x1a0] sm:$0xff] }
 0x275   : > { %v5164_v59 = vpop.permute.xlu1 %1579  ;;  %v5166_v48 = vpop.permute.xlu0 %1583 }
 0x276   : > { %8290 = vst [vmem:[#allocation193_spill] sm:$0xff] %v5164_v59  ;;  %8291 = vst [vmem:[#allocation194_spill] sm:$0xff] %v5166_v48  ;;  %v3854_v48 = vld [vmem:[%s3994_s25 + $0x198] sm:$0xff] }
 0x277   : > { %2091 = vperm.xlu1 %3800, %v3850_v51   ;;  %2103 = vperm.xlu0 %3801, %v3851_v49   ;;  %v3855_v51 = vld [vmem:[%s3994_s25 + $0x1b0] sm:$0xff] }
 0x279   : > { %v5170_v53 = vpop.permute.xlu1 %1587  ;;  %v5172_v57 = vpop.permute.xlu0 %1591 }
 0x27a   : > { %8292 = vst [vmem:[#allocation195_spill] sm:$0xff] %v5170_v53  ;;  %8293 = vst [vmem:[#allocation196_spill] sm:$0xff] %v5172_v57  ;;  %v3856_v57 = vld [vmem:[%s3994_s25 + $0x1a8] sm:$0xff] }
 0x27b   : > { %2099 = vperm.xlu1 %3800, %v3852_v50   ;;  %2111 = vperm.xlu0 %3801, %v3853_v56   ;;  %v3857_v50 = vld [vmem:[%s3994_s25 + $0x1c0] sm:$0xff] }
 0x27d   : > { %v5176_v0 = vpop.permute.xlu1 %1595  ;;  %v5178_v59 = vpop.permute.xlu0 %1599 }
 0x27e   : > { %8294 = vst [vmem:[#allocation197_spill] sm:$0xff] %v5176_v0  ;;  %8295 = vst [vmem:[#allocation198_spill] sm:$0xff] %v5178_v59  ;;  %v3858_v59 = vld [vmem:[%s3994_s25 + $0x1b8] sm:$0xff] }
 0x27f   : > { %2107 = vperm.xlu1 %3800, %v3854_v48   ;;  %2119 = vperm.xlu0 %3801, %v3855_v51   ;;  %v3859_v48 = vld [vmem:[%s3994_s25 + $0x1d0] sm:$0xff] }
 0x281   : > { %v5182_v49 = vpop.permute.xlu1 %1603  ;;  %v5184_v53 = vpop.permute.xlu0 %1607 }
 0x282   : > { %8296 = vst [vmem:[#allocation199_spill] sm:$0xff] %v5182_v49  ;;  %8297 = vst [vmem:[#allocation200_spill] sm:$0xff] %v5184_v53  ;;  %v3860_v53 = vld [vmem:[%s3994_s25 + $0x1c8] sm:$0xff] }
 0x283   : > { %2115 = vperm.xlu1 %3800, %v3856_v57   ;;  %2127 = vperm.xlu0 %3801, %v3857_v50   ;;  %v3861_v57 = vld [vmem:[%s3994_s25 + $0x1e0] sm:$0xff] }
 0x285   : > { %v5188_v56 = vpop.permute.xlu1 %1611  ;;  %v5190_v0 = vpop.permute.xlu0 %1615 }
 0x286   : > { %8298 = vst [vmem:[#allocation201_spill] sm:$0xff] %v5188_v56  ;;  %8299 = vst [vmem:[#allocation202_spill] sm:$0xff] %v5190_v0  ;;  %v3862_v0 = vld [vmem:[%s3994_s25 + $0x1d8] sm:$0xff] }
 0x287   : > { %2123 = vperm.xlu1 %3800, %v3858_v59   ;;  %2135 = vperm.xlu0 %3801, %v3859_v48   ;;  %v3863_v59 = vld [vmem:[%s3994_s25 + $0x1f0] sm:$0xff] }
 0x289   : > { %v5194_v51 = vpop.permute.xlu1 %1619  ;;  %v5196_v49 = vpop.permute.xlu0 %1623 }
 0x28a   : > { %8300 = vst [vmem:[#allocation203_spill] sm:$0xff] %v5194_v51  ;;  %8301 = vst [vmem:[#allocation204_spill] sm:$0xff] %v5196_v49  ;;  %v3864_v49 = vld [vmem:[%s3994_s25 + $0x1e8] sm:$0xff] }
 0x28b   : > { %2131 = vperm.xlu1 %3800, %v3860_v53   ;;  %2143 = vperm.xlu0 %3801, %v3861_v57   ;;  %v3865_v53 = vld [vmem:[%s3994_s25 + $0x200] sm:$0xff] }
 0x28d   : > { %v5200_v50 = vpop.permute.xlu1 %1627  ;;  %v5202_v56 = vpop.permute.xlu0 %1631 }
 0x28e   : > { %8302 = vst [vmem:[#allocation205_spill] sm:$0xff] %v5200_v50  ;;  %8303 = vst [vmem:[#allocation206_spill] sm:$0xff] %v5202_v56  ;;  %v3866_v56 = vld [vmem:[%s3994_s25 + $0x1f8] sm:$0xff] }
 0x28f   : > { %2139 = vperm.xlu1 %3800, %v3862_v0   ;;  %2151 = vperm.xlu0 %3801, %v3863_v59   ;;  %v3867_v0 = vld [vmem:[%s3994_s25 + $0x210] sm:$0xff] }
 0x291   : > { %v5206_v48 = vpop.permute.xlu1 %1635  ;;  %v5208_v51 = vpop.permute.xlu0 %1639 }
 0x292   : > { %8304 = vst [vmem:[#allocation207_spill] sm:$0xff] %v5206_v48  ;;  %8305 = vst [vmem:[#allocation208_spill] sm:$0xff] %v5208_v51  ;;  %v3868_v51 = vld [vmem:[%s3994_s25 + $0x208] sm:$0xff] }
 0x293   : > { %2147 = vperm.xlu1 %3800, %v3864_v49   ;;  %2159 = vperm.xlu0 %3801, %v3865_v53   ;;  %v3869_v49 = vld [vmem:[%s3994_s25 + $0x220] sm:$0xff] }
 0x296   : > { %v5212_v57 = vpop.permute.xlu1 %1903  ;;  %v5214_v50 = vpop.permute.xlu0 %1907 }
 0x297   : > { %8306 = vst [vmem:[#allocation209_spill] sm:$0xff] %v5212_v57  ;;  %8307 = vst [vmem:[#allocation210_spill] sm:$0xff] %v5214_v50  ;;  %2155 = vperm.xlu1 %3800, %v3866_v56   ;;  %2167 = vperm.xlu0 %3801, %v3867_v0   ;;  %v3871_v56 = vld [vmem:[%s3994_s25 + $0x230] sm:$0xff]  ;;  %v8352_v50 = vld [vmem:[#allocation14_spill] sm:$0xff] }
 0x298   : > { %v8362_v57 = vld [vmem:[#allocation22_spill] sm:$0xff] }
 0x29a   : > { %v5218_v59 = vpop.permute.xlu1 %1911  ;;  %v5220_v48 = vpop.permute.xlu0 %1919 }
 0x29b   : > { %8308 = vst [vmem:[#allocation211_spill] sm:$0xff] %v5218_v59  ;;  %8309 = vst [vmem:[#allocation212_spill] sm:$0xff] %v5220_v48  ;;  %2163 = vperm.xlu1 %3800, %v3868_v51   ;;  %2175 = vperm.xlu0 %3801, %v3869_v49   ;;  %v3873_v51 = vld [vmem:[%s3994_s25 + $0x240] sm:$0xff] }
 0x29e   : > { %v5224_v53 = vpop.permute.xlu1 %1915  ;;  %v5226_v54 = vpop.permute.xlu0 %1927 }
 0x29f   : > { %8310 = vst [vmem:[#allocation213_spill] sm:$0xff] %v5224_v53  ;;  %8311 = vst [vmem:[#allocation214_spill] sm:$0xff] %v5226_v54  ;;  %2171 = vperm.xlu1 %3800, %v3870_v52   ;;  %2183 = vperm.xlu0 %3801, %v3871_v56   ;;  %v3874_v54 = vld [vmem:[%s3994_s25 + $0x238] sm:$0xff]  ;;  %v3875_v52 = vld [vmem:[%s3994_s25 + $0x250] sm:$0xff] }
 0x2a2   : > { %v5230_v0 = vpop.permute.xlu1 %1923  ;;  %v5232_v46 = vpop.permute.xlu0 %1935 }
 0x2a3   : > { %8312 = vst [vmem:[#allocation215_spill] sm:$0xff] %v5230_v0  ;;  %8313 = vst [vmem:[#allocation216_spill] sm:$0xff] %v5232_v46  ;;  %2179 = vperm.xlu1 %3800, %v3872_v47   ;;  %2191 = vperm.xlu0 %3801, %v3873_v51   ;;  %v3876_v46 = vld [vmem:[%s3994_s25 + $0x248] sm:$0xff]  ;;  %v3877_v47 = vld [vmem:[%s3994_s25 + $0x260] sm:$0xff] }
 0x2a6   : > { %v5236_v49 = vpop.permute.xlu1 %1931  ;;  %v5238_v45 = vpop.permute.xlu0 %1943 }
 0x2a7   : > { %8314 = vst [vmem:[#allocation217_spill] sm:$0xff] %v5236_v49  ;;  %8315 = vst [vmem:[#allocation218_spill] sm:$0xff] %v5238_v45  ;;  %2187 = vperm.xlu1 %3800, %v3874_v54   ;;  %2199 = vperm.xlu0 %3801, %v3875_v52   ;;  %v3878_v45 = vld [vmem:[%s3994_s25 + $0x258] sm:$0xff]  ;;  %v3879_v54 = vld [vmem:[%s3994_s25 + $0x270] sm:$0xff] }
 0x2aa   : > { %v5242_v56 = vpop.permute.xlu1 %1939  ;;  %v5244_v48 = vpop.permute.xlu0 %1951 }
 0x2ab   : > { %8316 = vst [vmem:[#allocation219_spill] sm:$0xff] %v5242_v56  ;;  %8317 = vst [vmem:[#allocation220_spill] sm:$0xff] %v5244_v48  ;;  %2195 = vperm.xlu1 %3800, %v3876_v46   ;;  %2207 = vperm.xlu0 %3801, %v3877_v47   ;;  %v3880_v48 = vld [vmem:[%s3994_s25 + $0x268] sm:$0xff]  ;;  %v3881_v46 = vld [vmem:[%s3994_s25 + $0x280] sm:$0xff] }
 0x2ae   : > { %v5248_v51 = vpop.permute.xlu1 %1947  ;;  %v5250_v49 = vpop.permute.xlu0 %1959 }
 0x2af   : > { %8318 = vst [vmem:[#allocation221_spill] sm:$0xff] %v5248_v51  ;;  %8319 = vst [vmem:[#allocation222_spill] sm:$0xff] %v5250_v49  ;;  %2203 = vperm.xlu1 %3800, %v3878_v45   ;;  %2215 = vperm.xlu0 %3801, %v3879_v54   ;;  %v3882_v49 = vld [vmem:[%s3994_s25 + $0x278] sm:$0xff]  ;;  %v3883_v45 = vld [vmem:[%s3994_s25 + $0x290] sm:$0xff] }
 0x2b2   : > { %v5254_v52 = vpop.permute.xlu1 %1955  ;;  %v5256_v56 = vpop.permute.xlu0 %1967 }
 0x2b3   : > { %8320 = vst [vmem:[#allocation223_spill] sm:$0xff] %v5254_v52  ;;  %8321 = vst [vmem:[#allocation224_spill] sm:$0xff] %v5256_v56  ;;  %2211 = vperm.xlu1 %3800, %v3880_v48   ;;  %2223 = vperm.xlu0 %3801, %v3881_v46   ;;  %v3884_v56 = vld [vmem:[%s3994_s25 + $0x288] sm:$0xff]  ;;  %v3885_v48 = vld [vmem:[%s3994_s25 + $0x2a0] sm:$0xff] }
 0x2b6   : > { %v5260_v47 = vpop.permute.xlu1 %1963  ;;  %v5262_v51 = vpop.permute.xlu0 %1975 }
 0x2b7   : > { %8322 = vst [vmem:[#allocation225_spill] sm:$0xff] %v5260_v47  ;;  %8323 = vst [vmem:[#allocation226_spill] sm:$0xff] %v5262_v51  ;;  %2219 = vperm.xlu1 %3800, %v3882_v49   ;;  %2231 = vperm.xlu0 %3801, %v3883_v45   ;;  %v3886_v51 = vld [vmem:[%s3994_s25 + $0x298] sm:$0xff]  ;;  %v3887_v49 = vld [vmem:[%s3994_s25 + $0x2b0] sm:$0xff] }
 0x2ba   : > { %v5266_v54 = vpop.permute.xlu1 %1971  ;;  %v5268_v52 = vpop.permute.xlu0 %1983 }
 0x2bb   : > { %8324 = vst [vmem:[#allocation227_spill] sm:$0xff] %v5266_v54  ;;  %8325 = vst [vmem:[#allocation228_spill] sm:$0xff] %v5268_v52  ;;  %2227 = vperm.xlu1 %3800, %v3884_v56   ;;  %2239 = vperm.xlu0 %3801, %v3885_v48   ;;  %v3888_v52 = vld [vmem:[%s3994_s25 + $0x2a8] sm:$0xff]  ;;  %v3889_v56 = vld [vmem:[%s3994_s25 + $0x2c0] sm:$0xff] }
 0x2be   : > { %v5272_v46 = vpop.permute.xlu1 %1979  ;;  %v5274_v47 = vpop.permute.xlu0 %1991 }
 0x2bf   : > { %8326 = vst [vmem:[#allocation229_spill] sm:$0xff] %v5272_v46  ;;  %8327 = vst [vmem:[#allocation230_spill] sm:$0xff] %v5274_v47  ;;  %2235 = vperm.xlu1 %3800, %v3886_v51   ;;  %2247 = vperm.xlu0 %3801, %v3887_v49   ;;  %v3890_v47 = vld [vmem:[%s3994_s25 + $0x2b8] sm:$0xff]  ;;  %v3891_v51 = vld [vmem:[%s3994_s25 + $0x2d0] sm:$0xff] }
 0x2c2   : > { %v5278_v45 = vpop.permute.xlu1 %1987  ;;  %v5280_v54 = vpop.permute.xlu0 %1999 }
 0x2c3   : > { %8328 = vst [vmem:[#allocation231_spill] sm:$0xff] %v5278_v45  ;;  %8329 = vst [vmem:[#allocation232_spill] sm:$0xff] %v5280_v54  ;;  %2243 = vperm.xlu1 %3800, %v3888_v52   ;;  %2255 = vperm.xlu0 %3801, %v3889_v56   ;;  %v3892_v54 = vld [vmem:[%s3994_s25 + $0x2c8] sm:$0xff]  ;;  %v3893_v52 = vld [vmem:[%s3994_s25 + $0x2e0] sm:$0xff] }
 0x2c6   : > { %v5284_v48 = vpop.permute.xlu1 %1995  ;;  %v5286_v46 = vpop.permute.xlu0 %2007 }
 0x2c7   : > { %8330 = vst [vmem:[#allocation233_spill] sm:$0xff] %v5284_v48  ;;  %8331 = vst [vmem:[#allocation234_spill] sm:$0xff] %v5286_v46  ;;  %2251 = vperm.xlu1 %3800, %v3890_v47   ;;  %2263 = vperm.xlu0 %3801, %v3891_v51   ;;  %v3894_v46 = vld [vmem:[%s3994_s25 + $0x2d8] sm:$0xff]  ;;  %v3895_v47 = vld [vmem:[%s3994_s25 + $0x2f0] sm:$0xff] }
 0x2ca   : > { %v5290_v49 = vpop.permute.xlu1 %2003  ;;  %v5292_v45 = vpop.permute.xlu0 %2015 }
 0x2cb   : > { %8332 = vst [vmem:[#allocation235_spill] sm:$0xff] %v5290_v49  ;;  %8333 = vst [vmem:[#allocation236_spill] sm:$0xff] %v5292_v45  ;;  %2259 = vperm.xlu1 %3800, %v3892_v54   ;;  %2271 = vperm.xlu0 %3801, %v3893_v52   ;;  %v3896_v45 = vld [vmem:[%s3994_s25 + $0x2e8] sm:$0xff]  ;;  %v3897_v54 = vld [vmem:[%s3994_s25 + $0x300] sm:$0xff] }
 0x2ce   : > { %v5296_v56 = vpop.permute.xlu1 %2011  ;;  %v5298_v48 = vpop.permute.xlu0 %2023 }
 0x2cf   : > { %8334 = vst [vmem:[#allocation237_spill] sm:$0xff] %v5296_v56  ;;  %8335 = vst [vmem:[#allocation238_spill] sm:$0xff] %v5298_v48  ;;  %2267 = vperm.xlu1 %3800, %v3894_v46   ;;  %2279 = vperm.xlu0 %3801, %v3895_v47   ;;  %v3898_v48 = vld [vmem:[%s3994_s25 + $0x2f8] sm:$0xff]  ;;  %v3899_v46 = vld [vmem:[%s3994_s25 + $0x310] sm:$0xff] }
 0x2d2   : > { %v5302_v51 = vpop.permute.xlu1 %2019  ;;  %v5304_v49 = vpop.permute.xlu0 %2031 }
 0x2d3   : > { %8336 = vst [vmem:[#allocation239_spill] sm:$0xff] %v5302_v51  ;;  %8337 = vst [vmem:[#allocation240_spill] sm:$0xff] %v5304_v49  ;;  %2275 = vperm.xlu1 %3800, %v3896_v45   ;;  %2287 = vperm.xlu0 %3801, %v3897_v54   ;;  %v3900_v49 = vld [vmem:[%s3994_s25 + $0x308] sm:$0xff]  ;;  %v3901_v45 = vld [vmem:[%s3994_s25 + $0x320] sm:$0xff]  ;;  %v998_v54 = vlaneseq }
 0x2d6   : > { %v5308_v52 = vpop.permute.xlu1 %2027  ;;  %v5310_v56 = vpop.permute.xlu0 %2039 }
 0x2d7   : > { %8338 = vst [vmem:[#allocation241_spill] sm:$0xff] %v5308_v52  ;;  %8339 = vst [vmem:[#allocation242_spill] sm:$0xff] %v5310_v56  ;;  %2283 = vperm.xlu1 %3800, %v3898_v48   ;;  %2295 = vperm.xlu0 %3801, %v3899_v46   ;;  %v3902_v56 = vld [vmem:[%s3994_s25 + $0x318] sm:$0xff]  ;;  %v3903_v48 = vld [vmem:[%s3994_s25 + $0x330] sm:$0xff]  ;;  %v5326_v46 = vshrl.u32 %v998_v54, 7 }
 0x2d8   : > { %v5342_v54 = vld [vmem:[%s7883_s1] sm:$0x7] }
 0x2d9   : > { %8344 = vst [vmem:[#allocation247_spill] sm:$0xff] %v5326_v46 }
 0x2da   : > { %v5314_v47 = vpop.permute.xlu1 %2035  ;;  %v5316_v51 = vpop.permute.xlu0 %2047 }
 0x2db   : > { %8340 = vst [vmem:[#allocation243_spill] sm:$0xff] %v5314_v47  ;;  %8341 = vst [vmem:[#allocation244_spill] sm:$0xff] %v5316_v51  ;;  %2291 = vperm.xlu1 %3800, %v3900_v49   ;;  %2303 = vperm.xlu0 %3801, %v3901_v45   ;;  %v3904_v49 = vld [vmem:[%s3994_s25 + $0x328] sm:$0xff]  ;;  %v3905_v45 = vld [vmem:[%s3994_s25 + $0x340] sm:$0xff] }
 0x2de   : > { %v5320_v0 = vpop.permute.xlu1 %2043  ;;  %v5322_v52 = vpop.permute.xlu0 %2055 }
 0x2df   : > { %8342 = vst [vmem:[#allocation245_spill] sm:$0xff] %v5320_v0  ;;  %8343 = vst [vmem:[#allocation246_spill] sm:$0xff] %v5322_v52  ;;  %2299 = vperm.xlu1 %3800, %v3902_v56   ;;  %2311 = vperm.xlu0 %3801, %v3903_v48   ;;  %v1000_v52 = vsub.s32 0, %v5326_v46  ;;  %v3906_v48 = vld [vmem:[%s3994_s25 + $0x338] sm:$0xff] }
 0x2e2   : > { %v5328_v47 = vpop.permute.xlu1 %2051  ;;  %v5330_v51 = vpop.permute.xlu0 %2063 }
 0x2e3   : > { %8345 = vst [vmem:[#allocation248_spill] sm:$0xff] %v5328_v47  ;;  %8346 = vst [vmem:[#allocation249_spill] sm:$0xff] %v5330_v51  ;;  %2307 = vperm.xlu1 %3800, %v3904_v49   ;;  %2319 = vperm.xlu0 %3801, %v3905_v45   ;;  %v3907_v51 = vld [vmem:[%s3994_s25 + $0x350] sm:$0xff]  ;;  %v5347_v49 = vrot.slane %v5342_v54, %v1000_v52  ;;  %v8356_v52 = vld [vmem:[#allocation18_spill] sm:$0xff] }
 0x2e5   : > { %8349 = vst [vmem:[#allocation252_spill] sm:$0xff] %v5347_v49  ;;  %v5357_v53 = vmul.f32 %v5347_v49, %v8352_v50  ;;  %v5365_v59 = vmul.f32 %v5347_v49, %v8356_v52  ;;  %v5377_v50 = vmul.f32 %v5347_v49, %v8362_v57  ;;  %v8372_v57 = vld [vmem:[#allocation31_spill] sm:$0xff] }
 0x2e6   : > { %v5335_v0 = vpop.permute.xlu1 %2059  ;;  %v5337_v56 = vpop.permute.xlu0 %2071 }
 0x2e7   : > { %8347 = vst [vmem:[#allocation250_spill] sm:$0xff] %v5335_v0  ;;  %8348 = vst [vmem:[#allocation251_spill] sm:$0xff] %v5337_v56  ;;  %2315 = vperm.xlu1 %3800, %v3906_v48   ;;  %2327 = vperm.xlu0 %3801, %v3907_v51   ;;  %v3908_v0 = vld [vmem:[%s3994_s25 + $0x348] sm:$0xff]  ;;  %v3909_v56 = vld [vmem:[%s3994_s25 + $0x360] sm:$0xff] }
 0x2e8   : > { %8353 = vst [vmem:[#allocation14_spill] sm:$0xff] %v5357_v53  ;;  %v8354_v48 = vld [vmem:[#allocation15_spill] sm:$0xff]  ;;  %8357 = vst [vmem:[#allocation18_spill] sm:$0xff] %v5365_v59  ;;  %v3910_v59 = vld [vmem:[%s3994_s25 + $0x358] sm:$0xff] }
 0x2e9   : > { %v5361_v51 = vmul.f32 %v5347_v49, %v8354_v48  ;;  %8363 = vst [vmem:[#allocation22_spill] sm:$0xff] %v5377_v50  ;;  %v8364_v53 = vld [vmem:[#allocation23_spill] sm:$0xff]  ;;  %v5398_v50 = vmul.f32 %v5347_v49, %v8372_v57  ;;  %v8382_v57 = vld [vmem:[#allocation42_spill] sm:$0xff] }
 0x2ea   : > { %v5349_v45 = vpop.permute.xlu1 %2067  ;;  %v5351_v47 = vpop.permute.xlu0 %2079  ;;  %v5381_v48 = vmul.f32 %v5347_v49, %v8364_v53  ;;  %v8374_v53 = vld [vmem:[#allocation34_spill] sm:$0xff] }
 0x2eb   : > { %8350 = vst [vmem:[#allocation253_spill] sm:$0xff] %v5349_v45  ;;  %8351 = vst [vmem:[#allocation254_spill] sm:$0xff] %v5351_v47  ;;  %2323 = vperm.xlu1 %3800, %v3908_v0   ;;  %2335 = vperm.xlu0 %3801, %v3909_v56   ;;  %v8360_v0 = vld [vmem:[#allocation19_spill] sm:$0xff] }
 0x2ec   : > { %8355 = vst [vmem:[#allocation15_spill] sm:$0xff] %v5361_v51  ;;  %v5373_v56 = vmul.f32 %v5347_v49, %v8360_v0  ;;  %8365 = vst [vmem:[#allocation23_spill] sm:$0xff] %v5381_v48  ;;  %v8366_v51 = vld [vmem:[#allocation26_spill] sm:$0xff]  ;;  %v5402_v48 = vmul.f32 %v5347_v49, %v8374_v53  ;;  %v8384_v53 = vld [vmem:[#allocation43_spill] sm:$0xff] }
 0x2ed   : > { %v5385_v52 = vmul.f32 %v5347_v49, %v8366_v51  ;;  %v8370_v0 = vld [vmem:[#allocation30_spill] sm:$0xff]  ;;  %8373 = vst [vmem:[#allocation31_spill] sm:$0xff] %v5398_v50  ;;  %v3911_v51 = vld [vmem:[%s3994_s25 + $0x370] sm:$0xff]  ;;  %v5419_v50 = vmul.f32 %v5347_v49, %v8382_v57 }
 0x2ee   : > { %v5367_v45 = vpop.permute.xlu1 %2075  ;;  %v5369_v47 = vpop.permute.xlu0 %2087  ;;  %8361 = vst [vmem:[#allocation19_spill] sm:$0xff] %v5373_v56  ;;  %v5394_v56 = vmul.f32 %v5347_v49, %v8370_v0  ;;  %8375 = vst [vmem:[#allocation34_spill] sm:$0xff] %v5402_v48  ;;  %v8380_v0 = vld [vmem:[#allocation39_spill] sm:$0xff]  ;;  %v5423_v48 = vmul.f32 %v5347_v49, %v8384_v53 }
 0x2ef   : > { %8358 = vst [vmem:[#allocation255_spill] sm:$0xff] %v5367_v45  ;;  %8359 = vst [vmem:[#allocation256_spill] sm:$0xff] %v5369_v47  ;;  %2331 = vperm.xlu1 %3800, %v3910_v59   ;;  %v8368_v45 = vld [vmem:[#allocation27_spill] sm:$0xff]  ;;  %2343 = vperm.xlu0 %3801, %v3911_v51   ;;  %v8386_v51 = vld [vmem:[#allocation46_spill] sm:$0xff] }
 0x2f0   : > { %8367 = vst [vmem:[#allocation26_spill] sm:$0xff] %v5385_v52  ;;  %v5390_v47 = vmul.f32 %v5347_v49, %v8368_v45  ;;  %8371 = vst [vmem:[#allocation30_spill] sm:$0xff] %v5394_v56  ;;  %v8376_v59 = vld [vmem:[#allocation35_spill] sm:$0xff]  ;;  %v8378_v45 = vld [vmem:[#allocation38_spill] sm:$0xff]  ;;  %v5415_v56 = vmul.f32 %v5347_v49, %v8380_v0 }
 0x2f1   : > { %v5407_v52 = vmul.f32 %v5347_v49, %v8376_v59  ;;  %8383 = vst [vmem:[#allocation42_spill] sm:$0xff] %v5419_v50  ;;  %8385 = vst [vmem:[#allocation43_spill] sm:$0xff] %v5423_v48  ;;  %v5427_v59 = vmul.f32 %v5347_v49, %v8386_v51  ;;  %v8394_v50 = vld [vmem:[#allocation51_spill] sm:$0xff]  ;;  %v8396_v48 = vld [vmem:[#allocation54_spill] sm:$0xff] }
 0x2f2   : > { %8369 = vst [vmem:[#allocation27_spill] sm:$0xff] %v5390_v47  ;;  %v5411_v47 = vmul.f32 %v5347_v49, %v8378_v45  ;;  %8381 = vst [vmem:[#allocation39_spill] sm:$0xff] %v5415_v56  ;;  %v5437_v56 = vpop.permute.xlu1 %2083  ;;  %v5439_v57 = vpop.permute.xlu0 %2095  ;;  %v5443_v53 = vmul.f32 %v5347_v49, %v8394_v50  ;;  %v5447_v51 = vmul.f32 %v5347_v49, %v8396_v48  ;;  %v8404_v50 = vld [vmem:[#allocation62_spill] sm:$0xff]  ;;  %v8406_v48 = vld [vmem:[#allocation63_spill] sm:$0xff] }
 0x2f3   : > { %8377 = vst [vmem:[#allocation35_spill] sm:$0xff] %v5407_v52  ;;  %8387 = vst [vmem:[#allocation46_spill] sm:$0xff] %v5427_v59  ;;  %v8388_v52 = vld [vmem:[#allocation47_spill] sm:$0xff] }
 0x2f4   : > { %8379 = vst [vmem:[#allocation38_spill] sm:$0xff] %v5411_v47  ;;  %v5431_v45 = vmul.f32 %v5347_v49, %v8388_v52  ;;  %v8390_v47 = vld [vmem:[#allocation50_spill] sm:$0xff]  ;;  %8392 = vst [vmem:[#allocation257_spill] sm:$0xff] %v5437_v56  ;;  %v8398_v59 = vld [vmem:[#allocation55_spill] sm:$0xff] }
 0x2f5   : > { %v5435_v0 = vmul.f32 %v5347_v49, %v8390_v47  ;;  %8393 = vst [vmem:[#allocation258_spill] sm:$0xff] %v5439_v57  ;;  %8395 = vst [vmem:[#allocation51_spill] sm:$0xff] %v5443_v53  ;;  %v5451_v52 = vmul.f32 %v5347_v49, %v8398_v59  ;;  %v8402_v56 = vld [vmem:[#allocation59_spill] sm:$0xff]  ;;  %v5464_v53 = vmul.f32 %v5347_v49, %v8404_v50  ;;  %v8408_v59 = vld [vmem:[#allocation66_spill] sm:$0xff] }
 0x2f6   : > { %8389 = vst [vmem:[#allocation47_spill] sm:$0xff] %v5431_v45  ;;  %8397 = vst [vmem:[#allocation54_spill] sm:$0xff] %v5447_v51  ;;  %v8400_v45 = vld [vmem:[#allocation58_spill] sm:$0xff]  ;;  %v5460_v57 = vmul.f32 %v5347_v49, %v8402_v56  ;;  %v5468_v51 = vmul.f32 %v5347_v49, %v8406_v48  ;;  %v8414_v50 = vld [vmem:[#allocation71_spill] sm:$0xff] }
 0x2f7   : > { %8391 = vst [vmem:[#allocation50_spill] sm:$0xff] %v5435_v0  ;;  %8399 = vst [vmem:[#allocation55_spill] sm:$0xff] %v5451_v52  ;;  %v5455_v47 = vmul.f32 %v5347_v49, %v8400_v45  ;;  %v3912_v0 = vld [vmem:[%s3994_s25 + $0x368] sm:$0xff]  ;;  %v5472_v52 = vmul.f32 %v5347_v49, %v8408_v59  ;;  %v3913_v45 = vld [vmem:[%s3994_s25 + $0x380] sm:$0xff] }
 0x2f8   : > { %2339 = vperm.xlu1 %3800, %v3912_v0   ;;  %8403 = vst [vmem:[#allocation59_spill] sm:$0xff] %v5460_v57  ;;  %8405 = vst [vmem:[#allocation62_spill] sm:$0xff] %v5464_v53  ;;  %2351 = vperm.xlu0 %3801, %v3913_v45   ;;  %v8410_v0 = vld [vmem:[#allocation67_spill] sm:$0xff]  ;;  %v8412_v56 = vld [vmem:[#allocation70_spill] sm:$0xff]  ;;  %v5485_v53 = vmul.f32 %v5347_v49, %v8414_v50 }
 0x2f9   : > { %8401 = vst [vmem:[#allocation58_spill] sm:$0xff] %v5455_v47  ;;  %8407 = vst [vmem:[#allocation63_spill] sm:$0xff] %v5468_v51  ;;  %v5477_v47 = vmul.f32 %v5347_v49, %v8410_v0  ;;  %v5481_v57 = vmul.f32 %v5347_v49, %v8412_v56  ;;  %v8416_v48 = vld [vmem:[#allocation74_spill] sm:$0xff]  ;;  %v8418_v59 = vld [vmem:[#allocation75_spill] sm:$0xff] }
 0x2fa   : > { %8409 = vst [vmem:[#allocation66_spill] sm:$0xff] %v5472_v52  ;;  %8415 = vst [vmem:[#allocation71_spill] sm:$0xff] %v5485_v53  ;;  %v5489_v51 = vmul.f32 %v5347_v49, %v8416_v48  ;;  %v5493_v52 = vmul.f32 %v5347_v49, %v8418_v59  ;;  %v8420_v45 = vld [vmem:[#allocation78_spill] sm:$0xff]  ;;  %v5507_v53 = vpop.permute.xlu1 %2091  ;;  %v5509_v48 = vpop.permute.xlu0 %2103 }
 0x2fb   : > { %8411 = vst [vmem:[#allocation67_spill] sm:$0xff] %v5477_v47  ;;  %8413 = vst [vmem:[#allocation70_spill] sm:$0xff] %v5481_v57  ;;  %v5497_v0 = vmul.f32 %v5347_v49, %v8420_v45  ;;  %v8422_v47 = vld [vmem:[#allocation79_spill] sm:$0xff]  ;;  %v8424_v57 = vld [vmem:[#allocation82_spill] sm:$0xff] }
 0x2fc   : > { %8417 = vst [vmem:[#allocation74_spill] sm:$0xff] %v5489_v51  ;;  %8419 = vst [vmem:[#allocation75_spill] sm:$0xff] %v5493_v52  ;;  %v5501_v56 = vmul.f32 %v5347_v49, %v8422_v47  ;;  %v5505_v50 = vmul.f32 %v5347_v49, %v8424_v57  ;;  %v8428_v51 = vld [vmem:[#allocation83_spill] sm:$0xff]  ;;  %v8430_v52 = vld [vmem:[#allocation86_spill] sm:$0xff] }
 0x2fd   : > { %8421 = vst [vmem:[#allocation78_spill] sm:$0xff] %v5497_v0  ;;  %8426 = vst [vmem:[#allocation259_spill] sm:$0xff] %v5507_v53  ;;  %v5513_v59 = vmul.f32 %v5347_v49, %v8428_v51  ;;  %v5517_v45 = vmul.f32 %v5347_v49, %v8430_v52  ;;  %v8432_v0 = vld [vmem:[#allocation87_spill] sm:$0xff]  ;;  %v8438_v51 = vld [vmem:[#allocation94_spill] sm:$0xff] }
 0x2fe   : > { %8423 = vst [vmem:[#allocation79_spill] sm:$0xff] %v5501_v56  ;;  %8425 = vst [vmem:[#allocation82_spill] sm:$0xff] %v5505_v50  ;;  %v5521_v47 = vmul.f32 %v5347_v49, %v8432_v0  ;;  %v8434_v56 = vld [vmem:[#allocation90_spill] sm:$0xff]  ;;  %v8436_v53 = vld [vmem:[#allocation91_spill] sm:$0xff] }
 0x2ff   : > { %8427 = vst [vmem:[#allocation260_spill] sm:$0xff] %v5509_v48  ;;  %8429 = vst [vmem:[#allocation83_spill] sm:$0xff] %v5513_v59  ;;  %v5525_v57 = vmul.f32 %v5347_v49, %v8434_v56  ;;  %v3914_v50 = vld [vmem:[%s3994_s25 + $0x378] sm:$0xff]  ;;  %v5530_v48 = vmul.f32 %v5347_v49, %v8436_v53  ;;  %v5534_v59 = vmul.f32 %v5347_v49, %v8438_v51  ;;  %v8440_v52 = vld [vmem:[#allocation95_spill] sm:$0xff] }
 0x300   : > { %8431 = vst [vmem:[#allocation86_spill] sm:$0xff] %v5517_v45  ;;  %8433 = vst [vmem:[#allocation87_spill] sm:$0xff] %v5521_v47  ;;  %2347 = vperm.xlu1 %3800, %v3914_v50   ;;  %v5538_v45 = vmul.f32 %v5347_v49, %v8440_v52  ;;  %v8442_v0 = vld [vmem:[#allocation98_spill] sm:$0xff]  ;;  %v3915_v56 = vld [vmem:[%s3994_s25 + $0x390] sm:$0xff] }
 0x301   : > { %8435 = vst [vmem:[#allocation90_spill] sm:$0xff] %v5525_v57  ;;  %8437 = vst [vmem:[#allocation91_spill] sm:$0xff] %v5530_v48  ;;  %v5542_v47 = vmul.f32 %v5347_v49, %v8442_v0  ;;  %2359 = vperm.xlu0 %3801, %v3915_v56   ;;  %v8444_v50 = vld [vmem:[#allocation99_spill] sm:$0xff]  ;;  %v8446_v53 = vld [vmem:[#allocation102_spill] sm:$0xff] }
 0x302   : > { %8439 = vst [vmem:[#allocation94_spill] sm:$0xff] %v5534_v59  ;;  %8441 = vst [vmem:[#allocation95_spill] sm:$0xff] %v5538_v45  ;;  %v5547_v57 = vmul.f32 %v5347_v49, %v8444_v50  ;;  %v5551_v48 = vmul.f32 %v5347_v49, %v8446_v53  ;;  %v8448_v51 = vld [vmem:[#allocation103_spill] sm:$0xff]  ;;  %v8450_v52 = vld [vmem:[#allocation106_spill] sm:$0xff] }
 0x303   : > { %8443 = vst [vmem:[#allocation98_spill] sm:$0xff] %v5542_v47  ;;  %v5555_v59 = vmul.f32 %v5347_v49, %v8448_v51  ;;  %v5559_v45 = vmul.f32 %v5347_v49, %v8450_v52  ;;  %v8452_v0 = vld [vmem:[#allocation107_spill] sm:$0xff]  ;;  %v8454_v56 = vld [vmem:[#allocation110_spill] sm:$0xff]  ;;  %v1644_v51 = vsub.s32 1, %v5326_v46  ;;  %v3916_v46 = vld [vmem:[%s3994_s25 + $0x388] sm:$0xff] }
 0x304   : > { %8445 = vst [vmem:[#allocation99_spill] sm:$0xff] %v5547_v57  ;;  %8447 = vst [vmem:[#allocation102_spill] sm:$0xff] %v5551_v48  ;;  %v5563_v47 = vmul.f32 %v5347_v49, %v8452_v0  ;;  %v5567_v50 = vmul.f32 %v5347_v49, %v8454_v56  ;;  %v8456_v57 = vld [vmem:[#allocation111_spill] sm:$0xff]  ;;  %v5574_v48 = vpop.permute.xlu1 %2099  ;;  %v8460_v52 = vld [vmem:[#allocation114_spill] sm:$0xff]  ;;  %2355 = vperm.xlu1 %3800, %v3916_v46  }
 0x305   : > { %8449 = vst [vmem:[#allocation103_spill] sm:$0xff] %v5555_v59  ;;  %8451 = vst [vmem:[#allocation106_spill] sm:$0xff] %v5559_v45  ;;  %v5571_v53 = vmul.f32 %v5347_v49, %v8456_v57  ;;  %v5576_v59 = vpop.permute.xlu0 %2111  ;;  %v5580_v45 = vmul.f32 %v5347_v49, %v8460_v52  ;;  %v8462_v0 = vld [vmem:[#allocation115_spill] sm:$0xff]  ;;  %v8464_v56 = vld [vmem:[#allocation118_spill] sm:$0xff] }
 0x306   : > { %8453 = vst [vmem:[#allocation107_spill] sm:$0xff] %v5563_v47  ;;  %8455 = vst [vmem:[#allocation110_spill] sm:$0xff] %v5567_v50  ;;  %v5584_v47 = vmul.f32 %v5347_v49, %v8462_v0  ;;  %v5588_v50 = vmul.f32 %v5347_v49, %v8464_v56  ;;  %v8466_v57 = vld [vmem:[#allocation119_spill] sm:$0xff]  ;;  %v8472_v0 = vld [vmem:[#allocation126_spill] sm:$0xff] }
 0x307   : > { %8457 = vst [vmem:[#allocation111_spill] sm:$0xff] %v5571_v53  ;;  %8458 = vst [vmem:[#allocation261_spill] sm:$0xff] %v5574_v48  ;;  %v5592_v53 = vmul.f32 %v5347_v49, %v8466_v57  ;;  %v8468_v48 = vld [vmem:[#allocation122_spill] sm:$0xff]  ;;  %v8470_v52 = vld [vmem:[#allocation123_spill] sm:$0xff] }
 0x308   : > { %8459 = vst [vmem:[#allocation262_spill] sm:$0xff] %v5576_v59  ;;  %8461 = vst [vmem:[#allocation114_spill] sm:$0xff] %v5580_v45  ;;  %v5597_v59 = vmul.f32 %v5347_v49, %v8468_v48  ;;  %v5601_v45 = vmul.f32 %v5347_v49, %v8470_v52  ;;  %v8474_v56 = vld [vmem:[#allocation127_spill] sm:$0xff]  ;;  %v8476_v46 = vld [vmem:[#allocation130_spill] sm:$0xff] }
 0x309   : > { %8463 = vst [vmem:[#allocation115_spill] sm:$0xff] %v5584_v47  ;;  %8465 = vst [vmem:[#allocation118_spill] sm:$0xff] %v5588_v50  ;;  %v5605_v47 = vmul.f32 %v5347_v49, %v8472_v0  ;;  %v5609_v50 = vmul.f32 %v5347_v49, %v8474_v56  ;;  %v3917_v57 = vld [vmem:[%s3994_s25 + $0x3a0] sm:$0xff]  ;;  %v8479_v52 = vld [vmem:[#allocation133_spill] sm:$0xff] }
 0x30a   : > { %8467 = vst [vmem:[#allocation119_spill] sm:$0xff] %v5592_v53  ;;  %8469 = vst [vmem:[#allocation122_spill] sm:$0xff] %v5597_v59  ;;  %2367 = vperm.xlu0 %3801, %v3917_v57   ;;  %v5614_v53 = vmul.f32 %v5347_v49, %v8476_v46  ;;  %v8478_v48 = vld [vmem:[#allocation131_spill] sm:$0xff]  ;;  %v8481_v0 = vld [vmem:[#allocation134_spill] sm:$0xff] }
 0x30b   : > { %8471 = vst [vmem:[#allocation123_spill] sm:$0xff] %v5601_v45  ;;  %8473 = vst [vmem:[#allocation126_spill] sm:$0xff] %v5605_v47  ;;  %v5618_v59 = vmul.f32 %v5347_v49, %v8478_v48  ;;  %v5622_v45 = vmul.f32 %v5347_v49, %v8479_v52  ;;  %v5626_v47 = vmul.f32 %v5347_v49, %v8481_v0  ;;  %v8482_v56 = vld [vmem:[#allocation135_spill] sm:$0xff]  ;;  %v8484_v57 = vld [vmem:[#allocation136_spill] sm:$0xff]  ;;  %v5645_v0 = vpop.permute.xlu0 %2119 }
 0x30c   : > { %8475 = vst [vmem:[#allocation127_spill] sm:$0xff] %v5609_v50  ;;  %8477 = vst [vmem:[#allocation130_spill] sm:$0xff] %v5614_v53  ;;  %v5630_v50 = vmul.f32 %v5347_v49, %v8482_v56  ;;  %v5634_v46 = vmul.f32 %v5347_v49, %v8484_v57  ;;  %v8485_v53 = vld [vmem:[#allocation137_spill] sm:$0xff]  ;;  %v5641_v52 = vrot.slane %v5342_v54, %v1644_v51  ;;  %v3918_v51 = vld [vmem:[%s3994_s25 + $0x398] sm:$0xff] }
 0x30d   : > { %8480 = vst [vmem:[#allocation131_spill] sm:$0xff] %v5622_v45  ;;  %v5638_v48 = vmul.f32 %v5347_v49, %v8485_v53  ;;  %v5643_v45 = vpop.permute.xlu1 %2107  ;;  %8487 = vst [vmem:[#allocation135_spill] sm:$0xff] %v5645_v0  ;;  %v5649_v56 = vmul.f32 %v5347_v49, %v4638_v55  ;;  %v5657_v57 = vmul.f32 %v5347_v49, %v4644_v63  ;;  %2363 = vperm.xlu1 %3800, %v3918_v51  }
 0x30e   : > { %8483 = vst [vmem:[#allocation133_spill] sm:$0xff] %v5630_v50  ;;  %8486 = vst [vmem:[#allocation134_spill] sm:$0xff] %v5643_v45  ;;  %v5653_v50 = vmul.f32 %v5347_v49, %v4642_v61  ;;  %v5661_v53 = vmul.f32 %v5347_v49, %v4648_v58  ;;  %v5666_v0 = vmul.f32 %v5347_v49, %v4650_v62  ;;  %v3919_v58 = vld [vmem:[%s3994_s25 + $0x3b0] sm:$0xff]  ;;  %v3920_v45 = vld [vmem:[%s3994_s25 + $0x3a8] sm:$0xff] }
 0x30f   : > { %v5670_v55 = vmul.f32 %v5347_v49, %v4654_v60  ;;  %v5674_v61 = vmul.f32 %v5347_v49, %v4656_v4  ;;  %v5678_v63 = vmul.f32 %v5347_v49, %v4660_v2  ;;  %2375 = vperm.xlu0 %3801, %v3919_v58   ;;  %v5683_v51 = vmul.f32 %v5347_v49, %v4662_v1 }
 0x310   : > { %8488 = vst [vmem:[#allocation136_spill] sm:$0xff] %v5661_v53  ;;  %v5687_v62 = vmul.f32 %v5347_v49, %v4666_v3  ;;  %v5691_v60 = vmul.f32 %v5347_v49, %v4668_v6  ;;  %v5695_v4 = vmul.f32 %v5347_v49, %v4672_v5  ;;  %v5699_v2 = vmul.f32 %v5347_v49, %v4674_v8  ;;  %v5715_v5 = vpop.permute.xlu0 %2127  ;;  %v8675_v53 = vld [vmem:[#allocation215_spill] sm:$0xff] }
 0x311   : > { %8489 = vst [vmem:[#allocation137_spill] sm:$0xff] %v5670_v55  ;;  %8490 = vst [vmem:[#allocation263_spill] sm:$0xff] %v5674_v61  ;;  %v5703_v1 = vmul.f32 %v5347_v49, %v4678_v7  ;;  %v5707_v3 = vmul.f32 %v5347_v49, %v4680_v10  ;;  %v5711_v6 = vmul.f32 %v5347_v49, %v4684_v9  ;;  %v5713_v58 = vpop.permute.xlu1 %2115  ;;  %2371 = vperm.xlu1 %3800, %v3920_v45   ;;  %v8661_v55 = vld [vmem:[#allocation89_spill] sm:$0xff] }
 0x312   : > { %8491 = vst [vmem:[#allocation264_spill] sm:$0xff] %v5678_v63  ;;  %8492 = vst [vmem:[#allocation265_spill] sm:$0xff] %v5683_v51  ;;  %v5719_v8 = vmul.f32 %v5347_v49, %v4686_v12  ;;  %v5723_v7 = vmul.f32 %v5347_v49, %v4690_v11  ;;  %v5727_v10 = vmul.f32 %v5347_v49, %v4692_v14  ;;  %v8653_v51 = vld [vmem:[#allocation85_spill] sm:$0xff] }
 0x313   : > { %8493 = vst [vmem:[#allocation266_spill] sm:$0xff] %v5687_v62  ;;  %8494 = vst [vmem:[#allocation267_spill] sm:$0xff] %v5691_v60  ;;  %v5731_v9 = vmul.f32 %v5347_v49, %v4696_v13  ;;  %v5740_v12 = vmul.f32 %v5347_v49, %v4702_v15  ;;  %v5744_v11 = vmul.f32 %v5347_v49, %v4704_v18  ;;  %v3921_v13 = vld [vmem:[%s3994_s25 + $0x3c0] sm:$0xff]  ;;  %v8668_v61 = vld [vmem:[#allocation97_spill] sm:$0xff] }
 0x314   : > { %8495 = vst [vmem:[#allocation268_spill] sm:$0xff] %v5695_v4  ;;  %8496 = vst [vmem:[#allocation269_spill] sm:$0xff] %v5699_v2  ;;  %v5748_v14 = vmul.f32 %v5347_v49, %v4708_v17  ;;  %2383 = vperm.xlu0 %3801, %v3921_v13   ;;  %v5753_v45 = vmul.f32 %v5347_v49, %v4710_v20  ;;  %v5761_v15 = vmul.f32 %v5347_v49, %v4716_v22  ;;  %v8644_v62 = vld [vmem:[#allocation75_spill] sm:$0xff] }
 0x315   : > { %8497 = vst [vmem:[#allocation270_spill] sm:$0xff] %v5703_v1  ;;  %8498 = vst [vmem:[#allocation271_spill] sm:$0xff] %v5707_v3  ;;  %v5765_v18 = vmul.f32 %v5347_v49, %v4720_v21  ;;  %v5769_v17 = vmul.f32 %v5347_v49, %v4722_v24  ;;  %v5773_v20 = vmul.f32 %v5347_v49, %v4726_v23  ;;  %v5783_v13 = vpop.permute.xlu1 %2123  ;;  %v5785_v21 = vpop.permute.xlu0 %2135 }
 0x316   : > { %8499 = vst [vmem:[#allocation272_spill] sm:$0xff] %v5711_v6  ;;  %8500 = vst [vmem:[#allocation273_spill] sm:$0xff] %v5713_v58  ;;  %v5781_v22 = vmul.f32 %v5347_v49, %v4732_v25  ;;  %v5789_v24 = vmul.f32 %v5347_v49, %v4734_v28  ;;  %v5793_v23 = vmul.f32 %v5347_v49, %v4738_v27  ;;  %v8627_v6 = vld [vmem:[#allocation68_spill] sm:$0xff] }
 0x317   : > { %8501 = vst [vmem:[#allocation274_spill] sm:$0xff] %v5715_v5  ;;  %8502 = vst [vmem:[#allocation275_spill] sm:$0xff] %v5719_v8  ;;  %v5736_v5 = vmul.f32 %v5347_v49, %v4698_v16  ;;  %v5757_v16 = vmul.f32 %v5347_v49, %v4714_v19  ;;  %v5777_v19 = vmul.f32 %v5347_v49, %v4728_v26  ;;  %v8629_v8 = vld [vmem:[#allocation59_spill] sm:$0xff] }
 0x318   : > { %8503 = vst [vmem:[#allocation276_spill] sm:$0xff] %v5723_v7  ;;  %8504 = vst [vmem:[#allocation277_spill] sm:$0xff] %v5727_v10  ;;  %v5797_v26 = vmul.f32 %v5347_v49, %v4740_v30  ;;  %v5801_v25 = vmul.f32 %v5347_v49, %v4744_v29  ;;  %v5810_v28 = vmul.f32 %v5347_v49, %v4750_v31  ;;  %v3923_v29 = vld [vmem:[%s3994_s25 + $0x3d0] sm:$0xff] }
 0x319   : > { %8505 = vst [vmem:[#allocation278_spill] sm:$0xff] %v5731_v9  ;;  %8506 = vst [vmem:[#allocation279_spill] sm:$0xff] %v5736_v5  ;;  %v5814_v27 = vmul.f32 %v5347_v49, %v4752_v34  ;;  %v5818_v30 = vmul.f32 %v5347_v49, %v4756_v33  ;;  %2391 = vperm.xlu0 %3801, %v3923_v29   ;;  %v5831_v31 = vmul.f32 %v5347_v49, %v4764_v38  ;;  %v5853_v29 = vpop.permute.xlu1 %2131  ;;  %v8618_v9 = vld [vmem:[#allocation61_spill] sm:$0xff] }
 0x31a   : > { %8507 = vst [vmem:[#allocation280_spill] sm:$0xff] %v5740_v12  ;;  %8508 = vst [vmem:[#allocation281_spill] sm:$0xff] %v5744_v11  ;;  %v5835_v34 = vmul.f32 %v5347_v49, %v4768_v37  ;;  %v5839_v33 = vmul.f32 %v5347_v49, %v4770_v40  ;;  %v5851_v38 = vmul.f32 %v5347_v49, %v4780_v41  ;;  %v5855_v37 = vpop.permute.xlu0 %2143  ;;  %v8617_v11 = vld [vmem:[#allocation56_spill] sm:$0xff]  ;;  %v8622_v7 = vld [vmem:[#allocation65_spill] sm:$0xff] }
 0x31b   : > { %8509 = vst [vmem:[#allocation282_spill] sm:$0xff] %v5748_v14  ;;  %8510 = vst [vmem:[#allocation283_spill] sm:$0xff] %v5753_v45  ;;  %v5859_v40 = vmul.f32 %v5347_v49, %v4782_v44  ;;  %v8546_v44 = vld [vmem:[#allocation11_spill] sm:$0xff]  ;;  %v8599_v45 = vld [vmem:[#allocation45_spill] sm:$0xff] }
 0x31c   : > { %8511 = vst [vmem:[#allocation284_spill] sm:$0xff] %v5757_v16  ;;  %8512 = vst [vmem:[#allocation285_spill] sm:$0xff] %v5761_v15  ;;  %v8591_v16 = vld [vmem:[#allocation36_spill] sm:$0xff]  ;;  %v8595_v15 = vld [vmem:[#allocation31_spill] sm:$0xff] }
 0x31d   : > { %8513 = vst [vmem:[#allocation286_spill] sm:$0xff] %v5765_v18  ;;  %8514 = vst [vmem:[#allocation287_spill] sm:$0xff] %v5769_v17  ;;  %v8586_v18 = vld [vmem:[#allocation22_spill] sm:$0xff]  ;;  %v8590_v17 = vld [vmem:[#allocation27_spill] sm:$0xff] }
 0x31e   : > { %8515 = vst [vmem:[#allocation288_spill] sm:$0xff] %v5773_v20  ;;  %8516 = vst [vmem:[#allocation289_spill] sm:$0xff] %v5777_v19  ;;  %v5806_v20 = vmul.f32 %v5347_v49, %v4746_v32  ;;  %v5827_v32 = vmul.f32 %v5347_v49, %v4762_v35  ;;  %v5847_v35 = vmul.f32 %v5347_v49, %v4776_v42  ;;  %v8583_v19 = vld [vmem:[#allocation28_spill] sm:$0xff] }
 0x31f   : > { %8517 = vst [vmem:[#allocation290_spill] sm:$0xff] %v5781_v22  ;;  %8518 = vst [vmem:[#allocation291_spill] sm:$0xff] %v5783_v13  ;;  %v3922_v22 = vld [vmem:[%s3994_s25 + $0x3b8] sm:$0xff]  ;;  %v8613_v13 = vld [vmem:[#allocation57_spill] sm:$0xff] }
 0x320   : > { %8519 = vst [vmem:[#allocation292_spill] sm:$0xff] %v5785_v21  ;;  %8520 = vst [vmem:[#allocation293_spill] sm:$0xff] %v5789_v24  ;;  %2379 = vperm.xlu1 %3800, %v3922_v22   ;;  %v5823_v22 = vmul.f32 %v5347_v49, %v4758_v36  ;;  %v5843_v36 = vmul.f32 %v5347_v49, %v4774_v39  ;;  %v5863_v39 = vmul.f32 %v5347_v49, %v4786_v43  ;;  %v8594_v21 = vld [vmem:[#allocation26_spill] sm:$0xff] }
 0x321   : > { %8521 = vst [vmem:[#allocation294_spill] sm:$0xff] %v5793_v23  ;;  %8522 = vst [vmem:[#allocation295_spill] sm:$0xff] %v5797_v26  ;;  %v3927_v26 = vld [vmem:[%s3994_s25 + $0x3f0] sm:$0xff] }
 0x322   : > { %8523 = vst [vmem:[#allocation296_spill] sm:$0xff] %v5801_v25  ;;  %8524 = vst [vmem:[#allocation297_spill] sm:$0xff] %v5806_v20  ;;  %v8573_v20 = vld [vmem:[#allocation15_spill] sm:$0xff] }
 0x323   : > { %8525 = vst [vmem:[#allocation298_spill] sm:$0xff] %v5810_v28  ;;  %8526 = vst [vmem:[#allocation299_spill] sm:$0xff] %v5814_v27  ;;  %v8572_v27 = vld [vmem:[#allocation19_spill] sm:$0xff] }
 0x324   : > { %8527 = vst [vmem:[#allocation300_spill] sm:$0xff] %v5818_v30  ;;  %8528 = vst [vmem:[#allocation301_spill] sm:$0xff] %v5823_v22  ;;  %v5915_v22 = vpop.permute.xlu0 %2151 }
 0x325   : > { %8529 = vst [vmem:[#allocation302_spill] sm:$0xff] %v5827_v32  ;;  %8530 = vst [vmem:[#allocation303_spill] sm:$0xff] %v5831_v31  ;;  %v8547_v32 = vld [vmem:[#allocation10_spill] sm:$0xff]  ;;  %v8555_v31 = vld [vmem:[#allocation143_spill] sm:$0xff] }
 0x326   : > { %8531 = vst [vmem:[#allocation304_spill] sm:$0xff] %v5835_v34  ;;  %8532 = vst [vmem:[#allocation305_spill] sm:$0xff] %v5839_v33  ;;  %v8544_v34 = vld [vmem:[#allocation140_spill] sm:$0xff]  ;;  %v1646_v43 = vmul.f32 %v5641_v52, %v8547_v32  ;;  %v5899_v32 = vmul.f32 %v5347_v49, %v8555_v31  ;;  %v8565_v31 = vld [vmem:[#allocation7_spill] sm:$0xff] }
 0x327   : > { %8533 = vst [vmem:[#allocation306_spill] sm:$0xff] %v5843_v36  ;;  %8534 = vst [vmem:[#allocation307_spill] sm:$0xff] %v5847_v35  ;;  %v8540_v36 = vld [vmem:[#allocation138_spill] sm:$0xff]  ;;  %v8542_v35 = vld [vmem:[#allocation139_spill] sm:$0xff]  ;;  %v5876_v33 = vmul.f32 %v5347_v49, %v8544_v34 }
 0x328   : > { %8535 = vst [vmem:[#allocation308_spill] sm:$0xff] %v5851_v38  ;;  %8536 = vst [vmem:[#allocation309_spill] sm:$0xff] %v5853_v29  ;;  %v5867_v42 = vmul.f32 %v5347_v49, %v8540_v36  ;;  %v5871_v41 = vmul.f32 %v5347_v49, %v8542_v35  ;;  %v3924_v38 = vld [vmem:[%s3994_s25 + $0x3c8] sm:$0xff]  ;;  %v8549_v35 = vld [vmem:[#allocation141_spill] sm:$0xff]  ;;  %v5936_v23 = vadd.f32 %v1646_v43, %v8573_v20 }
 0x329   : > { %8537 = vst [vmem:[#allocation310_spill] sm:$0xff] %v5855_v37  ;;  %8538 = vst [vmem:[#allocation311_spill] sm:$0xff] %v5859_v40  ;;  %2387 = vperm.xlu1 %3800, %v3924_v38   ;;  %v1647_v40 = vmul.f32 %v5641_v52, %v8546_v44  ;;  %v8551_v38 = vld [vmem:[#allocation142_spill] sm:$0xff]  ;;  %v8579_v20 = vld [vmem:[#allocation247_spill] sm:$0xff] }
 0x32a   : > { %8539 = vst [vmem:[#allocation312_spill] sm:$0xff] %v5863_v39  ;;  %8541 = vst [vmem:[#allocation138_spill] sm:$0xff] %v5867_v42  ;;  %v8548_v39 = vld [vmem:[#allocation13_spill] sm:$0xff]  ;;  %v3925_v42 = vld [vmem:[%s3994_s25 + $0x3e0] sm:$0xff]  ;;  %v5891_v34 = vmul.f32 %v5347_v49, %v8551_v38  ;;  %v2416_v43 = vsub.s32 2, %v8579_v20 }
 0x32b   : > { %8543 = vst [vmem:[#allocation139_spill] sm:$0xff] %v5871_v41  ;;  %8545 = vst [vmem:[#allocation140_spill] sm:$0xff] %v5876_v33  ;;  %v1648_v36 = vmul.f32 %v5641_v52, %v8548_v39  ;;  %2399 = vperm.xlu0 %3801, %v3925_v42   ;;  %v5887_v41 = vmul.f32 %v5347_v49, %v8549_v35  ;;  %v8553_v33 = vld [vmem:[#allocation3_spill] sm:$0xff]  ;;  %v8557_v39 = vld [vmem:[#allocation5_spill] sm:$0xff]  ;;  %v5933_v25 = vadd.f32 %v1647_v40, %v8572_v27 }
 0x32c   : > { %8552 = vst [vmem:[#allocation10_spill] sm:$0xff] %v5891_v34  ;;  %v5895_v44 = vmul.f32 %v5347_v49, %v8553_v33  ;;  %8556 = vst [vmem:[#allocation141_spill] sm:$0xff] %v5899_v32  ;;  %v5903_v30 = vmul.f32 %v5347_v49, %v8557_v39  ;;  %v8559_v42 = vld [vmem:[#allocation4_spill] sm:$0xff]  ;;  %v8562_v34 = vld [vmem:[#allocation17_spill] sm:$0xff]  ;;  %v5919_v32 = vmul.f32 %v5347_v49, %v8565_v31 }
 0x32d   : > { %8550 = vst [vmem:[#allocation11_spill] sm:$0xff] %v5887_v41  ;;  %v5907_v35 = vmul.f32 %v5347_v49, %v8559_v42  ;;  %v8561_v41 = vld [vmem:[#allocation12_spill] sm:$0xff]  ;;  %v1650_v33 = vmul.f32 %v5641_v52, %v8562_v34  ;;  %8564 = vst [vmem:[#allocation5_spill] sm:$0xff] %v5915_v22  ;;  %v8567_v39 = vld [vmem:[#allocation6_spill] sm:$0xff] }
 0x32e   : > { %8554 = vst [vmem:[#allocation13_spill] sm:$0xff] %v5895_v44  ;;  %8558 = vst [vmem:[#allocation142_spill] sm:$0xff] %v5903_v30  ;;  %v1649_v38 = vmul.f32 %v5641_v52, %v8561_v41  ;;  %v5913_v44 = vpop.permute.xlu1 %2139  ;;  %v5923_v30 = vmul.f32 %v5347_v49, %v8567_v39  ;;  %v8569_v42 = vld [vmem:[#allocation9_spill] sm:$0xff]  ;;  %v8571_v41 = vld [vmem:[#allocation16_spill] sm:$0xff] }
 0x32f   : > { %8560 = vst [vmem:[#allocation3_spill] sm:$0xff] %v5907_v35  ;;  %8563 = vst [vmem:[#allocation143_spill] sm:$0xff] %v5913_v44  ;;  %v5927_v35 = vmul.f32 %v5347_v49, %v8569_v42  ;;  %v1651_v28 = vmul.f32 %v5641_v52, %v8571_v41  ;;  %v3926_v34 = vld [vmem:[%s3994_s25 + $0x3d8] sm:$0xff]  ;;  %v8575_v39 = vld [vmem:[#allocation21_spill] sm:$0xff]  ;;  %2407 = vperm.xlu0 %3801, %v3927_v26  }
 0x330   : > { %8566 = vst [vmem:[#allocation4_spill] sm:$0xff] %v5919_v32  ;;  %8568 = vst [vmem:[#allocation12_spill] sm:$0xff] %v5923_v30  ;;  %2395 = vperm.xlu1 %3800, %v3926_v34   ;;  %v8574_v31 = vld [vmem:[#allocation14_spill] sm:$0xff]  ;;  %v1652_v30 = vmul.f32 %v5641_v52, %v8575_v39  ;;  %v8576_v42 = vld [vmem:[#allocation20_spill] sm:$0xff] }
 0x331   : > { %8570 = vst [vmem:[#allocation17_spill] sm:$0xff] %v5927_v35  ;;  %v5939_v32 = vadd.f32 %v1648_v36, %v8574_v31  ;;  %v1653_v41 = vmul.f32 %v5641_v52, %v8576_v42  ;;  %v8577_v35 = vld [vmem:[#allocation25_spill] sm:$0xff]  ;;  %v8578_v27 = vld [vmem:[#allocation24_spill] sm:$0xff]  ;;  %v8580_v49 = vld [vmem:[#allocation18_spill] sm:$0xff]  ;;  %v1657_v42 = vmul.f32 %v5641_v52, %v8583_v19 }
 0x332   : > { %v1654_v34 = vmul.f32 %v5641_v52, %v8577_v35  ;;  %v1655_v40 = vmul.f32 %v5641_v52, %v8578_v27  ;;  %v5952_v36 = vadd.f32 %v1649_v38, %v8580_v49  ;;  %v8581_v31 = vld [vmem:[#allocation23_spill] sm:$0xff]  ;;  %v8582_v39 = vld [vmem:[#allocation29_spill] sm:$0xff]  ;;  %v5961_v22 = vpop.permute.xlu1 %2147  ;;  %v5963_v35 = vpop.permute.xlu0 %2159  ;;  %v5966_v27 = vadd.f32 %v1651_v28, %v8586_v18  ;;  %v8588_v38 = vld [vmem:[#allocation32_spill] sm:$0xff] }
 0x333   : > { %v5955_v24 = vadd.f32 %v1650_v33, %v8581_v31  ;;  %v1656_v26 = vmul.f32 %v5641_v52, %v8582_v39  ;;  %8584 = vst [vmem:[#allocation7_spill] sm:$0xff] %v5961_v22  ;;  %8585 = vst [vmem:[#allocation6_spill] sm:$0xff] %v5963_v35  ;;  %v8587_v20 = vld [vmem:[#allocation33_spill] sm:$0xff]  ;;  %v1659_v33 = vmul.f32 %v5641_v52, %v8588_v38  ;;  %v3928_v39 = vld [vmem:[%s3994_s25 + $0x3e8] sm:$0xff] }
 0x334   : > { %v1658_v49 = vmul.f32 %v5641_v52, %v8587_v20  ;;  %v8589_v31 = vld [vmem:[#allocation37_spill] sm:$0xff]  ;;  %2403 = vperm.xlu1 %3800, %v3928_v39   ;;  %v5976_v19 = vadd.f32 %v1652_v30, %v8590_v17  ;;  %v1661_v35 = vmul.f32 %v5641_v52, %v8591_v16  ;;  %v8593_v28 = vld [vmem:[#allocation40_spill] sm:$0xff]  ;;  %v5985_v38 = vadd.f32 %v1653_v41, %v8594_v21  ;;  %v8596_v39 = vld [vmem:[#allocation30_spill] sm:$0xff] }
 0x335   : > { %v1660_v37 = vmul.f32 %v5641_v52, %v8589_v31  ;;  %v8592_v22 = vld [vmem:[#allocation41_spill] sm:$0xff]  ;;  %v1663_v20 = vmul.f32 %v5641_v52, %v8593_v28  ;;  %v5988_v31 = vadd.f32 %v1654_v34, %v8595_v15  ;;  %v5991_v44 = vadd.f32 %v1655_v40, %v8596_v39  ;;  %v8597_v16 = vld [vmem:[#allocation35_spill] sm:$0xff]  ;;  %v8600_v21 = vld [vmem:[#allocation44_spill] sm:$0xff] }
 0x336   : > { %v1662_v18 = vmul.f32 %v5641_v52, %v8592_v22  ;;  %v5994_v17 = vrot.slane %v5342_v54, %v2416_v43  ;;  %v5997_v30 = vadd.f32 %v1656_v26, %v8597_v16  ;;  %v8598_v22 = vld [vmem:[#allocation34_spill] sm:$0xff]  ;;  %v1664_v28 = vmul.f32 %v5641_v52, %v8599_v45  ;;  %v6006_v15 = vpop.permute.xlu1 %2155  ;;  %v6008_v34 = vpop.permute.xlu0 %2167  ;;  %v8603_v40 = vld [vmem:[#allocation39_spill] sm:$0xff] }
 0x337   : > { %v6000_v14 = vadd.f32 %v1657_v42, %v8598_v22  ;;  %v1665_v41 = vmul.f32 %v5641_v52, %v8600_v21  ;;  %8601 = vst [vmem:[#allocation9_spill] sm:$0xff] %v6006_v15  ;;  %8602 = vst [vmem:[#allocation16_spill] sm:$0xff] %v6008_v34  ;;  %v6011_v39 = vadd.f32 %v1658_v49, %v8603_v40  ;;  %v8604_v54 = vld [vmem:[#allocation38_spill] sm:$0xff]  ;;  %v8605_v26 = vld [vmem:[#allocation43_spill] sm:$0xff] }
 0x338   : > { %v6014_v43 = vadd.f32 %v1659_v33, %v8604_v54  ;;  %v6017_v16 = vadd.f32 %v1660_v37, %v8605_v26  ;;  %v8606_v42 = vld [vmem:[#allocation49_spill] sm:$0xff]  ;;  %v3929_v45 = vld [vmem:[%s3994_s25 + $0x3f8] sm:$0xff]  ;;  %v8608_v15 = vld [vmem:[#allocation47_spill] sm:$0xff] }
 0x339   : > { %v1666_v22 = vmul.f32 %v5641_v52, %v8606_v42  ;;  %2411 = vperm.xlu1 %3800, %v3929_v45   ;;  %v8607_v29 = vld [vmem:[#allocation42_spill] sm:$0xff]  ;;  %v6026_v12 = vadd.f32 %v1662_v18, %v8608_v15  ;;  %v8610_v40 = vld [vmem:[#allocation48_spill] sm:$0xff]  ;;  %v8611_v54 = vld [vmem:[#allocation53_spill] sm:$0xff]  ;;  %v1670_v45 = vmul.f32 %v5641_v52, %v8613_v13 }
 0x33a   : > { %v6023_v21 = vadd.f32 %v1661_v35, %v8607_v29  ;;  %v8609_v34 = vld [vmem:[#allocation46_spill] sm:$0xff]  ;;  %v1667_v33 = vmul.f32 %v5641_v52, %v8610_v40  ;;  %v1668_v37 = vmul.f32 %v5641_v52, %v8611_v54  ;;  %v8612_v26 = vld [vmem:[#allocation52_spill] sm:$0xff]  ;;  %v8614_v29 = vld [vmem:[#allocation209_spill] sm:$0xff]  ;;  %v1671_v40 = vmul.f32 %v5641_v52, %v8617_v11  ;;  %v6051_v58 = vpop.permute.xlu1 %2163 }
 0x33b   : > { %v6029_v49 = vadd.f32 %v1663_v20, %v8609_v34  ;;  %v1669_v42 = vmul.f32 %v5641_v52, %v8612_v26  ;;  %v2418_v35 = vmul.f32 %v5994_v17, %v8614_v29  ;;  %v8615_v18 = vld [vmem:[#allocation51_spill] sm:$0xff]  ;;  %v8616_v20 = vld [vmem:[#allocation50_spill] sm:$0xff]  ;;  %v1672_v54 = vmul.f32 %v5641_v52, %v8618_v9  ;;  %8619 = vst [vmem:[#allocation19_spill] sm:$0xff] %v6051_v58  ;;  %v8621_v13 = vld [vmem:[#allocation60_spill] sm:$0xff] }
 0x33c   : > { %v6042_v15 = vadd.f32 %v1664_v28, %v8615_v18  ;;  %v6045_v34 = vadd.f32 %v1665_v41, %v8616_v20  ;;  %v8620_v26 = vld [vmem:[#allocation55_spill] sm:$0xff]  ;;  %v1673_v29 = vmul.f32 %v5641_v52, %v8621_v13  ;;  %v1674_v28 = vmul.f32 %v5641_v52, %v8622_v7  ;;  %v8623_v18 = vld [vmem:[#allocation64_spill] sm:$0xff]  ;;  %v6062_v20 = vpop.permute.xlu0 %2175  ;;  %v8625_v11 = vld [vmem:[#allocation54_spill] sm:$0xff] }
 0x33d   : > { %v6054_v5 = vadd.f32 %v1666_v22, %v8620_v26  ;;  %v1675_v41 = vmul.f32 %v5641_v52, %v8623_v18  ;;  %8624 = vst [vmem:[#allocation15_spill] sm:$0xff] %v6062_v20  ;;  %v6065_v10 = vadd.f32 %v1667_v33, %v8625_v11  ;;  %v8626_v9 = vld [vmem:[#allocation69_spill] sm:$0xff]  ;;  %v1677_v22 = vmul.f32 %v5641_v52, %v8627_v6  ;;  %v8630_v7 = vld [vmem:[#allocation58_spill] sm:$0xff]  ;;  %v8631_v18 = vld [vmem:[#allocation63_spill] sm:$0xff] }
 0x33e   : > { %v1676_v58 = vmul.f32 %v5641_v52, %v8626_v9  ;;  %v8628_v26 = vld [vmem:[#allocation73_spill] sm:$0xff]  ;;  %v6074_v1 = vadd.f32 %v1668_v37, %v8629_v8  ;;  %v6077_v3 = vadd.f32 %v1669_v42, %v8630_v7  ;;  %v6080_v20 = vadd.f32 %v1670_v45, %v8631_v18  ;;  %v8632_v11 = vld [vmem:[#allocation62_spill] sm:$0xff]  ;;  %v8633_v9 = vld [vmem:[#allocation67_spill] sm:$0xff]  ;;  %v6098_v45 = vpop.permute.xlu1 %2171 }
 0x33f   : > { %v1678_v13 = vmul.f32 %v5641_v52, %v8628_v26  ;;  %v2546_v33 = vadd.f32 %v2418_v35, %v5936_v23  ;;  %v6084_v4 = vadd.f32 %v1671_v40, %v8632_v11  ;;  %v6087_v2 = vadd.f32 %v1672_v54, %v8633_v9  ;;  %v8634_v6 = vld [vmem:[#allocation72_spill] sm:$0xff]  ;;  %v6094_v8 = vld [vmem:[%s7884_s2] ss:$0 sm:$0xff]  ;;  %8636 = vst [vmem:[#allocation14_spill] sm:$0xff] %v6098_v45  ;;  %v8637_v23 = vld [vmem:[#allocation66_spill] sm:$0xff] }
 0x340   : > { %v1679_v26 = vmul.f32 %v5641_v52, %v8634_v6  ;;  %v8635_v37 = vld [vmem:[#allocation211_spill] sm:$0xff]  ;;  %v6101_v35 = vadd.f32 %v1673_v29, %v8637_v23  ;;  %v8640_v54 = vld [vmem:[#allocation70_spill] sm:$0xff]  ;;  %v8642_v11 = vld [vmem:[#allocation77_spill] sm:$0xff]  ;;  %v6111_v6 = vpop.permute.xlu0 %2183  ;;  %v6114_v60 = vadd.f32 %v1676_v58, %v8644_v62 }
 0x341   : > { %v2420_v42 = vmul.f32 %v5994_v17, %v8635_v37  ;;  %v8638_v40 = vld [vmem:[#allocation71_spill] sm:$0xff]  ;;  %v6107_v18 = vadd.f32 %v1675_v41, %v8640_v54  ;;  %v1680_v9 = vmul.f32 %v5641_v52, %v8642_v11  ;;  %8643 = vst [vmem:[#allocation25_spill] sm:$0xff] %v6111_v6  ;;  %v8646_v37 = vld [vmem:[#allocation74_spill] sm:$0xff]  ;;  %v8650_v23 = vld [vmem:[#allocation76_spill] sm:$0xff]  ;;  %v1684_v6 = vmul.f32 %v5641_v52, %v8653_v51 }
 0x342   : > { %v6104_v7 = vadd.f32 %v1674_v28, %v8638_v40  ;;  %8645 = vst [vmem:[#allocation24_spill] sm:$0xff] %v6114_v60  ;;  %v6117_v63 = vadd.f32 %v1677_v22, %v8646_v37  ;;  %v8648_v45 = vld [vmem:[#allocation79_spill] sm:$0xff]  ;;  %v1681_v28 = vmul.f32 %v5641_v52, %v8650_v23  ;;  %v8651_v40 = vld [vmem:[#allocation81_spill] sm:$0xff]  ;;  %v8652_v54 = vld [vmem:[#allocation80_spill] sm:$0xff]  ;;  %v2681_v62 = vadd.f32 %v6094_v8, %v2546_v33 }
 0x343   : > { %8641 = vst [vmem:[#allocation20_spill] sm:$0xff] %v6107_v18  ;;  %v6120_v29 = vadd.f32 %v1678_v13, %v8648_v45  ;;  %v1682_v41 = vmul.f32 %v5641_v52, %v8651_v40  ;;  %v1683_v11 = vmul.f32 %v5641_v52, %v8652_v54  ;;  %v8654_v58 = vld [vmem:[#allocation78_spill] sm:$0xff]  ;;  %v8656_v37 = vld [vmem:[#allocation84_spill] sm:$0xff]  ;;  %v2548_v45 = vadd.f32 %v2420_v42, %v5939_v32  ;;  %v8657_v23 = vld [vmem:[#allocation213_spill] sm:$0xff]  ;;  %v6139_v40 = vpop.permute.xlu1 %2179 }
 0x344   : > { %8639 = vst [vmem:[#allocation21_spill] sm:$0xff] %v6104_v7  ;;  %8647 = vst [vmem:[#allocation247_spill] sm:$0xff] %v6117_v63  ;;  %v6132_v22 = vadd.f32 %v1679_v26, %v8654_v58  ;;  %v1685_v13 = vmul.f32 %v5641_v52, %v8656_v37  ;;  %v8659_v60 = vld [vmem:[#allocation83_spill] sm:$0xff]  ;;  %v1686_v51 = vmul.f32 %v5641_v52, %v8661_v55  ;;  %v8662_v33 = vld [vmem:[#allocation88_spill] sm:$0xff]  ;;  %v6150_v37 = vpop.permute.xlu0 %2191 }
 0x345   : > { %8649 = vst [vmem:[#allocation18_spill] sm:$0xff] %v6120_v29  ;;  %v2421_v29 = vmul.f32 %v5994_v17, %v8657_v23  ;;  %8658 = vst [vmem:[#allocation29_spill] sm:$0xff] %v6139_v40  ;;  %v6142_v54 = vadd.f32 %v1680_v9, %v8659_v60  ;;  %v1687_v26 = vmul.f32 %v5641_v52, %v8662_v33  ;;  %v8663_v58 = vld [vmem:[#allocation93_spill] sm:$0xff]  ;;  %v8665_v32 = vld [vmem:[#allocation82_spill] sm:$0xff] }
 0x346   : > { %8655 = vst [vmem:[#allocation23_spill] sm:$0xff] %v6132_v22  ;;  %v1688_v22 = vmul.f32 %v5641_v52, %v8663_v58  ;;  %8664 = vst [vmem:[#allocation22_spill] sm:$0xff] %v6150_v37  ;;  %v6153_v42 = vadd.f32 %v1681_v28, %v8665_v32  ;;  %v8667_v23 = vld [vmem:[#allocation92_spill] sm:$0xff]  ;;  %v1690_v60 = vmul.f32 %v5641_v52, %v8668_v61  ;;  %v8669_v9 = vld [vmem:[#allocation210_spill] sm:$0xff]  ;;  %v2809_v28 = vmax.f32 %v2681_v62, 0.0 }
 0x347   : > { %8660 = vst [vmem:[#allocation28_spill] sm:$0xff] %v6142_v54  ;;  %v1689_v40 = vmul.f32 %v5641_v52, %v8667_v23  ;;  %v2419_v55 = vmul.f32 %v5994_v17, %v8669_v9  ;;  %v8670_v54 = vld [vmem:[#allocation87_spill] sm:$0xff]  ;;  %v8671_v33 = vld [vmem:[#allocation86_spill] sm:$0xff]  ;;  %v2683_v23 = vadd.f32 %v6094_v8, %v2548_v45  ;;  %v2549_v61 = vadd.f32 %v2421_v29, %v5952_v36  ;;  %v6177_v18 = vpop.permute.xlu1 %2187  ;;  %v8683_v36 = vld [vmem:[#allocation96_spill] sm:$0xff] }
 0x348   : > { %8666 = vst [vmem:[#allocation33_spill] sm:$0xff] %v6153_v42  ;;  %v6162_v63 = vadd.f32 %v1682_v41, %v8670_v54  ;;  %v6165_v7 = vadd.f32 %v1683_v11, %v8671_v33  ;;  %v8672_v58 = vld [vmem:[#allocation91_spill] sm:$0xff]  ;;  %v8674_v32 = vld [vmem:[#allocation90_spill] sm:$0xff]  ;;  %v2423_v9 = vmul.f32 %v5994_v17, %v8675_v53  ;;  %8676 = vst [vmem:[#allocation37_spill] sm:$0xff] %v6177_v18  ;;  %v6195_v53 = vpop.permute.xlu0 %2199 }
 0x349   : > { %v6168_v37 = vadd.f32 %v1684_v6, %v8672_v58  ;;  %v6171_v42 = vadd.f32 %v1685_v13, %v8674_v32  ;;  %v6182_v41 = vld [vmem:[%s7885_s3] ss:$0 sm:$0xff]  ;;  %v8679_v62 = vld [vmem:[#allocation94_spill] sm:$0xff]  ;;  %v1691_v29 = vmul.f32 %v5641_v52, %v8683_v36  ;;  %8684 = vst [vmem:[#allocation40_spill] sm:$0xff] %v6195_v53 }
 0x34a   : > { %v8677_v6 = vld [vmem:[#allocation95_spill] sm:$0xff]  ;;  %v6188_v13 = vadd.f32 %v1687_v26, %v8679_v62  ;;  %v8685_v33 = vld [vmem:[#allocation98_spill] sm:$0xff]  ;;  %v2547_v26 = vadd.f32 %v2419_v55, %v5933_v25  ;;  %v8691_v62 = vld [vmem:[#allocation212_spill] sm:$0xff]  ;;  %v2944_v36 = vmul.f32 %v6182_v41, %v2809_v28 }
 0x34b   : > { %8673 = vst [vmem:[#allocation32_spill] sm:$0xff] %v6168_v37  ;;  %v6185_v11 = vadd.f32 %v1686_v51, %v8677_v6  ;;  %v8681_v54 = vld [vmem:[#allocation99_spill] sm:$0xff]  ;;  %v6198_v58 = vadd.f32 %v1689_v40, %v8685_v33  ;;  %v8689_v37 = vld [vmem:[#allocation101_spill] sm:$0xff]  ;;  %v8690_v6 = vld [vmem:[#allocation100_spill] sm:$0xff]  ;;  %v2684_v40 = vadd.f32 %v6094_v8, %v2549_v61  ;;  %v2551_v33 = vadd.f32 %v2423_v9, %v5966_v27  ;;  %v6215_v53 = vpop.permute.xlu1 %2195 }
 0x34c   : > { %8680 = vst [vmem:[#allocation36_spill] sm:$0xff] %v6188_v13  ;;  %v6191_v45 = vadd.f32 %v1688_v22, %v8681_v54  ;;  %v8687_v32 = vld [vmem:[#allocation103_spill] sm:$0xff]  ;;  %v1692_v51 = vmul.f32 %v5641_v52, %v8689_v37  ;;  %v1693_v22 = vmul.f32 %v5641_v52, %v8690_v6  ;;  %v2422_v54 = vmul.f32 %v5994_v17, %v8691_v62  ;;  %v8694_v25 = vld [vmem:[#allocation102_spill] sm:$0xff]  ;;  %v8696_v6 = vld [vmem:[#allocation105_spill] sm:$0xff] }
 0x34d   : > { %8678 = vst [vmem:[#allocation27_spill] sm:$0xff] %v6185_v11  ;;  %8686 = vst [vmem:[#allocation26_spill] sm:$0xff] %v6198_v58  ;;  %v6201_v18 = vadd.f32 %v1690_v60, %v8687_v32  ;;  %v8692_v60 = vld [vmem:[#allocation217_spill] sm:$0xff]  ;;  %v2811_v37 = vmax.f32 %v2683_v23, 0.0  ;;  %v6218_v55 = vadd.f32 %v1691_v29, %v8694_v25  ;;  %v8697_v62 = vld [vmem:[#allocation104_spill] sm:$0xff]  ;;  %v6226_v58 = vpop.permute.xlu0 %2207  ;;  %v2682_v29 = vadd.f32 %v6094_v8, %v2547_v26 }
 0x34e   : > { %8682 = vst [vmem:[#allocation41_spill] sm:$0xff] %v6191_v45  ;;  %v2425_v32 = vmul.f32 %v5994_v17, %v8692_v60  ;;  %8693 = vst [vmem:[#allocation30_spill] sm:$0xff] %v6215_v53  ;;  %v1695_v28 = vmul.f32 %v5641_v52, %v8697_v62  ;;  %v8698_v45 = vld [vmem:[#allocation109_spill] sm:$0xff]  ;;  %v8700_v27 = vld [vmem:[#allocation107_spill] sm:$0xff]  ;;  %v2550_v62 = vadd.f32 %v2422_v54, %v5955_v24 }
 0x34f   : > { %8688 = vst [vmem:[#allocation31_spill] sm:$0xff] %v6201_v18  ;;  %8695 = vst [vmem:[#allocation35_spill] sm:$0xff] %v6218_v55  ;;  %v1694_v18 = vmul.f32 %v5641_v52, %v8696_v6  ;;  %v1696_v61 = vmul.f32 %v5641_v52, %v8698_v45  ;;  %v6229_v9 = vadd.f32 %v1692_v51, %v8700_v27  ;;  %v8702_v60 = vld [vmem:[#allocation108_spill] sm:$0xff]  ;;  %v8703_v25 = vld [vmem:[#allocation214_spill] sm:$0xff] }
 0x350   : > { %8699 = vst [vmem:[#allocation34_spill] sm:$0xff] %v6226_v58  ;;  %v1697_v23 = vmul.f32 %v5641_v52, %v8702_v60  ;;  %v2424_v53 = vmul.f32 %v5994_v17, %v8703_v25  ;;  %v8704_v6 = vld [vmem:[#allocation106_spill] sm:$0xff]  ;;  %v8705_v11 = vld [vmem:[#allocation219_spill] sm:$0xff]  ;;  %v3073_v58 = vsel %vm3072_vm0, %v2944_v36, 0.0  ;;  %v2686_v51 = vadd.f32 %v6094_v8, %v2551_v33  ;;  %v6245_v60 = vpop.permute.xlu1 %2203 }
 0x351   : > { %8701 = vst [vmem:[#allocation45_spill] sm:$0xff] %v6229_v9  ;;  %v6237_v55 = vadd.f32 %v1693_v22, %v8704_v6  ;;  %v2427_v45 = vmul.f32 %v5994_v17, %v8705_v11  ;;  %v2553_v27 = vadd.f32 %v2425_v32, %v5985_v38  ;;  %8706 = vst [vmem:[#allocation44_spill] sm:$0xff] %v6245_v60  ;;  %v2812_v9 = vmax.f32 %v2684_v40, 0.0  ;;  %v8707_v25 = vld [vmem:[#allocation111_spill] sm:$0xff]  ;;  %v8708_v22 = vld [vmem:[#allocation110_spill] sm:$0xff]  ;;  %v6259_v33 = vpop.permute.xlu0 %2215 }
 0x352   : > { %v2946_v26 = vmul.f32 %v6182_v41, %v2811_v37  ;;  %v6249_v13 = vadd.f32 %v1694_v18, %v8707_v25  ;;  %v6252_v6 = vadd.f32 %v1695_v28, %v8708_v22  ;;  %v8709_v24 = vld [vmem:[#allocation115_spill] sm:$0xff]  ;;  %v8711_v11 = vld [vmem:[#allocation113_spill] sm:$0xff]  ;;  %3074 = vadd.xlane.f32.xlu0 %v3073_v58  ;;  %8712 = vst [vmem:[#allocation38_spill] sm:$0xff] %v6259_v33  ;;  %v8713_v38 = vld [vmem:[#allocation114_spill] sm:$0xff]  ;;  %v2810_v25 = vmax.f32 %v2682_v29, 0.0 }
 0x353   : > { %v6255_v54 = vadd.f32 %v1696_v61, %v8709_v24  ;;  %v1698_v36 = vmul.f32 %v5641_v52, %v8711_v11  ;;  %v6262_v32 = vadd.f32 %v1697_v23, %v8713_v38  ;;  %v2552_v40 = vadd.f32 %v2424_v53, %v5976_v19  ;;  %v8714_v37 = vld [vmem:[#allocation216_spill] sm:$0xff]  ;;  %v8716_v11 = vld [vmem:[#allocation221_spill] sm:$0xff]  ;;  %v8718_v29 = vld [vmem:[#allocation119_spill] sm:$0xff] }
 0x354   : > { %v2426_v18 = vmul.f32 %v5994_v17, %v8714_v37  ;;  %v8715_v28 = vld [vmem:[#allocation112_spill] sm:$0xff]  ;;  %v2685_v61 = vadd.f32 %v6094_v8, %v2550_v62  ;;  %v2555_v24 = vadd.f32 %v2427_v45, %v5991_v44  ;;  %v2429_v58 = vmul.f32 %v5994_v17, %v8716_v11  ;;  %v6274_v23 = vpop.permute.xlu1 %2211  ;;  %v8722_v45 = vld [vmem:[#allocation121_spill] sm:$0xff] }
 0x355   : > { %8710 = vst [vmem:[#allocation39_spill] sm:$0xff] %v6255_v54  ;;  %v1699_v22 = vmul.f32 %v5641_v52, %v8715_v28  ;;  %v2688_v33 = vadd.f32 %v6094_v8, %v2553_v27  ;;  %8717 = vst [vmem:[#allocation43_spill] sm:$0xff] %v6274_v23  ;;  %v3079_v19 = vsel %vm3072_vm0, %v2946_v26, 0.0  ;;  %v2947_v53 = vmul.f32 %v6182_v41, %v2812_v9  ;;  %v8720_v28 = vld [vmem:[#allocation117_spill] sm:$0xff]  ;;  %v8721_v60 = vld [vmem:[#allocation116_spill] sm:$0xff]  ;;  %v6287_v27 = vpop.permute.xlu0 %2223 }
 0x356   : > { %v2814_v38 = vmax.f32 %v2686_v51, 0.0  ;;  %v6279_v37 = vadd.f32 %v1698_v36, %v8718_v29  ;;  %v1700_v62 = vmul.f32 %v5641_v52, %v8720_v28  ;;  %v1701_v44 = vmul.f32 %v5641_v52, %v8721_v60  ;;  %3080 = vadd.xlane.f32.xlu0 %v3079_v19  ;;  %8723 = vst [vmem:[#allocation42_spill] sm:$0xff] %v6287_v27  ;;  %v8724_v51 = vld [vmem:[#allocation218_spill] sm:$0xff]  ;;  %v8727_v19 = vld [vmem:[#allocation223_spill] sm:$0xff] }
 0x357   : > { %v1702_v11 = vmul.f32 %v5641_v52, %v8722_v45  ;;  %v2687_v26 = vadd.f32 %v6094_v8, %v2552_v40  ;;  %v2554_v9 = vadd.f32 %v2426_v18, %v5988_v31  ;;  %v2428_v36 = vmul.f32 %v5994_v17, %v8724_v51  ;;  %v8725_v23 = vld [vmem:[#allocation118_spill] sm:$0xff]  ;;  %v8728_v51 = vld [vmem:[#allocation123_spill] sm:$0xff] }
 0x358   : > { %8719 = vst [vmem:[#allocation49_spill] sm:$0xff] %v6279_v37  ;;  %v2945_v29 = vmul.f32 %v6182_v41, %v2810_v25  ;;  %v6295_v28 = vadd.f32 %v1699_v22, %v8725_v23  ;;  %v2690_v60 = vadd.f32 %v6094_v8, %v2555_v24  ;;  %v2557_v37 = vadd.f32 %v2429_v58, %v6000_v14  ;;  %v6301_v54 = vpop.permute.xlu1 %2219  ;;  %v8729_v22 = vld [vmem:[#allocation122_spill] sm:$0xff]  ;;  %v8730_v24 = vld [vmem:[#allocation127_spill] sm:$0xff]  ;;  %v8731_v14 = vld [vmem:[#allocation120_spill] sm:$0xff] }
 0x359   : > { %v2813_v45 = vmax.f32 %v2685_v61, 0.0  ;;  %v2431_v27 = vmul.f32 %v5994_v17, %v8727_v19  ;;  %v3082_v31 = vsel %vm3072_vm0, %v2947_v53, 0.0  ;;  %v2949_v40 = vmul.f32 %v6182_v41, %v2814_v38  ;;  %v6316_v58 = vpop.permute.xlu0 %2231  ;;  %v8733_v19 = vld [vmem:[#allocation220_spill] sm:$0xff] }
 0x35a   : > { %8726 = vst [vmem:[#allocation47_spill] sm:$0xff] %v6295_v28  ;;  %v2816_v18 = vmax.f32 %v2688_v33, 0.0  ;;  %v6306_v25 = vadd.f32 %v1700_v62, %v8728_v51  ;;  %v6309_v23 = vadd.f32 %v1701_v44, %v8729_v22  ;;  %v6312_v28 = vadd.f32 %v1702_v11, %v8730_v24  ;;  %3083 = vadd.xlane.f32.xlu0 %v3082_v31  ;;  %v8734_v31 = vld [vmem:[#allocation225_spill] sm:$0xff] }
 0x35b   : > { %v1703_v61 = vmul.f32 %v5641_v52, %v8731_v14  ;;  %8732 = vst [vmem:[#allocation46_spill] sm:$0xff] %v6316_v58  ;;  %v2689_v53 = vadd.f32 %v6094_v8, %v2554_v9  ;;  %v2556_v38 = vadd.f32 %v2428_v36, %v5997_v30  ;;  %v3076_v33 = vsel %vm3072_vm0, %v2945_v29, 0.0  ;;  %v8737_v29 = vld [vmem:[#allocation125_spill] sm:$0xff] }
 0x35c   : > { %v2815_v62 = vmax.f32 %v2687_v26, 0.0  ;;  %v2430_v44 = vmul.f32 %v5994_v17, %v8733_v19  ;;  %v2692_v51 = vadd.f32 %v6094_v8, %v2557_v37  ;;  %v2948_v11 = vmul.f32 %v6182_v41, %v2813_v45  ;;  %v6328_v58 = vpop.permute.xlu1 %2227  ;;  %v8736_v26 = vld [vmem:[#allocation126_spill] sm:$0xff]  ;;  %v8738_v19 = vld [vmem:[#allocation124_spill] sm:$0xff] }
 0x35d   : > { %v2818_v22 = vmax.f32 %v2690_v60, 0.0  ;;  %v2559_v24 = vadd.f32 %v2431_v27, %v6014_v43  ;;  %v2433_v14 = vmul.f32 %v5994_v17, %v8734_v31  ;;  %8735 = vst [vmem:[#allocation48_spill] sm:$0xff] %v6328_v58  ;;  %v3088_v30 = vsel %vm3072_vm0, %v2949_v40, 0.0  ;;  %v6339_v43 = vpop.permute.xlu0 %2239  ;;  %3077 = vadd.xlane.f32.xlu1 %v3076_v33  ;;  %v8740_v45 = vld [vmem:[#allocation222_spill] sm:$0xff]  ;;  %v8741_v33 = vld [vmem:[#allocation227_spill] sm:$0xff] }
 0x35e   : > { %v2951_v9 = vmul.f32 %v6182_v41, %v2816_v18  ;;  %v6333_v36 = vadd.f32 %v1703_v61, %v8736_v26  ;;  %v1704_v37 = vmul.f32 %v5641_v52, %v8737_v29  ;;  %v1705_v60 = vmul.f32 %v5641_v52, %v8738_v19  ;;  %3089 = vadd.xlane.f32.xlu0 %v3088_v30 }
 0x35f   : > { %8739 = vst [vmem:[#allocation53_spill] sm:$0xff] %v6339_v43  ;;  %v2691_v27 = vadd.f32 %v6094_v8, %v2556_v38  ;;  %v2432_v40 = vmul.f32 %v5994_v17, %v8740_v45  ;;  %v2950_v18 = vmul.f32 %v6182_v41, %v2815_v62  ;;  %v2817_v31 = vmax.f32 %v2689_v53, 0.0  ;;  %v8742_v53 = vld [vmem:[#allocation130_spill] sm:$0xff] }
 0x360   : > { %v2558_v61 = vadd.f32 %v2430_v44, %v6011_v39  ;;  %v3085_v26 = vsel %vm3072_vm0, %v2948_v11, 0.0  ;;  %v2953_v29 = vmul.f32 %v6182_v41, %v2818_v22  ;;  %v2820_v58 = vmax.f32 %v2692_v51, 0.0  ;;  %v8743_v39 = vld [vmem:[#allocation129_spill] sm:$0xff]  ;;  %v6362_v11 = vpop.permute.xlu1 %2235 }
 0x361   : > { %v2694_v30 = vadd.f32 %v6094_v8, %v2559_v24  ;;  %v2561_v19 = vadd.f32 %v2433_v14, %v6023_v21  ;;  %v2435_v38 = vmul.f32 %v5994_v17, %v8741_v33  ;;  %v3094_v43 = vsel %vm3072_vm0, %v2951_v9, 0.0  ;;  %3086 = vadd.xlane.f32.xlu1 %v3085_v26  ;;  %v6364_v21 = vpop.permute.xlu0 %2247  ;;  %v8745_v9 = vld [vmem:[#allocation224_spill] sm:$0xff]  ;;  %v8746_v26 = vld [vmem:[#allocation229_spill] sm:$0xff] }
 0x362   : > { %v6354_v45 = vadd.f32 %v1704_v37, %v5618_v59  ;;  %v6357_v62 = vadd.f32 %v1705_v60, %v8742_v53  ;;  %v1706_v44 = vmul.f32 %v5641_v52, %v8743_v39  ;;  %3095 = vadd.xlane.f32.xlu0 %v3094_v43  ;;  %v2560_v51 = vadd.f32 %v2432_v40, %v6017_v16  ;;  %v8748_v53 = vld [vmem:[#allocation132_spill] sm:$0xff] }
 0x363   : > { %8744 = vst [vmem:[#allocation52_spill] sm:$0xff] %v6364_v21  ;;  %v3091_v22 = vsel %vm3072_vm0, %v2950_v18, 0.0  ;;  %v2952_v24 = vmul.f32 %v6182_v41, %v2817_v31  ;;  %v2819_v59 = vmax.f32 %v2691_v27, 0.0  ;;  %v2693_v14 = vadd.f32 %v6094_v8, %v2558_v61  ;;  %v8747_v27 = vld [vmem:[#allocation128_spill] sm:$0xff] }
 0x364   : > { %v2434_v37 = vmul.f32 %v5994_v17, %v8745_v9  ;;  %v3100_v60 = vsel %vm3072_vm0, %v2953_v29, 0.0  ;;  %v2955_v43 = vmul.f32 %v6182_v41, %v2820_v58  ;;  %v2696_v16 = vadd.f32 %v6094_v8, %v2561_v19  ;;  %v8749_v29 = vld [vmem:[#allocation226_spill] sm:$0xff] }
 0x365   : > { %v2563_v40 = vadd.f32 %v2435_v38, %v6029_v49  ;;  %v2437_v33 = vmul.f32 %v5994_v17, %v8746_v26  ;;  %v2822_v18 = vmax.f32 %v2694_v30, 0.0  ;;  %v6378_v31 = vadd.f32 %v1706_v44, %v5626_v47  ;;  %3092 = vadd.xlane.f32.xlu1 %v3091_v22  ;;  %v8750_v38 = vld [vmem:[#allocation231_spill] sm:$0xff] }
 0x366   : > { %v1707_v61 = vmul.f32 %v5641_v52, %v8747_v27  ;;  %v1708_v39 = vmul.f32 %v5641_v52, %v8748_v53  ;;  %3101 = vadd.xlane.f32.xlu0 %v3100_v60  ;;  %v2695_v58 = vadd.f32 %v6094_v8, %v2560_v51  ;;  %v2436_v49 = vmul.f32 %v5994_v17, %v8749_v29  ;;  %v6395_v51 = vpop.permute.xlu1 %2243  ;;  %v6397_v27 = vpop.permute.xlu0 %2255 }
 0x367   : > { %v3097_v19 = vsel %vm3072_vm0, %v2952_v24, 0.0  ;;  %v2954_v30 = vmul.f32 %v6182_v41, %v2819_v59  ;;  %v2562_v47 = vadd.f32 %v2434_v37, %v6026_v12  ;;  %v2439_v44 = vmul.f32 %v5994_v17, %v8750_v38  ;;  %8751 = vst [vmem:[#allocation57_spill] sm:$0xff] %v6395_v51  ;;  %8752 = vst [vmem:[#allocation209_spill] sm:$0xff] %v6397_v27  ;;  %v8753_v59 = vld [vmem:[#allocation131_spill] sm:$0xff]  ;;  %v8754_v37 = vld [vmem:[#allocation144_spill] sm:$0xff] }
 0x368   : > { %v3106_v9 = vsel %vm3072_vm0, %v2955_v43, 0.0  ;;  %v2821_v26 = vmax.f32 %v2693_v14, 0.0  ;;  %v2698_v60 = vadd.f32 %v6094_v8, %v2563_v40  ;;  %v2565_v22 = vadd.f32 %v2437_v33, %v6045_v34  ;;  %v8755_v43 = vld [vmem:[#allocation228_spill] sm:$0xff]  ;;  %v8756_v38 = vld [vmem:[#allocation233_spill] sm:$0xff] }
 0x369   : > { %v2957_v24 = vmul.f32 %v6182_v41, %v2822_v18  ;;  %v2824_v53 = vmax.f32 %v2696_v16, 0.0  ;;  %v6401_v29 = vadd.f32 %v1707_v61, %v8753_v59  ;;  %v6404_v12 = vadd.f32 %v1708_v39, %v5634_v46  ;;  %3098 = vadd.xlane.f32.xlu1 %v3097_v19  ;;  %v8757_v59 = vld [vmem:[#allocation133_spill] sm:$0xff] }
 0x36a   : > { %v1709_v14 = vmul.f32 %v5641_v52, %v8754_v37  ;;  %3107 = vadd.xlane.f32.xlu0 %v3106_v9  ;;  %v2564_v34 = vadd.f32 %v2436_v49, %v6042_v15  ;;  %v2438_v40 = vmul.f32 %v5994_v17, %v8755_v43  ;;  %v3103_v33 = vsel %vm3072_vm0, %v2954_v30, 0.0 }
 0x36b   : > { %v2823_v18 = vmax.f32 %v2695_v58, 0.0  ;;  %v2697_v16 = vadd.f32 %v6094_v8, %v2562_v47  ;;  %v2567_v61 = vadd.f32 %v2439_v44, %v6065_v10  ;;  %v2441_v46 = vmul.f32 %v5994_v17, %v8756_v38  ;;  %v8758_v58 = vld [vmem:[#allocation145_spill] sm:$0xff]  ;;  %v8759_v47 = vld [vmem:[#allocation146_spill] sm:$0xff] }
 0x36c   : > { %v2956_v39 = vmul.f32 %v6182_v41, %v2821_v26  ;;  %v2700_v9 = vadd.f32 %v6094_v8, %v2565_v22  ;;  %v3112_v19 = vsel %vm3072_vm0, %v2957_v24, 0.0  ;;  %v2959_v15 = vmul.f32 %v6182_v41, %v2824_v53  ;;  %v8760_v22 = vld [vmem:[#allocation230_spill] sm:$0xff]  ;;  %v6431_v53 = vpop.permute.xlu1 %2251 }
 0x36d   : > { %v2826_v49 = vmax.f32 %v2698_v60, 0.0  ;;  %v6421_v37 = vadd.f32 %v1709_v14, %v8757_v59  ;;  %v1710_v30 = vmul.f32 %v5641_v52, %v8758_v58  ;;  %v1711_v10 = vmul.f32 %v5641_v52, %v8759_v47  ;;  %3104 = vadd.xlane.f32.xlu1 %v3103_v33  ;;  %8761 = vst [vmem:[#allocation51_spill] sm:$0xff] %v6431_v53  ;;  %v6433_v60 = vpop.permute.xlu0 %2263  ;;  %v8763_v59 = vld [vmem:[#allocation235_spill] sm:$0xff] }
 0x36e   : > { %3113 = vadd.xlane.f32.xlu0 %v3112_v19  ;;  %v2699_v44 = vadd.f32 %v6094_v8, %v2564_v34  ;;  %v2566_v26 = vadd.f32 %v2438_v40, %v6054_v5  ;;  %v2440_v24 = vmul.f32 %v5994_v17, %v8760_v22  ;;  %8762 = vst [vmem:[#allocation50_spill] sm:$0xff] %v6433_v60  ;;  %v3109_v19 = vsel %vm3072_vm0, %v2956_v39, 0.0  ;;  %v8766_v22 = vld [vmem:[#allocation237_spill] sm:$0xff] }
 0x36f   : > { %v2958_v14 = vmul.f32 %v6182_v41, %v2823_v18  ;;  %v2702_v43 = vadd.f32 %v6094_v8, %v2567_v61  ;;  %v2569_v38 = vadd.f32 %v2441_v46, %v6077_v3  ;;  %v2825_v33 = vmax.f32 %v2697_v16, 0.0  ;;  %v8764_v61 = vld [vmem:[#allocation147_spill] sm:$0xff] }
 0x370   : > { %v2443_v34 = vmul.f32 %v5994_v17, %v8763_v59  ;;  %v3118_v5 = vsel %vm3072_vm0, %v2959_v15, 0.0  ;;  %v2961_v40 = vmul.f32 %v6182_v41, %v2826_v49  ;;  %v2828_v58 = vmax.f32 %v2700_v9, 0.0  ;;  %v8765_v49 = vld [vmem:[#allocation232_spill] sm:$0xff]  ;;  %v6461_v59 = vpop.permute.xlu1 %2259 }
 0x371   : > { %v6444_v47 = vadd.f32 %v1710_v30, %v5649_v56  ;;  %v6447_v18 = vadd.f32 %v1711_v10, %v5638_v48  ;;  %v1712_v3 = vmul.f32 %v5641_v52, %v8764_v61  ;;  %3110 = vadd.xlane.f32.xlu1 %v3109_v19  ;;  %v2701_v16 = vadd.f32 %v6094_v8, %v2566_v26  ;;  %v6463_v26 = vpop.permute.xlu0 %2271 }
 0x372   : > { %3119 = vadd.xlane.f32.xlu0 %v3118_v5  ;;  %v2568_v46 = vadd.f32 %v2440_v24, %v6074_v1  ;;  %v3115_v39 = vsel %vm3072_vm0, %v2958_v14, 0.0  ;;  %v2827_v15 = vmax.f32 %v2699_v44, 0.0  ;;  %v2442_v9 = vmul.f32 %v5994_v17, %v8765_v49  ;;  %8767 = vst [vmem:[#allocation56_spill] sm:$0xff] %v6461_v59  ;;  %8768 = vst [vmem:[#allocation61_spill] sm:$0xff] %v6463_v26  ;;  %v8769_v14 = vld [vmem:[#allocation148_spill] sm:$0xff] }
 0x373   : > { %v2704_v56 = vadd.f32 %v6094_v8, %v2569_v38  ;;  %v2960_v48 = vmul.f32 %v6182_v41, %v2825_v33  ;;  %v2830_v30 = vmax.f32 %v2702_v43, 0.0  ;;  %v2571_v10 = vadd.f32 %v2443_v34, %v6084_v4  ;;  %v8770_v43 = vld [vmem:[#allocation149_spill] sm:$0xff]  ;;  %v8771_v34 = vld [vmem:[#allocation234_spill] sm:$0xff] }
 0x374   : > { %v2445_v19 = vmul.f32 %v5994_v17, %v8766_v22  ;;  %v3124_v1 = vsel %vm3072_vm0, %v2961_v40, 0.0  ;;  %v2963_v44 = vmul.f32 %v6182_v41, %v2828_v58  ;;  %v6468_v24 = vadd.f32 %v1712_v3, %v5657_v57 }
 0x375   : > { %v1713_v38 = vmul.f32 %v5641_v52, %v8769_v14  ;;  %v1714_v4 = vmul.f32 %v5641_v52, %v8770_v43  ;;  %3116 = vadd.xlane.f32.xlu1 %v3115_v39  ;;  %v2703_v33 = vadd.f32 %v6094_v8, %v2568_v46  ;;  %v2444_v5 = vmul.f32 %v5994_v17, %v8771_v34  ;;  %v8772_v39 = vld [vmem:[#allocation239_spill] sm:$0xff] }
 0x376   : > { %3125 = vadd.xlane.f32.xlu0 %v3124_v1  ;;  %v2962_v40 = vmul.f32 %v6182_v41, %v2827_v15  ;;  %v2829_v61 = vmax.f32 %v2701_v16, 0.0  ;;  %v2570_v58 = vadd.f32 %v2442_v9, %v6080_v20  ;;  %v3121_v57 = vsel %vm3072_vm0, %v2960_v48, 0.0  ;;  %v8773_v20 = vld [vmem:[#allocation150_spill] sm:$0xff] }
 0x377   : > { %v2965_v3 = vmul.f32 %v6182_v41, %v2830_v30  ;;  %v2832_v49 = vmax.f32 %v2704_v56, 0.0  ;;  %v2706_v22 = vadd.f32 %v6094_v8, %v2571_v10  ;;  %v2573_v1 = vadd.f32 %v2445_v19, %v6101_v35  ;;  %v6495_v56 = vpop.permute.xlu1 %2267  ;;  %v6497_v35 = vpop.permute.xlu0 %2279 }
 0x378   : > { %v2447_v46 = vmul.f32 %v5994_v17, %v8772_v39  ;;  %v3130_v14 = vsel %vm3072_vm0, %v2963_v44, 0.0  ;;  %v6487_v43 = vadd.f32 %v1713_v38, %v5653_v50  ;;  %v6490_v16 = vadd.f32 %v1714_v4, %v5666_v0  ;;  %8774 = vst [vmem:[#allocation55_spill] sm:$0xff] %v6495_v56  ;;  %8775 = vst [vmem:[#allocation60_spill] sm:$0xff] %v6497_v35  ;;  %v8776_v0 = vld [vmem:[#allocation236_spill] sm:$0xff] }
 0x379   : > { %v1715_v15 = vmul.f32 %v5641_v52, %v8773_v20  ;;  %3122 = vadd.xlane.f32.xlu1 %v3121_v57  ;;  %v2572_v9 = vadd.f32 %v2444_v5, %v6087_v2  ;;  %v3127_v48 = vsel %vm3072_vm0, %v2962_v40, 0.0  ;;  %v2964_v30 = vmul.f32 %v6182_v41, %v2829_v61  ;;  %v8777_v4 = vld [vmem:[#allocation20_spill] sm:$0xff]  ;;  %v8778_v5 = vld [vmem:[#allocation241_spill] sm:$0xff] }
 0x37a   : > { %3131 = vadd.xlane.f32.xlu0 %v3130_v14  ;;  %v2831_v50 = vmax.f32 %v2703_v33, 0.0  ;;  %v2705_v10 = vadd.f32 %v6094_v8, %v2570_v58  ;;  %v2446_v19 = vmul.f32 %v5994_v17, %v8776_v0  ;;  %v3136_v44 = vsel %vm3072_vm0, %v2965_v3, 0.0  ;;  %v8779_v39 = vld [vmem:[#allocation136_spill] sm:$0xff]  ;;  %v8780_v33 = vld [vmem:[#allocation151_spill] sm:$0xff]  ;;  %v8783_v0 = vld [vmem:[#allocation21_spill] sm:$0xff] }
 0x37b   : > { %v2967_v38 = vmul.f32 %v6182_v41, %v2832_v49  ;;  %v2708_v2 = vadd.f32 %v6094_v8, %v2573_v1  ;;  %v2575_v34 = vadd.f32 %v2447_v46, %v8777_v4  ;;  %v2449_v57 = vmul.f32 %v5994_v17, %v8778_v5  ;;  %v8781_v14 = vld [vmem:[#allocation152_spill] sm:$0xff]  ;;  %v8782_v49 = vld [vmem:[#allocation238_spill] sm:$0xff]  ;;  %v8784_v4 = vld [vmem:[#allocation243_spill] sm:$0xff]  ;;  %v6530_v35 = vpop.permute.xlu0 %2287 }
 0x37c   : > { %v2834_v40 = vmax.f32 %v2706_v22, 0.0  ;;  %v6511_v61 = vadd.f32 %v1715_v15, %v8779_v39  ;;  %v1716_v58 = vmul.f32 %v5641_v52, %v8780_v33  ;;  %v1717_v20 = vmul.f32 %v5641_v52, %v8781_v14  ;;  %8787 = vst [vmem:[#allocation64_spill] sm:$0xff] %v6530_v35 }
 0x37d   : > { %3128 = vadd.xlane.f32.xlu1 %v3127_v48  ;;  %v2707_v3 = vadd.f32 %v6094_v8, %v2572_v9  ;;  %v2448_v1 = vmul.f32 %v5994_v17, %v8782_v49  ;;  %v3133_v46 = vsel %vm3072_vm0, %v2964_v30, 0.0  ;;  %v2966_v22 = vmul.f32 %v6182_v41, %v2831_v50  ;;  %v8785_v48 = vld [vmem:[#allocation247_spill] sm:$0xff]  ;;  %v6528_v9 = vpop.permute.xlu1 %2275 }
 0x37e   : > { %3137 = vadd.xlane.f32.xlu0 %v3136_v44  ;;  %v2574_v15 = vadd.f32 %v2446_v19, %v8783_v0  ;;  %v2451_v5 = vmul.f32 %v5994_v17, %v8784_v4  ;;  %v3142_v39 = vsel %vm3072_vm0, %v2967_v38, 0.0  ;;  %v2833_v33 = vmax.f32 %v2705_v10, 0.0  ;;  %8786 = vst [vmem:[#allocation65_spill] sm:$0xff] %v6528_v9  ;;  %v8788_v50 = vld [vmem:[#allocation263_spill] sm:$0xff]  ;;  %v8789_v19 = vld [vmem:[#allocation137_spill] sm:$0xff]  ;;  %v8791_v38 = vld [vmem:[#allocation24_spill] sm:$0xff] }
 0x37f   : > { %v2710_v44 = vadd.f32 %v6094_v8, %v2575_v34  ;;  %v2577_v14 = vadd.f32 %v2449_v57, %v8785_v48  ;;  %v2969_v30 = vmul.f32 %v6182_v41, %v2834_v40  ;;  %v2836_v49 = vmax.f32 %v2708_v2, 0.0  ;;  %v8790_v4 = vld [vmem:[#allocation153_spill] sm:$0xff]  ;;  %v8792_v57 = vld [vmem:[#allocation240_spill] sm:$0xff] }
 0x380   : > { %v6534_v26 = vadd.f32 %v1716_v58, %v8788_v50  ;;  %v6537_v0 = vadd.f32 %v1717_v20, %v8789_v19  ;;  %v1718_v10 = vmul.f32 %v5641_v52, %v8790_v4  ;;  %v2576_v34 = vadd.f32 %v2448_v1, %v8791_v38  ;;  %v8793_v58 = vld [vmem:[#allocation23_spill] sm:$0xff]  ;;  %v8794_v9 = vld [vmem:[#allocation245_spill] sm:$0xff] }
 0x381   : > { %3134 = vadd.xlane.f32.xlu1 %v3133_v46  ;;  %v2450_v48 = vmul.f32 %v5994_v17, %v8792_v57  ;;  %v3139_v35 = vsel %vm3072_vm0, %v2966_v22, 0.0  ;;  %v2835_v40 = vmax.f32 %v2707_v3, 0.0  ;;  %v2709_v2 = vadd.f32 %v6094_v8, %v2574_v15  ;;  %v8795_v38 = vld [vmem:[#allocation265_spill] sm:$0xff]  ;;  %v8796_v3 = vld [vmem:[#allocation154_spill] sm:$0xff]  ;;  %v8797_v15 = vld [vmem:[#allocation155_spill] sm:$0xff] }
 0x382   : > { %3143 = vadd.xlane.f32.xlu0 %v3142_v39  ;;  %v2579_v50 = vadd.f32 %v2451_v5, %v8793_v58  ;;  %v2453_v20 = vmul.f32 %v5994_v17, %v8794_v9  ;;  %v2968_v19 = vmul.f32 %v6182_v41, %v2833_v33  ;;  %v2712_v39 = vadd.f32 %v6094_v8, %v2577_v14  ;;  %v8798_v9 = vld [vmem:[#allocation18_spill] sm:$0xff] }
 0x383   : > { %v3148_v46 = vsel %vm3072_vm0, %v2969_v30, 0.0  ;;  %v2971_v1 = vmul.f32 %v6182_v41, %v2836_v49  ;;  %v2838_v4 = vmax.f32 %v2710_v44, 0.0  ;;  %v6554_v57 = vadd.f32 %v1718_v10, %v8795_v38  ;;  %v8799_v58 = vld [vmem:[#allocation242_spill] sm:$0xff]  ;;  %v6564_v49 = vpop.permute.xlu1 %2283  ;;  %v6566_v44 = vpop.permute.xlu0 %2295 }
 0x384   : > { %v1719_v22 = vmul.f32 %v5641_v52, %v8796_v3  ;;  %v1720_v5 = vmul.f32 %v5641_v52, %v8797_v15  ;;  %v2711_v33 = vadd.f32 %v6094_v8, %v2576_v34  ;;  %v2578_v14 = vadd.f32 %v2450_v48, %v8798_v9  ;;  %8800 = vst [vmem:[#allocation54_spill] sm:$0xff] %v6564_v49  ;;  %v8802_v3 = vld [vmem:[#allocation33_spill] sm:$0xff]  ;;  %v8803_v15 = vld [vmem:[#allocation248_spill] sm:$0xff] }
 0x385   : > { %3140 = vadd.xlane.f32.xlu1 %v3139_v35  ;;  %v2452_v30 = vmul.f32 %v5994_v17, %v8799_v58  ;;  %8801 = vst [vmem:[#allocation69_spill] sm:$0xff] %v6566_v44  ;;  %v2970_v10 = vmul.f32 %v6182_v41, %v2835_v40  ;;  %v2714_v38 = vadd.f32 %v6094_v8, %v2579_v50  ;;  %v2837_v35 = vmax.f32 %v2709_v2, 0.0  ;;  %v8804_v49 = vld [vmem:[#allocation264_spill] sm:$0xff]  ;;  %v8805_v44 = vld [vmem:[#allocation267_spill] sm:$0xff] }
 0x386   : > { %3149 = vadd.xlane.f32.xlu0 %v3148_v46  ;;  %v2581_v60 = vadd.f32 %v2453_v20, %v8802_v3  ;;  %v3145_v46 = vsel %vm3072_vm0, %v2968_v19, 0.0  ;;  %v2455_v34 = vmul.f32 %v5994_v17, %v8803_v15  ;;  %v3154_v48 = vsel %vm3072_vm0, %v2971_v1, 0.0  ;;  %v8806_v50 = vld [vmem:[#allocation156_spill] sm:$0xff] }
 0x387   : > { %v2973_v9 = vmul.f32 %v6182_v41, %v2838_v4  ;;  %v2840_v58 = vmax.f32 %v2712_v39, 0.0  ;;  %v6577_v56 = vadd.f32 %v1719_v22, %v8804_v49  ;;  %v6580_v40 = vadd.f32 %v1720_v5, %v8805_v44  ;;  %v8807_v19 = vld [vmem:[#allocation28_spill] sm:$0xff] }
 0x388   : > { %v1721_v20 = vmul.f32 %v5641_v52, %v8806_v50  ;;  %v2713_v2 = vadd.f32 %v6094_v8, %v2578_v14  ;;  %v2580_v3 = vadd.f32 %v2452_v30, %v8807_v19  ;;  %v3151_v1 = vsel %vm3072_vm0, %v2970_v10, 0.0  ;;  %v8808_v4 = vld [vmem:[#allocation244_spill] sm:$0xff]  ;;  %v8809_v50 = vld [vmem:[#allocation250_spill] sm:$0xff]  ;;  %v6596_v14 = vpop.permute.xlu0 %2303 }
 0x389   : > { %3146 = vadd.xlane.f32.xlu1 %v3145_v46  ;;  %v2839_v15 = vmax.f32 %v2711_v33, 0.0  ;;  %v2454_v39 = vmul.f32 %v5994_v17, %v8808_v4  ;;  %v2716_v22 = vadd.f32 %v6094_v8, %v2581_v60  ;;  %v2972_v5 = vmul.f32 %v6182_v41, %v2837_v35  ;;  %8811 = vst [vmem:[#allocation73_spill] sm:$0xff] %v6596_v14  ;;  %v8812_v10 = vld [vmem:[#allocation266_spill] sm:$0xff]  ;;  %v8813_v60 = vld [vmem:[#allocation157_spill] sm:$0xff] }
 0x38a   : > { %3155 = vadd.xlane.f32.xlu0 %v3154_v48  ;;  %v2842_v49 = vmax.f32 %v2714_v38, 0.0  ;;  %v2583_v44 = vadd.f32 %v2455_v34, %v6165_v7  ;;  %v2457_v46 = vmul.f32 %v5994_v17, %v8809_v50  ;;  %v6594_v48 = vpop.permute.xlu1 %2291  ;;  %v3160_v30 = vsel %vm3072_vm0, %v2973_v9, 0.0  ;;  %v8814_v38 = vld [vmem:[#allocation158_spill] sm:$0xff] }
 0x38b   : > { %8810 = vst [vmem:[#allocation68_spill] sm:$0xff] %v6594_v48  ;;  %v2975_v33 = vmul.f32 %v6182_v41, %v2840_v58  ;;  %v6601_v19 = vadd.f32 %v1721_v20, %v8812_v10  ;;  %v1722_v35 = vmul.f32 %v5641_v52, %v8813_v60  ;;  %v1723_v7 = vmul.f32 %v5641_v52, %v8814_v38  ;;  %v8815_v4 = vld [vmem:[#allocation246_spill] sm:$0xff] }
 0x38c   : > { %v2715_v34 = vadd.f32 %v6094_v8, %v2580_v3  ;;  %v2456_v50 = vmul.f32 %v5994_v17, %v8815_v4  ;;  %v2974_v9 = vmul.f32 %v6182_v41, %v2839_v15  ;;  %v2841_v14 = vmax.f32 %v2713_v2, 0.0  ;;  %v8817_v4 = vld [vmem:[#allocation269_spill] sm:$0xff]  ;;  %v8818_v2 = vld [vmem:[#allocation268_spill] sm:$0xff] }
 0x38d   : > { %3152 = vadd.xlane.f32.xlu1 %v3151_v1  ;;  %v2582_v58 = vadd.f32 %v2454_v39, %v6162_v63  ;;  %v3157_v20 = vsel %vm3072_vm0, %v2972_v5, 0.0  ;;  %v2977_v10 = vmul.f32 %v6182_v41, %v2842_v49  ;;  %v2844_v60 = vmax.f32 %v2716_v22, 0.0  ;;  %v8816_v1 = vld [vmem:[#allocation253_spill] sm:$0xff]  ;;  %v8819_v63 = vld [vmem:[#allocation159_spill] sm:$0xff]  ;;  %v8820_v22 = vld [vmem:[#allocation32_spill] sm:$0xff] }
 0x38e   : > { %3161 = vadd.xlane.f32.xlu0 %v3160_v30  ;;  %v2718_v48 = vadd.f32 %v6094_v8, %v2583_v44  ;;  %v2585_v30 = vadd.f32 %v2457_v46, %v6171_v42  ;;  %v2459_v3 = vmul.f32 %v5994_v17, %v8816_v1  ;;  %v3166_v38 = vsel %vm3072_vm0, %v2975_v33, 0.0  ;;  %v6628_v49 = vpop.permute.xlu1 %2299  ;;  %v6630_v42 = vpop.permute.xlu0 %2311 }
 0x38f   : > { %v6620_v27 = vadd.f32 %v1722_v35, %v8817_v4  ;;  %v6623_v15 = vadd.f32 %v1723_v7, %v8818_v2  ;;  %v1724_v39 = vmul.f32 %v5641_v52, %v8819_v63  ;;  %v2584_v5 = vadd.f32 %v2456_v50, %v8820_v22  ;;  %8821 = vst [vmem:[#allocation59_spill] sm:$0xff] %v6628_v49  ;;  %v8823_v7 = vld [vmem:[#allocation249_spill] sm:$0xff]  ;;  %v8825_v63 = vld [vmem:[#allocation255_spill] sm:$0xff] }
 0x390   : > { %8822 = vst [vmem:[#allocation58_spill] sm:$0xff] %v6630_v42  ;;  %v3163_v44 = vsel %vm3072_vm0, %v2974_v9, 0.0  ;;  %v2976_v46 = vmul.f32 %v6182_v41, %v2841_v14  ;;  %v2843_v33 = vmax.f32 %v2715_v34, 0.0  ;;  %v2717_v35 = vadd.f32 %v6094_v8, %v2582_v58  ;;  %v8826_v42 = vld [vmem:[#allocation271_spill] sm:$0xff]  ;;  %v8827_v34 = vld [vmem:[#allocation160_spill] sm:$0xff]  ;;  %v8828_v49 = vld [vmem:[#allocation161_spill] sm:$0xff] }
 0x391   : > { %3158 = vadd.xlane.f32.xlu1 %v3157_v20  ;;  %v2458_v1 = vmul.f32 %v5994_v17, %v8823_v7  ;;  %v3172_v4 = vsel %vm3072_vm0, %v2977_v10, 0.0  ;;  %v2979_v20 = vmul.f32 %v6182_v41, %v2844_v60  ;;  %v2720_v50 = vadd.f32 %v6094_v8, %v2585_v30  ;;  %v8829_v60 = vld [vmem:[#allocation251_spill] sm:$0xff] }
 0x392   : > { %3167 = vadd.xlane.f32.xlu0 %v3166_v38  ;;  %v8824_v38 = vld [vmem:[#allocation36_spill] sm:$0xff]  ;;  %v2461_v22 = vmul.f32 %v5994_v17, %v8825_v63  ;;  %v2846_v9 = vmax.f32 %v2718_v48, 0.0  ;;  %v6644_v14 = vadd.f32 %v1724_v39, %v8826_v42  ;;  %v1725_v58 = vmul.f32 %v5641_v52, %v8827_v34  ;;  %v8831_v42 = vld [vmem:[#allocation257_spill] sm:$0xff]  ;;  %v6663_v21 = vpop.permute.xlu0 %2319 }
 0x393   : > { %v2587_v2 = vadd.f32 %v2459_v3, %v8824_v38  ;;  %v1726_v7 = vmul.f32 %v5641_v52, %v8828_v49  ;;  %v2719_v10 = vadd.f32 %v6094_v8, %v2584_v5  ;;  %v2460_v30 = vmul.f32 %v5994_v17, %v8829_v60  ;;  %v8830_v38 = vld [vmem:[#allocation27_spill] sm:$0xff]  ;;  %v6661_v5 = vpop.permute.xlu1 %2307  ;;  %8834 = vst [vmem:[#allocation62_spill] sm:$0xff] %v6663_v21 }
 0x394   : > { %v3169_v3 = vsel %vm3072_vm0, %v2976_v46, 0.0  ;;  %v2978_v48 = vmul.f32 %v6182_v41, %v2843_v33  ;;  %v2586_v39 = vadd.f32 %v2458_v1, %v8830_v38  ;;  %v2463_v63 = vmul.f32 %v5994_v17, %v8831_v42  ;;  %8833 = vst [vmem:[#allocation63_spill] sm:$0xff] %v6661_v5  ;;  %v8835_v33 = vld [vmem:[#allocation270_spill] sm:$0xff]  ;;  %v8836_v1 = vld [vmem:[#allocation275_spill] sm:$0xff] }
 0x395   : > { %3164 = vadd.xlane.f32.xlu1 %v3163_v44  ;;  %v3178_v34 = vsel %vm3072_vm0, %v2979_v20, 0.0  ;;  %v2845_v59 = vmax.f32 %v2717_v35, 0.0  ;;  %v2722_v49 = vadd.f32 %v6094_v8, %v2587_v2  ;;  %v8832_v44 = vld [vmem:[#allocation26_spill] sm:$0xff]  ;;  %v2981_v46 = vmul.f32 %v6182_v41, %v2846_v9  ;;  %v8838_v20 = vld [vmem:[#allocation41_spill] sm:$0xff]  ;;  %v8841_v5 = vld [vmem:[#allocation259_spill] sm:$0xff] }
 0x396   : > { %3173 = vadd.xlane.f32.xlu0 %v3172_v4  ;;  %v2589_v4 = vadd.f32 %v2461_v22, %v8832_v44  ;;  %v2848_v60 = vmax.f32 %v2720_v50, 0.0  ;;  %v6667_v53 = vadd.f32 %v1725_v58, %v8835_v33  ;;  %v6670_v38 = vadd.f32 %v1726_v7, %v8836_v1  ;;  %v8837_v42 = vld [vmem:[#allocation162_spill] sm:$0xff]  ;;  %v8840_v58 = vld [vmem:[#allocation35_spill] sm:$0xff] }
 0x397   : > { %v1727_v35 = vmul.f32 %v5641_v52, %v8837_v42  ;;  %v2588_v2 = vadd.f32 %v2460_v30, %v8838_v20  ;;  %v8839_v22 = vld [vmem:[#allocation254_spill] sm:$0xff]  ;;  %v3175_v21 = vsel %vm3072_vm0, %v2978_v48, 0.0  ;;  %v2847_v9 = vmax.f32 %v2719_v10, 0.0  ;;  %v8842_v20 = vld [vmem:[#allocation272_spill] sm:$0xff]  ;;  %v8843_v10 = vld [vmem:[#allocation163_spill] sm:$0xff] }
 0x398   : > { %v2462_v44 = vmul.f32 %v5994_v17, %v8839_v22  ;;  %v2721_v50 = vadd.f32 %v6094_v8, %v2586_v39  ;;  %v2591_v33 = vadd.f32 %v2463_v63, %v8840_v58  ;;  %v2465_v7 = vmul.f32 %v5994_v17, %v8841_v5  ;;  %v8844_v39 = vld [vmem:[#allocation164_spill] sm:$0xff]  ;;  %v8845_v5 = vld [vmem:[#allocation31_spill] sm:$0xff] }
 0x399   : > { %3170 = vadd.xlane.f32.xlu1 %v3169_v3  ;;  %v2980_v1 = vmul.f32 %v6182_v41, %v2845_v59  ;;  %v3184_v3 = vsel %vm3072_vm0, %v2981_v46, 0.0  ;;  %v2983_v30 = vmul.f32 %v6182_v41, %v2848_v60  ;;  %v2850_v42 = vmax.f32 %v2722_v49, 0.0  ;;  %v8846_v58 = vld [vmem:[#allocation256_spill] sm:$0xff]  ;;  %v6697_v60 = vpop.permute.xlu1 %2315  ;;  %v6699_v49 = vpop.permute.xlu0 %2327 }
 0x39a   : > { %3179 = vadd.xlane.f32.xlu0 %v3178_v34  ;;  %v2724_v34 = vadd.f32 %v6094_v8, %v2589_v4  ;;  %v6687_v22 = vadd.f32 %v1727_v35, %v8842_v20  ;;  %v1728_v48 = vmul.f32 %v5641_v52, %v8843_v10  ;;  %v1729_v63 = vmul.f32 %v5641_v52, %v8844_v39  ;;  %v8849_v39 = vld [vmem:[#allocation261_spill] sm:$0xff] }
 0x39b   : > { %v2723_v59 = vadd.f32 %v6094_v8, %v2588_v2  ;;  %v2590_v4 = vadd.f32 %v2462_v44, %v8845_v5  ;;  %v2464_v46 = vmul.f32 %v5994_v17, %v8846_v58  ;;  %8847 = vst [vmem:[#allocation67_spill] sm:$0xff] %v6697_v60  ;;  %8848 = vst [vmem:[#allocation72_spill] sm:$0xff] %v6699_v49  ;;  %v3190_v44 = vsel %vm3072_vm0, %v2983_v30, 0.0  ;;  %v8850_v60 = vld [vmem:[#allocation277_spill] sm:$0xff]  ;;  %v8851_v49 = vld [vmem:[#allocation276_spill] sm:$0xff] }
 0x39c   : > { %v2982_v35 = vmul.f32 %v6182_v41, %v2847_v9  ;;  %v2726_v20 = vadd.f32 %v6094_v8, %v2591_v33  ;;  %v2593_v10 = vadd.f32 %v2465_v7, %v6237_v55  ;;  %v2467_v2 = vmul.f32 %v5994_v17, %v8849_v39  ;;  %v8852_v33 = vld [vmem:[#allocation165_spill] sm:$0xff] }
 0x39d   : > { %3176 = vadd.xlane.f32.xlu1 %v3175_v21  ;;  %v2849_v21 = vmax.f32 %v2721_v50, 0.0  ;;  %v2985_v5 = vmul.f32 %v6182_v41, %v2850_v42  ;;  %v2852_v58 = vmax.f32 %v2724_v34, 0.0  ;;  %v6710_v51 = vadd.f32 %v1728_v48, %v8850_v60  ;;  %v8853_v7 = vld [vmem:[#allocation45_spill] sm:$0xff]  ;;  %v8854_v42 = vld [vmem:[#allocation258_spill] sm:$0xff] }
 0x39e   : > { %3185 = vadd.xlane.f32.xlu0 %v3184_v3  ;;  %v3181_v3 = vsel %vm3072_vm0, %v2980_v1, 0.0  ;;  %v6713_v9 = vadd.f32 %v1729_v63, %v8851_v49  ;;  %v1730_v55 = vmul.f32 %v5641_v52, %v8852_v33  ;;  %v2725_v50 = vadd.f32 %v6094_v8, %v2590_v4  ;;  %v8855_v33 = vld [vmem:[#allocation134_spill] sm:$0xff]  ;;  %v6729_v4 = vpop.permute.xlu0 %2335 }
 0x39f   : > { %v2592_v1 = vadd.f32 %v2464_v46, %v8853_v7  ;;  %v3187_v30 = vsel %vm3072_vm0, %v2982_v35, 0.0  ;;  %v2851_v39 = vmax.f32 %v2723_v59, 0.0  ;;  %v2466_v34 = vmul.f32 %v5994_v17, %v8854_v42  ;;  %8857 = vst [vmem:[#allocation66_spill] sm:$0xff] %v6729_v4  ;;  %v8858_v35 = vld [vmem:[#allocation279_spill] sm:$0xff]  ;;  %v8862_v42 = vld [vmem:[#allocation260_spill] sm:$0xff] }
 0x3a0   : > { %v2728_v48 = vadd.f32 %v6094_v8, %v2593_v10  ;;  %v2984_v63 = vmul.f32 %v6182_v41, %v2849_v21  ;;  %v2854_v60 = vmax.f32 %v2726_v20, 0.0  ;;  %v2595_v49 = vadd.f32 %v2467_v2, %v6252_v6  ;;  %v8860_v10 = vld [vmem:[#allocation166_spill] sm:$0xff]  ;;  %v8861_v20 = vld [vmem:[#allocation167_spill] sm:$0xff] }
 0x3a1   : > { %3182 = vadd.xlane.f32.xlu1 %v3181_v3  ;;  %v2469_v3 = vmul.f32 %v5994_v17, %v8855_v33  ;;  %v3196_v46 = vsel %vm3072_vm0, %v2985_v5, 0.0  ;;  %v2987_v59 = vmul.f32 %v6182_v41, %v2852_v58  ;;  %v6734_v7 = vadd.f32 %v1730_v55, %v8858_v35 }
 0x3a2   : > { %3191 = vadd.xlane.f32.xlu0 %v3190_v44  ;;  %v6727_v44 = vpop.permute.xlu1 %2323  ;;  %v1731_v21 = vmul.f32 %v5641_v52, %v8860_v10  ;;  %v1732_v6 = vmul.f32 %v5641_v52, %v8861_v20  ;;  %v2727_v2 = vadd.f32 %v6094_v8, %v2592_v1  ;;  %v2468_v33 = vmul.f32 %v5994_v17, %v8862_v42  ;;  %v8864_v42 = vld [vmem:[#allocation278_spill] sm:$0xff] }
 0x3a3   : > { %8856 = vst [vmem:[#allocation211_spill] sm:$0xff] %v6727_v44  ;;  %8859 = vst [vmem:[#allocation71_spill] sm:$0xff] %v6734_v7  ;;  %v2986_v5 = vmul.f32 %v6182_v41, %v2851_v39  ;;  %v2853_v4 = vmax.f32 %v2725_v50, 0.0  ;;  %v2594_v58 = vadd.f32 %v2466_v34, %v6249_v13  ;;  %v3193_v55 = vsel %vm3072_vm0, %v2984_v63, 0.0  ;;  %v8865_v50 = vld [vmem:[#allocation281_spill] sm:$0xff]  ;;  %v8867_v13 = vld [vmem:[#allocation168_spill] sm:$0xff] }
 0x3a4   : > { %v2989_v35 = vmul.f32 %v6182_v41, %v2854_v60  ;;  %v2856_v10 = vmax.f32 %v2728_v48, 0.0  ;;  %v2730_v44 = vadd.f32 %v6094_v8, %v2595_v49  ;;  %v3202_v20 = vsel %vm3072_vm0, %v2987_v59, 0.0  ;;  %v8868_v48 = vld [vmem:[#allocation39_spill] sm:$0xff] }
 0x3a5   : > { %3188 = vadd.xlane.f32.xlu1 %v3187_v30  ;;  %v8863_v30 = vld [vmem:[#allocation273_spill] sm:$0xff]  ;;  %v6753_v7 = vadd.f32 %v1731_v21, %v8864_v42  ;;  %v6756_v39 = vadd.f32 %v1732_v6, %v8865_v50  ;;  %v1733_v34 = vmul.f32 %v5641_v52, %v8867_v13  ;;  %v2596_v63 = vadd.f32 %v2468_v33, %v8868_v48  ;;  %v8871_v6 = vld [vmem:[#allocation262_spill] sm:$0xff]  ;;  %v8873_v13 = vld [vmem:[#allocation291_spill] sm:$0xff] }
 0x3a6   : > { %3197 = vadd.xlane.f32.xlu0 %v3196_v46  ;;  %v2597_v46 = vadd.f32 %v2469_v3, %v6262_v32  ;;  %v2471_v1 = vmul.f32 %v5994_v17, %v8863_v30  ;;  %v6761_v60 = vpop.permute.xlu1 %2331  ;;  %v6763_v32 = vpop.permute.xlu0 %2343  ;;  %v3199_v49 = vsel %vm3072_vm0, %v2986_v5, 0.0  ;;  %v2988_v3 = vmul.f32 %v6182_v41, %v2853_v4 }
 0x3a7   : > { %8866 = vst [vmem:[#allocation70_spill] sm:$0xff] %v6756_v39  ;;  %8869 = vst [vmem:[#allocation77_spill] sm:$0xff] %v6761_v60  ;;  %v2855_v59 = vmax.f32 %v2727_v2, 0.0  ;;  %v2729_v21 = vadd.f32 %v6094_v8, %v2594_v58  ;;  %v2470_v30 = vmul.f32 %v5994_v17, %v8871_v6  ;;  %v3208_v42 = vsel %vm3072_vm0, %v2989_v35, 0.0  ;;  %v8875_v2 = vld [vmem:[#allocation169_spill] sm:$0xff]  ;;  %v8876_v60 = vld [vmem:[#allocation170_spill] sm:$0xff] }
 0x3a8   : > { %8870 = vst [vmem:[#allocation75_spill] sm:$0xff] %v6763_v32  ;;  %v2732_v33 = vadd.f32 %v6094_v8, %v2597_v46  ;;  %v2473_v48 = vmul.f32 %v5994_v17, %v8873_v13  ;;  %v2858_v5 = vmax.f32 %v2730_v44, 0.0  ;;  %v8874_v32 = vld [vmem:[#allocation280_spill] sm:$0xff]  ;;  %v1734_v58 = vmul.f32 %v5641_v52, %v8875_v2 }
 0x3a9   : > { %3194 = vadd.xlane.f32.xlu1 %v3193_v55  ;;  %v2991_v55 = vmul.f32 %v6182_v41, %v2856_v10  ;;  %v6777_v4 = vadd.f32 %v1733_v34, %v8874_v32  ;;  %v1735_v6 = vmul.f32 %v5641_v52, %v8876_v60  ;;  %v2731_v35 = vadd.f32 %v6094_v8, %v2596_v63  ;;  %v8877_v10 = vld [vmem:[#allocation135_spill] sm:$0xff]  ;;  %v8879_v32 = vld [vmem:[#allocation309_spill] sm:$0xff] }
 0x3aa   : > { %3203 = vadd.xlane.f32.xlu0 %v3202_v20  ;;  %v8872_v20 = vld [vmem:[#allocation47_spill] sm:$0xff]  ;;  %v2472_v46 = vmul.f32 %v5994_v17, %v8877_v10  ;;  %v2990_v44 = vmul.f32 %v6182_v41, %v2855_v59  ;;  %v2475_v13 = vmul.f32 %v5994_v17, %v8879_v32  ;;  %v2857_v39 = vmax.f32 %v2729_v21, 0.0  ;;  %v8882_v21 = vld [vmem:[#allocation282_spill] sm:$0xff] }
 0x3ab   : > { %v2599_v50 = vadd.f32 %v2471_v1, %v8872_v20  ;;  %v3205_v1 = vsel %vm3072_vm0, %v2988_v3, 0.0  ;;  %v8878_v20 = vld [vmem:[#allocation49_spill] sm:$0xff]  ;;  %v3214_v2 = vsel %vm3072_vm0, %v2991_v55, 0.0  ;;  %v6795_v60 = vld [vmem:[%s7884_s2] ss:$0 sm:$0xff]  ;;  %v2601_v63 = vadd.f32 %v2473_v48, %v6309_v23  ;;  %v6801_v3 = vpop.permute.xlu0 %2351 }
 0x3ac   : > { %v2598_v34 = vadd.f32 %v2470_v30, %v8878_v20  ;;  %8880 = vst [vmem:[#allocation74_spill] sm:$0xff] %v6801_v3  ;;  %v2993_v59 = vmul.f32 %v6182_v41, %v2858_v5  ;;  %v2860_v30 = vmax.f32 %v2732_v33, 0.0  ;;  %v6808_v55 = vadd.f32 %v1735_v6, %v8882_v21  ;;  %v8883_v20 = vld [vmem:[#allocation171_spill] sm:$0xff] }
 0x3ad   : > { %3200 = vadd.xlane.f32.xlu1 %v3199_v49  ;;  %v2734_v8 = vadd.f32 %v6795_v60, %v2599_v50  ;;  %v6799_v49 = vpop.permute.xlu1 %2339  ;;  %v1736_v32 = vmul.f32 %v5641_v52, %v8883_v20  ;;  %v2600_v23 = vadd.f32 %v2472_v46, %v6306_v25  ;;  %v8884_v50 = vld [vmem:[#allocation274_spill] sm:$0xff]  ;;  %v3211_v3 = vsel %vm3072_vm0, %v2990_v44, 0.0  ;;  %v8886_v20 = vld [vmem:[#allocation285_spill] sm:$0xff] }
 0x3ae   : > { %3209 = vadd.xlane.f32.xlu0 %v3208_v42  ;;  %v8881_v42 = vld [vmem:[#allocation283_spill] sm:$0xff]  ;;  %v2474_v48 = vmul.f32 %v5994_v17, %v8884_v50  ;;  %v2859_v5 = vmax.f32 %v2731_v35, 0.0  ;;  %v2733_v33 = vadd.f32 %v6795_v60, %v2598_v34  ;;  %v2992_v21 = vmul.f32 %v6182_v41, %v2857_v39  ;;  %v8887_v35 = vld [vmem:[#allocation172_spill] sm:$0xff]  ;;  %v8888_v34 = vld [vmem:[#allocation173_spill] sm:$0xff] }
 0x3af   : > { %v6805_v10 = vadd.f32 %v1734_v58, %v8881_v42  ;;  %v2603_v58 = vadd.f32 %v2475_v13, %v6333_v36  ;;  %v8885_v42 = vld [vmem:[#allocation143_spill] sm:$0xff]  ;;  %v2995_v25 = vmul.f32 %v6182_v41, %v2860_v30  ;;  %v2862_v46 = vmax.f32 %v2734_v8, 0.0  ;;  %v6837_v8 = vpop.permute.xlu0 %2359 }
 0x3b0   : > { %v2477_v6 = vmul.f32 %v5994_v17, %v8885_v42  ;;  %v6825_v50 = vadd.f32 %v1736_v32, %v8886_v20  ;;  %v1737_v44 = vmul.f32 %v5641_v52, %v8887_v35  ;;  %v1738_v36 = vmul.f32 %v5641_v52, %v8888_v34  ;;  %8891 = vst [vmem:[#allocation76_spill] sm:$0xff] %v6837_v8  ;;  %v8892_v35 = vld [vmem:[#allocation7_spill] sm:$0xff] }
 0x3b1   : > { %3206 = vadd.xlane.f32.xlu1 %v3205_v1  ;;  %v3220_v1 = vsel %vm3072_vm0, %v2993_v59, 0.0  ;;  %v2735_v39 = vadd.f32 %v6795_v60, %v2600_v23  ;;  %v2602_v13 = vadd.f32 %v2474_v48, %v6312_v28  ;;  %v6835_v30 = vpop.permute.xlu1 %2347  ;;  %v2994_v32 = vmul.f32 %v6182_v41, %v2859_v5  ;;  %v6849_v48 = vld [vmem:[%s7885_s3] ss:$0 sm:$0xff]  ;;  %v8893_v5 = vld [vmem:[#allocation284_spill] sm:$0xff] }
 0x3b2   : > { %3215 = vadd.xlane.f32.xlu0 %v3214_v2  ;;  %v2736_v2 = vadd.f32 %v6795_v60, %v2601_v63  ;;  %v8889_v63 = vld [vmem:[#allocation292_spill] sm:$0xff]  ;;  %8890 = vst [vmem:[#allocation79_spill] sm:$0xff] %v6835_v30  ;;  %v2738_v42 = vadd.f32 %v6795_v60, %v2603_v58  ;;  %v2605_v20 = vadd.f32 %v2477_v6, %v6357_v62  ;;  %v3226_v28 = vsel %vm3072_vm0, %v2995_v25, 0.0  ;;  %v8894_v62 = vld [vmem:[#allocation287_spill] sm:$0xff] }
 0x3b3   : > { %v2476_v59 = vmul.f32 %v5994_v17, %v8889_v63  ;;  %v2479_v23 = vmul.f32 %v5994_v17, %v8892_v35  ;;  %v2997_v34 = vmul.f32 %v6849_v48, %v2862_v46  ;;  %v6853_v58 = vadd.f32 %v1737_v44, %v8893_v5  ;;  %v8896_v46 = vld [vmem:[#allocation310_spill] sm:$0xff] }
 0x3b4   : > { %v2864_v41 = vmax.f32 %v2736_v2, 0.0  ;;  %v6856_v6 = vadd.f32 %v1738_v36, %v8894_v62  ;;  %v2737_v25 = vadd.f32 %v6795_v60, %v2602_v13  ;;  %v3223_v35 = vsel %vm3072_vm0, %v2994_v32, 0.0  ;;  %v6872_v13 = vpop.permute.xlu0 %2367 }
 0x3b5   : > { %3212 = vadd.xlane.f32.xlu1 %v3211_v3  ;;  %v2861_v3 = vmax.f32 %v2733_v33, 0.0  ;;  %v8895_v33 = vld [vmem:[#allocation174_spill] sm:$0xff]  ;;  %v2604_v63 = vadd.f32 %v2476_v59, %v6354_v45  ;;  %v2863_v8 = vmax.f32 %v2735_v39, 0.0  ;;  %v2478_v2 = vmul.f32 %v5994_v17, %v8896_v46  ;;  %8899 = vst [vmem:[#allocation80_spill] sm:$0xff] %v6872_v13  ;;  %v8903_v46 = vld [vmem:[#allocation5_spill] sm:$0xff] }
 0x3b6   : > { %3221 = vadd.xlane.f32.xlu0 %v3220_v1  ;;  %v3217_v1 = vsel %vm3072_vm0, %v2992_v21, 0.0  ;;  %v1739_v21 = vmul.f32 %v5641_v52, %v8895_v33  ;;  %v2740_v44 = vadd.f32 %v6795_v60, %v2605_v20  ;;  %v2866_v5 = vmax.f32 %v2738_v42, 0.0  ;;  %v8897_v33 = vld [vmem:[#allocation9_spill] sm:$0xff]  ;;  %v8900_v59 = vld [vmem:[#allocation286_spill] sm:$0xff]  ;;  %v8901_v20 = vld [vmem:[#allocation175_spill] sm:$0xff] }
 0x3b7   : > { %v2996_v36 = vmul.f32 %v6849_v48, %v2861_v3  ;;  %v2607_v62 = vadd.f32 %v2479_v23, %v6401_v29  ;;  %v3232_v45 = vsel %vm3072_vm0, %v2997_v34, 0.0  ;;  %v2999_v39 = vmul.f32 %v6849_v48, %v2864_v41  ;;  %v8902_v42 = vld [vmem:[#allocation176_spill] sm:$0xff] }
 0x3b8   : > { %v6877_v32 = vadd.f32 %v1739_v21, %v8900_v59  ;;  %v1740_v3 = vmul.f32 %v5641_v52, %v8901_v20  ;;  %v1741_v29 = vmul.f32 %v5641_v52, %v8902_v42  ;;  %v2739_v23 = vadd.f32 %v6795_v60, %v2604_v63 }
 0x3b9   : > { %3218 = vadd.xlane.f32.xlu1 %v3217_v1  ;;  %v2481_v1 = vmul.f32 %v5994_v17, %v8897_v33  ;;  %v2480_v33 = vmul.f32 %v5994_v17, %v8903_v46  ;;  %v2998_v34 = vmul.f32 %v6849_v48, %v2863_v8  ;;  %v2865_v13 = vmax.f32 %v2737_v25, 0.0  ;;  %v8905_v46 = vld [vmem:[#allocation289_spill] sm:$0xff]  ;;  %v8906_v8 = vld [vmem:[#allocation288_spill] sm:$0xff] }
 0x3ba   : > { %3227 = vadd.xlane.f32.xlu0 %v3226_v28  ;;  %v6870_v28 = vpop.permute.xlu1 %2355  ;;  %v2606_v41 = vadd.f32 %v2478_v2, %v6378_v31  ;;  %v3229_v21 = vsel %vm3072_vm0, %v2996_v36, 0.0  ;;  %v3001_v59 = vmul.f32 %v6849_v48, %v2866_v5  ;;  %v2868_v20 = vmax.f32 %v2740_v44, 0.0  ;;  %v8907_v31 = vld [vmem:[#allocation177_spill] sm:$0xff] }
 0x3bb   : > { %8898 = vst [vmem:[#allocation81_spill] sm:$0xff] %v6870_v28  ;;  %v2742_v28 = vadd.f32 %v6795_v60, %v2607_v62  ;;  %v3238_v42 = vsel %vm3072_vm0, %v2999_v39, 0.0  ;;  %v6896_v30 = vadd.f32 %v1740_v3, %v8905_v46  ;;  %v6899_v25 = vadd.f32 %v1741_v29, %v8906_v8  ;;  %v8909_v3 = vld [vmem:[#allocation6_spill] sm:$0xff]  ;;  %v8911_v8 = vld [vmem:[#allocation293_spill] sm:$0xff] }
 0x3bc   : > { %v1742_v2 = vmul.f32 %v5641_v52, %v8907_v31  ;;  %v2608_v44 = vadd.f32 %v2480_v33, %v6404_v12  ;;  %v3235_v5 = vsel %vm3072_vm0, %v2998_v34, 0.0  ;;  %v3000_v62 = vmul.f32 %v6849_v48, %v2865_v13  ;;  %v8913_v31 = vld [vmem:[#allocation179_spill] sm:$0xff] }
 0x3bd   : > { %3224 = vadd.xlane.f32.xlu1 %v3223_v35  ;;  %v8904_v35 = vld [vmem:[#allocation19_spill] sm:$0xff]  ;;  %v2741_v39 = vadd.f32 %v6795_v60, %v2606_v41  ;;  %v2482_v29 = vmul.f32 %v5994_v17, %v8909_v3  ;;  %v2870_v34 = vmax.f32 %v2742_v28, 0.0  ;;  %v1744_v3 = vmul.f32 %v5641_v52, %v8913_v31 }
 0x3be   : > { %3233 = vadd.xlane.f32.xlu0 %v3232_v45  ;;  %v2609_v45 = vadd.f32 %v2481_v1, %v6421_v37  ;;  %v2483_v63 = vmul.f32 %v5994_v17, %v8904_v35  ;;  %v6904_v36 = vpop.permute.xlu1 %2363  ;;  %v6906_v37 = vpop.permute.xlu0 %2375  ;;  %v2867_v1 = vmax.f32 %v2739_v23, 0.0  ;;  %v3244_v35 = vsel %vm3072_vm0, %v3001_v59, 0.0  ;;  %v8912_v23 = vld [vmem:[#allocation178_spill] sm:$0xff] }
 0x3bf   : > { %8908 = vst [vmem:[#allocation85_spill] sm:$0xff] %v6906_v37  ;;  %v6920_v13 = vadd.f32 %v1742_v2, %v8911_v8  ;;  %v1743_v41 = vmul.f32 %v5641_v52, %v8912_v23  ;;  %v2743_v59 = vadd.f32 %v6795_v60, %v2608_v44  ;;  %v8915_v2 = vld [vmem:[#allocation29_spill] sm:$0xff]  ;;  %v2869_v23 = vmax.f32 %v2741_v39, 0.0 }
 0x3c0   : > { %v2744_v12 = vadd.f32 %v6795_v60, %v2609_v45  ;;  %v2611_v33 = vadd.f32 %v2483_v63, %v6447_v18  ;;  %v3241_v45 = vsel %vm3072_vm0, %v3000_v62, 0.0  ;;  %v3002_v28 = vmul.f32 %v6849_v48, %v2867_v1  ;;  %v8917_v1 = vld [vmem:[#allocation290_spill] sm:$0xff] }
 0x3c1   : > { %3230 = vadd.xlane.f32.xlu1 %v3229_v21  ;;  %v3003_v21 = vmul.f32 %v6849_v48, %v2868_v20  ;;  %v8914_v20 = vld [vmem:[#allocation16_spill] sm:$0xff]  ;;  %v2610_v63 = vadd.f32 %v2482_v29, %v6444_v47  ;;  %v3005_v62 = vmul.f32 %v6849_v48, %v2870_v34  ;;  %v6943_v37 = vadd.f32 %v1743_v41, %v8917_v1  ;;  %v8921_v1 = vld [vmem:[#allocation37_spill] sm:$0xff] }
 0x3c2   : > { %3239 = vadd.xlane.f32.xlu0 %v3238_v42  ;;  %v8910_v42 = vld [vmem:[#allocation14_spill] sm:$0xff]  ;;  %v2484_v18 = vmul.f32 %v5994_v17, %v8914_v20  ;;  %v6937_v44 = vpop.permute.xlu1 %2371  ;;  %v6939_v31 = vpop.permute.xlu0 %2383  ;;  %v2872_v20 = vmax.f32 %v2744_v12, 0.0  ;;  %v8918_v47 = vld [vmem:[#allocation180_spill] sm:$0xff]  ;;  %v2871_v34 = vmax.f32 %v2743_v59, 0.0  ;;  %v8923_v59 = vld [vmem:[#allocation181_spill] sm:$0xff] }
 0x3c3   : > { %v2485_v46 = vmul.f32 %v5994_v17, %v8910_v42  ;;  %v2487_v42 = vmul.f32 %v5994_v17, %v8915_v2  ;;  %v3250_v8 = vsel %vm3072_vm0, %v3003_v21, 0.0  ;;  %8916 = vst [vmem:[#allocation78_spill] sm:$0xff] %v6939_v31  ;;  %v1745_v29 = vmul.f32 %v5641_v52, %v8918_v47  ;;  %v8919_v2 = vld [vmem:[#allocation15_spill] sm:$0xff] }
 0x3c4   : > { %v2486_v39 = vmul.f32 %v5994_v17, %v8919_v2  ;;  %v8920_v21 = vld [vmem:[#allocation295_spill] sm:$0xff]  ;;  %v2745_v12 = vadd.f32 %v6795_v60, %v2610_v63  ;;  %v2489_v47 = vmul.f32 %v5994_v17, %v8921_v1  ;;  %v3004_v31 = vmul.f32 %v6849_v48, %v2869_v23  ;;  %v8924_v63 = vld [vmem:[#allocation182_spill] sm:$0xff] }
 0x3c5   : > { %3236 = vadd.xlane.f32.xlu1 %v3235_v5  ;;  %v2613_v5 = vadd.f32 %v2485_v46, %v6487_v43  ;;  %v6950_v43 = vadd.f32 %v1744_v3, %v8920_v21  ;;  %v3247_v46 = vsel %vm3072_vm0, %v3002_v28, 0.0  ;;  %v2615_v41 = vadd.f32 %v2487_v42, %v6511_v61 }
 0x3c6   : > { %3245 = vadd.xlane.f32.xlu0 %v3244_v35  ;;  %v2746_v35 = vadd.f32 %v6795_v60, %v2611_v33  ;;  %v2612_v33 = vadd.f32 %v2484_v18, %v6468_v24  ;;  %v3007_v3 = vmul.f32 %v6849_v48, %v2872_v20  ;;  %v8922_v24 = vld [vmem:[#allocation294_spill] sm:$0xff]  ;;  %v1746_v28 = vmul.f32 %v5641_v52, %v8923_v59  ;;  %v6973_v20 = vpop.permute.xlu1 %2379 }
 0x3c7   : > { %v6963_v18 = vadd.f32 %v1745_v29, %v8922_v24  ;;  %v2614_v61 = vadd.f32 %v2486_v39, %v6490_v16  ;;  %v1747_v42 = vmul.f32 %v5641_v52, %v8924_v63  ;;  %v3006_v29 = vmul.f32 %v6849_v48, %v2871_v34  ;;  %v8927_v39 = vld [vmem:[#allocation30_spill] sm:$0xff]  ;;  %v8928_v63 = vld [vmem:[#allocation297_spill] sm:$0xff] }
 0x3c8   : > { %v2874_v2 = vmax.f32 %v2746_v35, 0.0  ;;  %v2747_v23 = vadd.f32 %v6795_v60, %v2612_v33  ;;  %v6975_v35 = vpop.permute.xlu0 %2391  ;;  %v2750_v21 = vadd.f32 %v6795_v60, %v2615_v41  ;;  %v2617_v16 = vadd.f32 %v2489_v47, %v6537_v0  ;;  %v8930_v0 = vld [vmem:[#allocation184_spill] sm:$0xff] }
 0x3c9   : > { %3242 = vadd.xlane.f32.xlu1 %v3241_v45  ;;  %v3256_v45 = vsel %vm3072_vm0, %v3005_v62, 0.0  ;;  %8926 = vst [vmem:[#allocation84_spill] sm:$0xff] %v6975_v35  ;;  %v3253_v1 = vsel %vm3072_vm0, %v3004_v31, 0.0  ;;  %v3262_v33 = vsel %vm3072_vm0, %v3007_v3, 0.0  ;;  %v2873_v59 = vmax.f32 %v2745_v12, 0.0  ;;  %v8929_v35 = vld [vmem:[#allocation183_spill] sm:$0xff] }
 0x3ca   : > { %3251 = vadd.xlane.f32.xlu0 %v3250_v8  ;;  %v2748_v8 = vadd.f32 %v6795_v60, %v2613_v5  ;;  %v8925_v5 = vld [vmem:[#allocation25_spill] sm:$0xff]  ;;  %v1748_v34 = vmul.f32 %v5641_v52, %v8929_v35  ;;  %v2749_v41 = vadd.f32 %v6795_v60, %v2614_v61  ;;  %v1749_v47 = vmul.f32 %v5641_v52, %v8930_v0 }
 0x3cb   : > { %v2488_v62 = vmul.f32 %v5994_v17, %v8925_v5  ;;  %v6986_v5 = vadd.f32 %v1746_v28, %v8928_v63  ;;  %v3259_v3 = vsel %vm3072_vm0, %v3006_v29, 0.0  ;;  %v2752_v28 = vadd.f32 %v6795_v60, %v2617_v16  ;;  %v8932_v63 = vld [vmem:[#allocation44_spill] sm:$0xff] }
 0x3cc   : > { %v2876_v24 = vmax.f32 %v2748_v8, 0.0  ;;  %v8931_v8 = vld [vmem:[#allocation22_spill] sm:$0xff]  ;;  %v2878_v35 = vmax.f32 %v2750_v21, 0.0  ;;  %v2493_v61 = vmul.f32 %v5994_v17, %v8932_v63  ;;  %v8934_v29 = vld [vmem:[#allocation296_spill] sm:$0xff] }
 0x3cd   : > { %3248 = vadd.xlane.f32.xlu1 %v3247_v46  ;;  %v2491_v46 = vmul.f32 %v5994_v17, %v8927_v39  ;;  %v2616_v31 = vadd.f32 %v2488_v62, %v6534_v26  ;;  %v2490_v12 = vmul.f32 %v5994_v17, %v8931_v8  ;;  %v7011_v16 = vadd.f32 %v1747_v42, %v8934_v29  ;;  %v8937_v63 = vld [vmem:[#allocation298_spill] sm:$0xff] }
 0x3ce   : > { %3257 = vadd.xlane.f32.xlu0 %v3256_v45  ;;  %v3009_v45 = vmul.f32 %v6849_v48, %v2874_v2  ;;  %v2875_v2 = vmax.f32 %v2747_v23, 0.0  ;;  %v3011_v62 = vmul.f32 %v6849_v48, %v2876_v24  ;;  %v3008_v23 = vmul.f32 %v6849_v48, %v2873_v59  ;;  %v8938_v59 = vld [vmem:[#allocation40_spill] sm:$0xff] }
 0x3cf   : > { %v2619_v39 = vadd.f32 %v2491_v46, %v6577_v56  ;;  %v8935_v56 = vld [vmem:[#allocation299_spill] sm:$0xff]  ;;  %v8936_v46 = vld [vmem:[#allocation185_spill] sm:$0xff]  ;;  %v2877_v8 = vmax.f32 %v2749_v41, 0.0  ;;  %v2751_v24 = vadd.f32 %v6795_v60, %v2616_v31  ;;  %v2618_v29 = vadd.f32 %v2490_v12, %v6554_v57 }
 0x3d0   : > { %v3268_v26 = vsel %vm3072_vm0, %v3009_v45, 0.0  ;;  %v7014_v21 = vadd.f32 %v1748_v34, %v8935_v56  ;;  %v1750_v0 = vmul.f32 %v5641_v52, %v8936_v46  ;;  %v7019_v45 = vadd.f32 %v1749_v47, %v8937_v63  ;;  %v8939_v41 = vld [vmem:[#allocation43_spill] sm:$0xff]  ;;  %v8940_v63 = vld [vmem:[#allocation301_spill] sm:$0xff] }
 0x3d1   : > { %3254 = vadd.xlane.f32.xlu1 %v3253_v1  ;;  %v7001_v1 = vpop.permute.xlu1 %2387  ;;  %v3010_v42 = vmul.f32 %v6849_v48, %v2875_v2  ;;  %v2754_v34 = vadd.f32 %v6795_v60, %v2619_v39  ;;  %v3013_v56 = vmul.f32 %v6849_v48, %v2878_v35  ;;  %v2880_v46 = vmax.f32 %v2752_v28, 0.0  ;;  %v8941_v2 = vld [vmem:[#allocation186_spill] sm:$0xff] }
 0x3d2   : > { %3263 = vadd.xlane.f32.xlu0 %v3262_v33  ;;  %v7003_v33 = vpop.permute.xlu0 %2399  ;;  %v2495_v47 = vmul.f32 %v5994_v17, %v8939_v41  ;;  %v3265_v31 = vsel %vm3072_vm0, %v3008_v23, 0.0  ;;  %v1751_v57 = vmul.f32 %v5641_v52, %v8941_v2  ;;  %v3012_v12 = vmul.f32 %v6849_v48, %v2877_v8  ;;  %v8942_v28 = vld [vmem:[#allocation34_spill] sm:$0xff]  ;;  %v8944_v2 = vld [vmem:[#allocation300_spill] sm:$0xff] }
 0x3d3   : > { %8933 = vst [vmem:[#allocation213_spill] sm:$0xff] %v7003_v33  ;;  %v2492_v33 = vmul.f32 %v5994_v17, %v8938_v59  ;;  %v7034_v59 = vadd.f32 %v1750_v0, %v8940_v63  ;;  %v2494_v39 = vmul.f32 %v5994_v17, %v8942_v28  ;;  %v2879_v23 = vmax.f32 %v2751_v24, 0.0  ;;  %v8945_v24 = vld [vmem:[#allocation187_spill] sm:$0xff]  ;;  %v8946_v28 = vld [vmem:[#allocation38_spill] sm:$0xff] }
 0x3d4   : > { %v2753_v0 = vadd.f32 %v6795_v60, %v2618_v29  ;;  %v3280_v41 = vsel %vm3072_vm0, %v3013_v56, 0.0  ;;  %v2882_v8 = vmax.f32 %v2754_v34, 0.0  ;;  %v7055_v63 = vstv %s7008_s11 }
 0x3d5   : > { %3260 = vadd.xlane.f32.xlu1 %v3259_v3  ;;  %v2621_v3 = vadd.f32 %v2493_v61, %v6601_v19  ;;  %v2620_v19 = vadd.f32 %v2492_v33, %v6580_v40  ;;  %v7042_v35 = vpop.permute.xlu1 %2395  ;;  %v2623_v33 = vadd.f32 %v2495_v47, %v6623_v15  ;;  %v1752_v29 = vmul.f32 %v5641_v52, %v8945_v24  ;;  %v8947_v47 = vld [vmem:[#allocation48_spill] sm:$0xff] }
 0x3d6   : > { %3269 = vadd.xlane.f32.xlu0 %v3268_v26  ;;  %v3274_v26 = vsel %vm3072_vm0, %v3011_v62, 0.0  ;;  %v7044_v61 = vpop.permute.xlu0 %2407  ;;  %v3271_v62 = vsel %vm3072_vm0, %v3010_v42, 0.0  ;;  %v7058_v42 = vadd.f32 %v1751_v57, %v8944_v2  ;;  %v2496_v56 = vmul.f32 %v5994_v17, %v8946_v28  ;;  %v8948_v28 = vld [vmem:[#allocation188_spill] sm:$0xff] }
 0x3d7   : > { %8943 = vst [vmem:[#allocation83_spill] sm:$0xff] %v7044_v61  ;;  %v2756_v40 = vadd.f32 %v6795_v60, %v2621_v3  ;;  %v3277_v34 = vsel %vm3072_vm0, %v3012_v12, 0.0  ;;  %v2622_v15 = vadd.f32 %v2494_v39, %v6620_v27  ;;  %v3014_v3 = vmul.f32 %v6849_v48, %v2879_v23 }
 0x3d8   : > { %v2499_v57 = vmul.f32 %v5994_v17, %v8947_v47  ;;  %v2758_v2 = vadd.f32 %v6795_v60, %v2623_v33  ;;  %v3017_v27 = vmul.f32 %v6849_v48, %v2882_v8  ;;  %v1753_v23 = vmul.f32 %v5641_v52, %v8948_v28  ;;  %v8949_v47 = vld [vmem:[#allocation42_spill] sm:$0xff]  ;;  %v8951_v28 = vld [vmem:[#allocation189_spill] sm:$0xff] }
 0x3d9   : > { %3266 = vadd.xlane.f32.xlu1 %v3265_v31  ;;  %v2497_v31 = vmul.f32 %v5994_v17, %v6301_v54  ;;  %v2755_v54 = vadd.f32 %v6795_v60, %v2620_v19  ;;  %v7081_v19 = vpop.permute.xlu1 %2403  ;;  %v2884_v39 = vmax.f32 %v2756_v40, 0.0  ;;  %v2624_v61 = vadd.f32 %v2496_v56, %v6644_v14 }
 0x3da   : > { %3275 = vadd.xlane.f32.xlu0 %v3274_v26  ;;  %v3015_v26 = vmul.f32 %v6849_v48, %v2880_v46  ;;  %v3283_v40 = vsel %vm3072_vm0, %v3014_v3, 0.0  ;;  %v2501_v14 = vmul.f32 %v5994_v17, %v6362_v11  ;;  %v1754_v3 = vmul.f32 %v5641_v52, %v8951_v28  ;;  %v8952_v11 = vld [vmem:[#allocation302_spill] sm:$0xff]  ;;  %v8955_v28 = vld [vmem:[#allocation305_spill] sm:$0xff] }
 0x3db   : > { %v2625_v24 = vadd.f32 %v2497_v31, %v6667_v53  ;;  %v2757_v53 = vadd.f32 %v6795_v60, %v2622_v15  ;;  %v2883_v33 = vmax.f32 %v2755_v54, 0.0  ;;  %v2627_v31 = vadd.f32 %v2499_v57, %v6687_v22 }
 0x3dc   : > { %v2886_v15 = vmax.f32 %v2758_v2, 0.0  ;;  %v2759_v54 = vadd.f32 %v6795_v60, %v2624_v61  ;;  %v7111_v57 = vadd.f32 %v1753_v23, %v8952_v11  ;;  %v8954_v23 = vld [vmem:[#allocation57_spill] sm:$0xff]  ;;  %v7127_v11 = vadd.f32 %v1754_v3, %v8955_v28  ;;  %v8959_v28 = vld [vmem:[#allocation304_spill] sm:$0xff] }
 0x3dd   : > { %3272 = vadd.xlane.f32.xlu1 %v3271_v62  ;;  %v3286_v62 = vsel %vm3072_vm0, %v3015_v26, 0.0  ;;  %v2762_v61 = vadd.f32 %v6795_v60, %v2627_v31 }
 0x3de   : > { %3281 = vadd.xlane.f32.xlu0 %v3280_v41  ;;  %v2881_v41 = vmax.f32 %v2753_v0, 0.0  ;;  %v8950_v0 = vld [vmem:[#allocation303_spill] sm:$0xff]  ;;  %v2887_v31 = vmax.f32 %v2759_v54, 0.0 }
 0x3df   : > { %v3075_v46 = vpop.xlane.xlu0 %3074  ;;  %v7092_v26 = vadd.f32 %v1752_v29, %v8950_v0  ;;  %v3292_v29 = vsel %vm3072_vm0, %v3017_v27, 0.0  ;;  %v7115_v27 = vpop.permute.xlu1 %2411  ;;  %v2890_v54 = vmax.f32 %v2762_v61, 0.0 }
 0x3e0   : > { %v3459_v12 = vadd.f32 %v7055_v63, %v3075_v46  ;;  %v2498_v46 = vmul.f32 %v5994_v17, %v8949_v47  ;;  %v2885_v47 = vmax.f32 %v2757_v53, 0.0  ;;  %v8956_v53 = vld [vmem:[#allocation190_spill] sm:$0xff] }
 0x3e1   : > { %3278 = vadd.xlane.f32.xlu1 %v3277_v34  ;;  %v2760_v34 = vadd.f32 %v6795_v60, %v2625_v24 }
 0x3e2   : > { %3588 = vst.msk [vmem:[%s7070_s14] sm:$0xff] %vm3587_vm1, %v3459_v12  ;;  %3287 = vadd.xlane.f32.xlu0 %v3286_v62  ;;  %v3016_v12 = vmul.f32 %v6849_v48, %v2881_v41  ;;  %v3019_v62 = vmul.f32 %v6849_v48, %v2884_v39  ;;  %v2626_v22 = vadd.f32 %v2498_v46, %v6670_v38  ;;  %v8953_v41 = vld [vmem:[#allocation46_spill] sm:$0xff] }
 0x3e3   : > { %v3081_v8 = vpop.xlane.xlu0 %3080  ;;  %v2500_v24 = vmul.f32 %v5994_v17, %v8953_v41  ;;  %v3018_v39 = vmul.f32 %v6849_v48, %v2883_v33  ;;  %v2629_v38 = vadd.f32 %v2501_v14, %v6713_v9  ;;  %v1755_v33 = vmul.f32 %v5641_v52, %v8956_v53  ;;  %v8962_v53 = vld [vmem:[#allocation52_spill] sm:$0xff] }
 0x3e4   : > { %v3461_v56 = vadd.f32 %v7055_v63, %v3081_v8  ;;  %v3289_v0 = vsel %vm3072_vm0, %v3016_v12, 0.0  ;;  %v2503_v8 = vmul.f32 %v5994_v17, %v8954_v23  ;;  %v2761_v9 = vadd.f32 %v6795_v60, %v2626_v22  ;;  %v8957_v12 = vld [vmem:[#allocation53_spill] sm:$0xff] }
 0x3e5   : > { %3284 = vadd.xlane.f32.xlu1 %v3283_v40  ;;  %v3298_v40 = vsel %vm3072_vm0, %v3019_v62, 0.0  ;;  %v2628_v14 = vadd.f32 %v2500_v24, %v6710_v51  ;;  %v2502_v62 = vmul.f32 %v5994_v17, %v8957_v12  ;;  %v3295_v3 = vsel %vm3072_vm0, %v3018_v39, 0.0  ;;  %v8958_v24 = vld [vmem:[#allocation51_spill] sm:$0xff] }
 0x3e6   : > { %3590 = vst.msk [vmem:[%s7070_s14 + $0x10] sm:$0xff] %vm3587_vm1, %v3461_v56  ;;  %3293 = vadd.xlane.f32.xlu0 %v3292_v29  ;;  %v3021_v56 = vmul.f32 %v6849_v48, %v2886_v15  ;;  %v2888_v29 = vmax.f32 %v2760_v34, 0.0  ;;  %v3020_v41 = vmul.f32 %v6849_v48, %v2885_v47  ;;  %v2764_v22 = vadd.f32 %v6795_v60, %v2629_v38  ;;  %v8960_v47 = vld [vmem:[#allocation191_spill] sm:$0xff] }
 0x3e7   : > { %v3084_v2 = vpop.xlane.xlu0 %3083  ;;  %v2631_v51 = vadd.f32 %v2503_v8, %v6753_v7  ;;  %v7148_v39 = vadd.f32 %v1755_v33, %v8959_v28  ;;  %v1756_v38 = vmul.f32 %v5641_v52, %v8960_v47  ;;  %v3022_v7 = vmul.f32 %v6849_v48, %v2887_v31  ;;  %v8964_v28 = vld [vmem:[#allocation307_spill] sm:$0xff] }
 0x3e8   : > { %v3462_v46 = vadd.f32 %v7055_v63, %v3084_v2  ;;  %v3304_v23 = vsel %vm3072_vm0, %v3021_v56, 0.0  ;;  %v2889_v61 = vmax.f32 %v2761_v9, 0.0  ;;  %v2763_v8 = vadd.f32 %v6795_v60, %v2628_v14  ;;  %v8961_v56 = vld [vmem:[#allocation71_spill] sm:$0xff] }
 0x3e9   : > { %3290 = vadd.xlane.f32.xlu1 %v3289_v0  ;;  %v2505_v0 = vmul.f32 %v5994_v17, %v8958_v24  ;;  %v2504_v33 = vmul.f32 %v5994_v17, %v8962_v53  ;;  %v3025_v31 = vmul.f32 %v6849_v48, %v2890_v54  ;;  %v2892_v9 = vmax.f32 %v2764_v22, 0.0 }
 0x3ea   : > { %3591 = vst.msk [vmem:[%s7070_s14 + $0x18] sm:$0xff] %vm3587_vm1, %v3462_v46  ;;  %3299 = vadd.xlane.f32.xlu0 %v3298_v40  ;;  %v3078_v15 = vpop.xlane.xlu1 %3077  ;;  %v3023_v40 = vmul.f32 %v6849_v48, %v2888_v29  ;;  %v2630_v29 = vadd.f32 %v2502_v62, %v8961_v56  ;;  %v2766_v14 = vadd.f32 %v6795_v60, %v2631_v51  ;;  %v8963_v62 = vld [vmem:[#allocation56_spill] sm:$0xff]  ;;  %v3307_v22 = vsel %vm3072_vm0, %v3022_v7, 0.0  ;;  %v8966_v51 = vld [vmem:[#allocation70_spill] sm:$0xff] }
 0x3eb   : > { %v3090_v34 = vpop.xlane.xlu0 %3089  ;;  %v3460_v46 = vadd.f32 %v7055_v63, %v3078_v15  ;;  %v3301_v15 = vsel %vm3072_vm0, %v3020_v41, 0.0  ;;  %v2507_v24 = vmul.f32 %v5994_v17, %v8963_v62  ;;  %v7171_v47 = vadd.f32 %v1756_v38, %v8964_v28  ;;  %v8965_v41 = vld [vmem:[#allocation192_spill] sm:$0xff]  ;;  %v8969_v28 = vld [vmem:[#allocation306_spill] sm:$0xff] }
 0x3ec   : > { %v3464_v2 = vadd.f32 %v7055_v63, %v3090_v34  ;;  %v1757_v56 = vmul.f32 %v5641_v52, %v8965_v41  ;;  %v2765_v54 = vadd.f32 %v6795_v60, %v2630_v29  ;;  %v3316_v7 = vsel %vm3072_vm0, %v3025_v31, 0.0 }
 0x3ed   : > { %3589 = vst.msk [vmem:[%s7070_s14 + $0x8] sm:$0xff] %vm3587_vm1, %v3460_v46  ;;  %3296 = vadd.xlane.f32.xlu1 %v3295_v3  ;;  %v2633_v46 = vadd.f32 %v2505_v0, %v6777_v4  ;;  %v3024_v4 = vmul.f32 %v6849_v48, %v2889_v61  ;;  %v2632_v0 = vadd.f32 %v2504_v33, %v8966_v51 }
 0x3ee   : > { %3593 = vst.msk [vmem:[%s7070_s14 + $0x28] sm:$0xff] %vm3587_vm1, %v3464_v2  ;;  %3305 = vadd.xlane.f32.xlu0 %v3304_v23  ;;  %v3087_v34 = vpop.xlane.xlu1 %3086  ;;  %v3310_v23 = vsel %vm3072_vm0, %v3023_v40, 0.0  ;;  %v8967_v40 = vld [vmem:[#allocation209_spill] sm:$0xff]  ;;  %v3027_v61 = vmul.f32 %v6849_v48, %v2892_v9  ;;  %v2635_v33 = vadd.f32 %v2507_v24, %v6808_v55  ;;  %v7194_v41 = vadd.f32 %v1757_v56, %v8969_v28 }
 0x3ef   : > { %v3096_v12 = vpop.xlane.xlu0 %3095  ;;  %v3463_v3 = vadd.f32 %v7055_v63, %v3087_v34  ;;  %v2506_v38 = vmul.f32 %v5994_v17, %v8967_v40  ;;  %v2891_v34 = vmax.f32 %v2763_v8, 0.0  ;;  %v2768_v29 = vadd.f32 %v6795_v60, %v2633_v46  ;;  %v8970_v8 = vld [vmem:[#allocation193_spill] sm:$0xff]  ;;  %v8971_v40 = vld [vmem:[#allocation50_spill] sm:$0xff] }
 0x3f0   : > { %v3466_v2 = vadd.f32 %v7055_v63, %v3096_v12  ;;  %v1758_v51 = vmul.f32 %v5641_v52, %v8970_v8  ;;  %v3313_v55 = vsel %vm3072_vm0, %v3024_v4, 0.0  ;;  %v2767_v31 = vadd.f32 %v6795_v60, %v2632_v0  ;;  %v8974_v28 = vld [vmem:[#allocation61_spill] sm:$0xff] }
 0x3f1   : > { %3592 = vst.msk [vmem:[%s7070_s14 + $0x20] sm:$0xff] %vm3587_vm1, %v3463_v3  ;;  %3302 = vadd.xlane.f32.xlu1 %v3301_v15  ;;  %v8968_v3 = vld [vmem:[#allocation55_spill] sm:$0xff]  ;;  %v2634_v9 = vadd.f32 %v2506_v38, %v6805_v10  ;;  %v3026_v24 = vmul.f32 %v6849_v48, %v2891_v34  ;;  %v2893_v56 = vmax.f32 %v2765_v54, 0.0  ;;  %v3322_v4 = vsel %vm3072_vm0, %v3027_v61, 0.0 }
 0x3f2   : > { %3595 = vst.msk [vmem:[%s7070_s14 + $0x38] sm:$0xff] %vm3587_vm1, %v3466_v2  ;;  %3311 = vadd.xlane.f32.xlu0 %v3310_v23  ;;  %v3093_v12 = vpop.xlane.xlu1 %3092  ;;  %v2509_v62 = vmul.f32 %v5994_v17, %v8968_v3  ;;  %v2894_v23 = vmax.f32 %v2766_v14, 0.0  ;;  %v2770_v0 = vadd.f32 %v6795_v60, %v2635_v33  ;;  %v8973_v3 = vld [vmem:[#allocation194_spill] sm:$0xff]  ;;  %v2510_v8 = vmul.f32 %v5994_v17, %v8974_v28  ;;  %v8978_v28 = vld [vmem:[#allocation68_spill] sm:$0xff] }
 0x3f3   : > { %v3102_v53 = vpop.xlane.xlu0 %3101  ;;  %v3465_v15 = vadd.f32 %v7055_v63, %v3093_v12  ;;  %v8972_v12 = vld [vmem:[#allocation65_spill] sm:$0xff]  ;;  %v1759_v34 = vmul.f32 %v5641_v52, %v8973_v3  ;;  %v2769_v61 = vadd.f32 %v6795_v60, %v2634_v9 }
 0x3f4   : > { %v3468_v2 = vadd.f32 %v7055_v63, %v3102_v53  ;;  %v2508_v53 = vmul.f32 %v5994_v17, %v8971_v40  ;;  %v2637_v10 = vadd.f32 %v2509_v62, %v6853_v58  ;;  %v3029_v38 = vmul.f32 %v6849_v48, %v2894_v23  ;;  %v8975_v40 = vld [vmem:[#allocation54_spill] sm:$0xff] }
 0x3f5   : > { %3594 = vst.msk [vmem:[%s7070_s14 + $0x30] sm:$0xff] %vm3587_vm1, %v3465_v15  ;;  %3308 = vadd.xlane.f32.xlu1 %v3307_v22  ;;  %v3028_v62 = vmul.f32 %v6849_v48, %v2893_v56  ;;  %v8977_v56 = vld [vmem:[#allocation60_spill] sm:$0xff] }
 0x3f6   : > { %3597 = vst.msk [vmem:[%s7070_s14 + $0x48] sm:$0xff] %vm3587_vm1, %v3468_v2  ;;  %3317 = vadd.xlane.f32.xlu0 %v3316_v7  ;;  %v3099_v46 = vpop.xlane.xlu1 %3098  ;;  %v2511_v2 = vmul.f32 %v5994_v17, %v8972_v12  ;;  %v2896_v7 = vmax.f32 %v2768_v29, 0.0  ;;  %v2636_v54 = vadd.f32 %v2508_v53, %v6825_v50  ;;  %v3319_v29 = vsel %vm3072_vm0, %v3026_v24, 0.0  ;;  %v8976_v24 = vld [vmem:[#allocation311_spill] sm:$0xff] }
 0x3f7   : > { %v3108_v14 = vpop.xlane.xlu0 %3107  ;;  %v3467_v22 = vadd.f32 %v7055_v63, %v3099_v46  ;;  %v2895_v50 = vmax.f32 %v2767_v31, 0.0  ;;  %v2513_v53 = vmul.f32 %v5994_v17, %v8975_v40  ;;  %v2772_v9 = vadd.f32 %v6795_v60, %v2637_v10 }
 0x3f8   : > { %v3470_v15 = vadd.f32 %v7055_v63, %v3108_v14  ;;  %v2639_v23 = vadd.f32 %v2511_v2, %v6877_v32  ;;  %v3328_v46 = vsel %vm3072_vm0, %v3029_v38, 0.0  ;;  %v3031_v12 = vmul.f32 %v6849_v48, %v2896_v7 }
 0x3f9   : > { %3596 = vst.msk [vmem:[%s7070_s14 + $0x40] sm:$0xff] %vm3587_vm1, %v3467_v22  ;;  %3314 = vadd.xlane.f32.xlu1 %v3313_v55  ;;  %v7237_v22 = vadd.f32 %v1758_v51, %v8976_v24  ;;  %v2771_v31 = vadd.f32 %v6795_v60, %v2636_v54  ;;  %v2638_v32 = vadd.f32 %v2510_v8, %v6856_v6  ;;  %v3325_v51 = vsel %vm3072_vm0, %v3028_v62, 0.0  ;;  %v8979_v62 = vld [vmem:[#allocation308_spill] sm:$0xff] }
 0x3fa   : > { %3599 = vst.msk [vmem:[%s7070_s14 + $0x58] sm:$0xff] %vm3587_vm1, %v3470_v15  ;;  %3323 = vadd.xlane.f32.xlu0 %v3322_v4  ;;  %v3105_v33 = vpop.xlane.xlu1 %3104  ;;  %v2898_v15 = vmax.f32 %v2770_v0, 0.0  ;;  %v2512_v2 = vmul.f32 %v5994_v17, %v8977_v56  ;;  %v3030_v0 = vmul.f32 %v6849_v48, %v2895_v50  ;;  %v2897_v38 = vmax.f32 %v2769_v61, 0.0  ;;  %v8980_v61 = vld [vmem:[#allocation195_spill] sm:$0xff] }
 0x3fb   : > { %v3114_v58 = vpop.xlane.xlu0 %3113  ;;  %v3469_v55 = vadd.f32 %v7055_v63, %v3105_v33  ;;  %v2774_v6 = vadd.f32 %v6795_v60, %v2639_v23  ;;  %v2641_v7 = vadd.f32 %v2513_v53, %v6899_v25  ;;  %v2515_v8 = vmul.f32 %v5994_v17, %v8978_v28  ;;  %v8982_v56 = vld [vmem:[#allocation59_spill] sm:$0xff]  ;;  %v8985_v28 = vld [vmem:[#allocation69_spill] sm:$0xff] }
 0x3fc   : > { %v3472_v14 = vadd.f32 %v7055_v63, %v3114_v58  ;;  %v3334_v58 = vsel %vm3072_vm0, %v3031_v12, 0.0  ;;  %v3033_v33 = vmul.f32 %v6849_v48, %v2898_v15  ;;  %v7258_v40 = vadd.f32 %v1759_v34, %v8979_v62 }
 0x3fd   : > { %3598 = vst.msk [vmem:[%s7070_s14 + $0x50] sm:$0xff] %vm3587_vm1, %v3469_v55  ;;  %3320 = vadd.xlane.f32.xlu1 %v3319_v29  ;;  %v2900_v29 = vmax.f32 %v2772_v9, 0.0  ;;  %v1760_v50 = vmul.f32 %v5641_v52, %v8980_v61  ;;  %v2773_v25 = vadd.f32 %v6795_v60, %v2638_v32  ;;  %v2899_v23 = vmax.f32 %v2771_v31, 0.0 }
 0x3fe   : > { %3601 = vst.msk [vmem:[%s7070_s14 + $0x68] sm:$0xff] %vm3587_vm1, %v3472_v14  ;;  %3329 = vadd.xlane.f32.xlu0 %v3328_v46  ;;  %v3111_v10 = vpop.xlane.xlu1 %3110  ;;  %v2640_v53 = vadd.f32 %v2512_v2, %v6896_v30  ;;  %v8981_v14 = vld [vmem:[#allocation64_spill] sm:$0xff]  ;;  %v3331_v46 = vsel %vm3072_vm0, %v3030_v0, 0.0  ;;  %v3032_v12 = vmul.f32 %v6849_v48, %v2897_v38  ;;  %v2776_v15 = vadd.f32 %v6795_v60, %v2641_v7 }
 0x3ff   : > { %v3120_v4 = vpop.xlane.xlu0 %3119  ;;  %v3471_v54 = vadd.f32 %v7055_v63, %v3111_v10  ;;  %v2514_v55 = vmul.f32 %v5994_v17, %v8981_v14  ;;  %v2902_v31 = vmax.f32 %v2774_v6, 0.0  ;;  %v2643_v30 = vadd.f32 %v2515_v8, %v6943_v37  ;;  %v8984_v38 = vld [vmem:[#allocation196_spill] sm:$0xff] }
 0x400   : > { %v3474_v3 = vadd.f32 %v7055_v63, %v3120_v4  ;;  %v2517_v2 = vmul.f32 %v5994_v17, %v8982_v56  ;;  %v3340_v4 = vsel %vm3072_vm0, %v3033_v33, 0.0  ;;  %v3035_v10 = vmul.f32 %v6849_v48, %v2900_v29 }
 0x401   : > { %3600 = vst.msk [vmem:[%s7070_s14 + $0x60] sm:$0xff] %vm3587_vm1, %v3471_v54  ;;  %3326 = vadd.xlane.f32.xlu1 %v3325_v51  ;;  %v8983_v51 = vld [vmem:[#allocation138_spill] sm:$0xff]  ;;  %v1761_v7 = vmul.f32 %v5641_v52, %v8984_v38  ;;  %v3034_v37 = vmul.f32 %v6849_v48, %v2899_v23  ;;  %v2901_v6 = vmax.f32 %v2773_v25, 0.0  ;;  %v2642_v54 = vadd.f32 %v2514_v55, %v6920_v13  ;;  %v8986_v13 = vld [vmem:[#allocation63_spill] sm:$0xff] }
 0x402   : > { %3603 = vst.msk [vmem:[%s7070_s14 + $0x78] sm:$0xff] %vm3587_vm1, %v3474_v3  ;;  %3335 = vadd.xlane.f32.xlu0 %v3334_v58  ;;  %v3117_v9 = vpop.xlane.xlu1 %3116  ;;  %v7281_v0 = vadd.f32 %v1760_v50, %v8983_v51  ;;  %v2775_v3 = vadd.f32 %v6795_v60, %v2640_v53  ;;  %v2516_v8 = vmul.f32 %v5994_v17, %v8985_v28  ;;  %v3337_v29 = vsel %vm3072_vm0, %v3032_v12, 0.0 }
 0x403   : > { %v3126_v34 = vpop.xlane.xlu0 %3125  ;;  %v3473_v32 = vadd.f32 %v7055_v63, %v3117_v9  ;;  %v3037_v50 = vmul.f32 %v6849_v48, %v2902_v31  ;;  %v2904_v25 = vmax.f32 %v2776_v15, 0.0  ;;  %v2778_v23 = vadd.f32 %v6795_v60, %v2643_v30  ;;  %v8989_v31 = vld [vmem:[#allocation73_spill] sm:$0xff] }
 0x404   : > { %v3476_v24 = vadd.f32 %v7055_v63, %v3126_v34  ;;  %v2645_v53 = vadd.f32 %v2517_v2, %v6963_v18  ;;  %v2519_v14 = vmul.f32 %v5994_v17, %v8986_v13  ;;  %v3346_v55 = vsel %vm3072_vm0, %v3035_v10, 0.0  ;;  %v8987_v34 = vld [vmem:[#allocation312_spill] sm:$0xff] }
 0x405   : > { %3602 = vst.msk [vmem:[%s7070_s14 + $0x70] sm:$0xff] %vm3587_vm1, %v3473_v32  ;;  %3332 = vadd.xlane.f32.xlu1 %v3331_v46  ;;  %v7304_v9 = vadd.f32 %v1761_v7, %v8987_v34  ;;  %v8988_v46 = vld [vmem:[#allocation197_spill] sm:$0xff]  ;;  %v3343_v15 = vsel %vm3072_vm0, %v3034_v37, 0.0  ;;  %v3036_v18 = vmul.f32 %v6849_v48, %v2901_v6  ;;  %v2644_v32 = vadd.f32 %v2516_v8, %v6950_v43  ;;  %v8990_v6 = vld [vmem:[#allocation67_spill] sm:$0xff]  ;;  %v8991_v8 = vld [vmem:[#allocation140_spill] sm:$0xff] }
 0x406   : > { %3605 = vst.msk [vmem:[%s7070_s14 + $0x88] sm:$0xff] %vm3587_vm1, %v3476_v24  ;;  %3341 = vadd.xlane.f32.xlu0 %v3340_v4  ;;  %v3123_v33 = vpop.xlane.xlu1 %3122  ;;  %v1762_v12 = vmul.f32 %v5641_v52, %v8988_v46  ;;  %v2777_v24 = vadd.f32 %v6795_v60, %v2642_v54  ;;  %v2518_v30 = vmul.f32 %v5994_v17, %v8989_v31  ;;  %v2903_v4 = vmax.f32 %v2775_v3, 0.0  ;;  %v8992_v3 = vld [vmem:[#allocation198_spill] sm:$0xff]  ;;  %v8995_v31 = vld [vmem:[#allocation139_spill] sm:$0xff] }
 0x407   : > { %v3132_v58 = vpop.xlane.xlu0 %3131  ;;  %v3475_v61 = vadd.f32 %v7055_v63, %v3123_v33  ;;  %v3352_v38 = vsel %vm3072_vm0, %v3037_v50, 0.0  ;;  %v3039_v7 = vmul.f32 %v6849_v48, %v2904_v25  ;;  %v2780_v37 = vadd.f32 %v6795_v60, %v2645_v53 }
 0x408   : > { %v3478_v62 = vadd.f32 %v7055_v63, %v3132_v58  ;;  %v2647_v43 = vadd.f32 %v2519_v14, %v7011_v16  ;;  %v2521_v54 = vmul.f32 %v5994_v17, %v8990_v6  ;;  %v2906_v28 = vmax.f32 %v2778_v23, 0.0  ;;  %v8994_v14 = vld [vmem:[#allocation211_spill] sm:$0xff] }
 0x409   : > { %3604 = vst.msk [vmem:[%s7070_s14 + $0x80] sm:$0xff] %vm3587_vm1, %v3475_v61  ;;  %3338 = vadd.xlane.f32.xlu1 %v3337_v29  ;;  %v7327_v58 = vadd.f32 %v1762_v12, %v8991_v8  ;;  %v1763_v33 = vmul.f32 %v5641_v52, %v8992_v3  ;;  %v8993_v29 = vld [vmem:[#allocation58_spill] sm:$0xff]  ;;  %v3349_v16 = vsel %vm3072_vm0, %v3036_v18, 0.0  ;;  %v2779_v61 = vadd.f32 %v6795_v60, %v2644_v32 }
 0x40a   : > { %3607 = vst.msk [vmem:[%s7070_s14 + $0x98] sm:$0xff] %vm3587_vm1, %v3478_v62  ;;  %3347 = vadd.xlane.f32.xlu0 %v3346_v55  ;;  %v3129_v2 = vpop.xlane.xlu1 %3128  ;;  %v2520_v62 = vmul.f32 %v5994_v17, %v8993_v29  ;;  %v2646_v50 = vadd.f32 %v2518_v30, %v6986_v5  ;;  %v3038_v53 = vmul.f32 %v6849_v48, %v2903_v4  ;;  %v2905_v13 = vmax.f32 %v2777_v24, 0.0  ;;  %v8998_v29 = vld [vmem:[#allocation199_spill] sm:$0xff] }
 0x40b   : > { %v3138_v56 = vpop.xlane.xlu0 %3137  ;;  %v3477_v51 = vadd.f32 %v7055_v63, %v3129_v2  ;;  %v2523_v55 = vmul.f32 %v5994_v17, %v8994_v14  ;;  %v3358_v12 = vsel %vm3072_vm0, %v3039_v7, 0.0  ;;  %v2649_v5 = vadd.f32 %v2521_v54, %v7019_v45 }
 0x40c   : > { %v3480_v10 = vadd.f32 %v7055_v63, %v3138_v56  ;;  %v3041_v18 = vmul.f32 %v6849_v48, %v2906_v28  ;;  %v2908_v32 = vmax.f32 %v2780_v37, 0.0  ;;  %v7350_v30 = vadd.f32 %v1763_v33, %v8995_v31  ;;  %v8996_v56 = vld [vmem:[#allocation62_spill] sm:$0xff]  ;;  %v8997_v37 = vld [vmem:[#allocation77_spill] sm:$0xff] }
 0x40d   : > { %3606 = vst.msk [vmem:[%s7070_s14 + $0x90] sm:$0xff] %vm3587_vm1, %v3477_v51  ;;  %3344 = vadd.xlane.f32.xlu1 %v3343_v15  ;;  %v2782_v15 = vadd.f32 %v6795_v60, %v2647_v43  ;;  %v2648_v24 = vadd.f32 %v2520_v62, %v7014_v21  ;;  %v2522_v2 = vmul.f32 %v5994_v17, %v8996_v56  ;;  %v3355_v51 = vsel %vm3072_vm0, %v3038_v53, 0.0 }
 0x40e   : > { %3609 = vst.msk [vmem:[%s7070_s14 + $0xa8] sm:$0xff] %vm3587_vm1, %v3480_v10  ;;  %3353 = vadd.xlane.f32.xlu0 %v3352_v38  ;;  %v3135_v23 = vpop.xlane.xlu1 %3134  ;;  %v2781_v4 = vadd.f32 %v6795_v60, %v2646_v50  ;;  %v3040_v38 = vmul.f32 %v6849_v48, %v2905_v13  ;;  %v2907_v21 = vmax.f32 %v2779_v61, 0.0  ;;  %v2651_v7 = vadd.f32 %v2523_v55, %v7058_v42  ;;  %v8999_v61 = vld [vmem:[#allocation72_spill] sm:$0xff] }
 0x40f   : > { %v3144_v25 = vpop.xlane.xlu0 %3143  ;;  %v3479_v46 = vadd.f32 %v7055_v63, %v3135_v23  ;;  %v2525_v43 = vmul.f32 %v5994_v17, %v8997_v37  ;;  %v2784_v28 = vadd.f32 %v6795_v60, %v2649_v5  ;;  %v3364_v8 = vsel %vm3072_vm0, %v3041_v18, 0.0 }
 0x410   : > { %v3482_v34 = vadd.f32 %v7055_v63, %v3144_v25  ;;  %v3043_v3 = vmul.f32 %v6849_v48, %v2908_v32  ;;  %v2910_v33 = vmax.f32 %v2782_v15, 0.0  ;;  %v1764_v62 = vmul.f32 %v5641_v52, %v8998_v29  ;;  %v9000_v32 = vld [vmem:[#allocation10_spill] sm:$0xff] }
 0x411   : > { %3608 = vst.msk [vmem:[%s7070_s14 + $0xa0] sm:$0xff] %vm3587_vm1, %v3479_v46  ;;  %3350 = vadd.xlane.f32.xlu1 %v3349_v16  ;;  %v2783_v16 = vadd.f32 %v6795_v60, %v2648_v24  ;;  %v2650_v42 = vadd.f32 %v2522_v2, %v7034_v59  ;;  %v2524_v50 = vmul.f32 %v5994_v17, %v8999_v61  ;;  %v3361_v53 = vsel %vm3072_vm0, %v3040_v38, 0.0  ;;  %v7385_v59 = vld [vmem:[%s7884_s2] ss:$0 sm:$0xff]  ;;  %v9001_v24 = vld [vmem:[#allocation200_spill] sm:$0xff] }
 0x412   : > { %3611 = vst.msk [vmem:[%s7070_s14 + $0xb8] sm:$0xff] %vm3587_vm1, %v3482_v34  ;;  %3359 = vadd.xlane.f32.xlu0 %v3358_v12  ;;  %v3141_v10 = vpop.xlane.xlu1 %3140  ;;  %v3042_v13 = vmul.f32 %v6849_v48, %v2907_v21  ;;  %v2909_v60 = vmax.f32 %v2781_v4, 0.0  ;;  %v2786_v14 = vadd.f32 %v7385_v59, %v2651_v7  ;;  %v2653_v55 = vadd.f32 %v2525_v43, %v7111_v57  ;;  %v9002_v4 = vld [vmem:[#allocation66_spill] sm:$0xff] }
 0x413   : > { %v3150_v45 = vpop.xlane.xlu0 %3149  ;;  %v3481_v54 = vadd.f32 %v7055_v63, %v3141_v10  ;;  %v2527_v12 = vmul.f32 %v5994_v17, %v6799_v49  ;;  %v3370_v15 = vsel %vm3072_vm0, %v3043_v3, 0.0  ;;  %v3045_v5 = vmul.f32 %v6849_v48, %v2910_v33  ;;  %v9004_v33 = vld [vmem:[#allocation11_spill] sm:$0xff] }
 0x414   : > { %v3484_v6 = vadd.f32 %v7055_v63, %v3150_v45  ;;  %v2912_v18 = vmax.f32 %v2784_v28, 0.0  ;;  %v7396_v31 = vadd.f32 %v1764_v62, %v9000_v32  ;;  %v1765_v56 = vmul.f32 %v5641_v52, %v9001_v24  ;;  %v9005_v62 = vld [vmem:[#allocation201_spill] sm:$0xff] }
 0x415   : > { %3610 = vst.msk [vmem:[%s7070_s14 + $0xb0] sm:$0xff] %vm3587_vm1, %v3481_v54  ;;  %3356 = vadd.xlane.f32.xlu1 %v3355_v51  ;;  %v2785_v57 = vadd.f32 %v7385_v59, %v2650_v42  ;;  %v2911_v49 = vmax.f32 %v2783_v16, 0.0  ;;  %v2652_v2 = vadd.f32 %v2524_v50, %v7092_v26  ;;  %v2526_v45 = vmul.f32 %v5994_v17, %v9002_v4  ;;  %v9003_v54 = vld [vmem:[#allocation79_spill] sm:$0xff]  ;;  %v9008_v32 = vld [vmem:[#allocation141_spill] sm:$0xff] }
 0x416   : > { %3613 = vst.msk [vmem:[%s7070_s14 + $0xc8] sm:$0xff] %vm3587_vm1, %v3484_v6  ;;  %3365 = vadd.xlane.f32.xlu0 %v3364_v8  ;;  %v3147_v23 = vpop.xlane.xlu1 %3146  ;;  %v3367_v38 = vsel %vm3072_vm0, %v3042_v13, 0.0  ;;  %v3044_v21 = vmul.f32 %v6849_v48, %v2909_v60  ;;  %v2788_v7 = vadd.f32 %v7385_v59, %v2653_v55  ;;  %v2914_v6 = vmax.f32 %v2786_v14, 0.0 }
 0x417   : > { %v3156_v25 = vpop.xlane.xlu0 %3155  ;;  %v3483_v46 = vadd.f32 %v7055_v63, %v3147_v23  ;;  %v2655_v26 = vadd.f32 %v2527_v12, %v7148_v39  ;;  %v2529_v28 = vmul.f32 %v5994_v17, %v9003_v54  ;;  %v3376_v8 = vsel %vm3072_vm0, %v3045_v5, 0.0  ;;  %v7430_v39 = vld [vmem:[%s7885_s3] ss:$0 sm:$0xff] }
 0x418   : > { %v3486_v34 = vadd.f32 %v7055_v63, %v3156_v25  ;;  %v3047_v3 = vmul.f32 %v6849_v48, %v2912_v18  ;;  %v7419_v29 = vadd.f32 %v1765_v56, %v9004_v33  ;;  %v1766_v16 = vmul.f32 %v5641_v52, %v9005_v62  ;;  %v9006_v25 = vld [vmem:[#allocation75_spill] sm:$0xff]  ;;  %v9009_v56 = vld [vmem:[#allocation202_spill] sm:$0xff] }
 0x419   : > { %3612 = vst.msk [vmem:[%s7070_s14 + $0xc0] sm:$0xff] %vm3587_vm1, %v3483_v46  ;;  %3362 = vadd.xlane.f32.xlu1 %v3361_v53  ;;  %v3046_v42 = vmul.f32 %v7430_v39, %v2911_v49  ;;  %v2913_v48 = vmax.f32 %v2785_v57, 0.0  ;;  %v2787_v61 = vadd.f32 %v7385_v59, %v2652_v2  ;;  %v2654_v50 = vadd.f32 %v2526_v45, %v7127_v11  ;;  %v9007_v11 = vld [vmem:[#allocation81_spill] sm:$0xff]  ;;  %v9010_v45 = vld [vmem:[#allocation74_spill] sm:$0xff]  ;;  %v9012_v33 = vld [vmem:[#allocation203_spill] sm:$0xff] }
 0x41a   : > { %3615 = vst.msk [vmem:[%s7070_s14 + $0xd8] sm:$0xff] %vm3587_vm1, %v3486_v34  ;;  %3371 = vadd.xlane.f32.xlu0 %v3370_v15  ;;  %v3153_v51 = vpop.xlane.xlu1 %3152  ;;  %v2528_v23 = vmul.f32 %v5994_v17, %v9006_v25  ;;  %v3373_v60 = vsel %vm3072_vm0, %v3044_v21, 0.0  ;;  %v3049_v34 = vmul.f32 %v7430_v39, %v2914_v6  ;;  %v2916_v46 = vmax.f32 %v2788_v7, 0.0 }
 0x41b   : > { %v3162_v10 = vpop.xlane.xlu0 %3161  ;;  %v3485_v43 = vadd.f32 %v7055_v63, %v3153_v51  ;;  %v2790_v12 = vadd.f32 %v7385_v59, %v2655_v26  ;;  %v2657_v15 = vadd.f32 %v2529_v28, %v7194_v41  ;;  %v2531_v5 = vmul.f32 %v5994_v17, %v9007_v11 }
 0x41c   : > { %v3488_v37 = vadd.f32 %v7055_v63, %v3162_v10  ;;  %v3382_v18 = vsel %vm3072_vm0, %v3047_v3, 0.0  ;;  %v7447_v24 = vadd.f32 %v1766_v16, %v9008_v32  ;;  %v1767_v57 = vmul.f32 %v5641_v52, %v9009_v56  ;;  %v9013_v16 = vld [vmem:[#allocation76_spill] sm:$0xff] }
 0x41d   : > { %3614 = vst.msk [vmem:[%s7070_s14 + $0xd0] sm:$0xff] %vm3587_vm1, %v3485_v43  ;;  %3368 = vadd.xlane.f32.xlu1 %v3367_v38  ;;  %v3379_v49 = vsel %vm3072_vm0, %v3046_v42, 0.0  ;;  %v3048_v41 = vmul.f32 %v7430_v39, %v2913_v48  ;;  %v2789_v2 = vadd.f32 %v7385_v59, %v2654_v50  ;;  %v2656_v4 = vadd.f32 %v2528_v23, %v7171_v47 }
 0x41e   : > { %3617 = vst.msk [vmem:[%s7070_s14 + $0xe8] sm:$0xff] %vm3587_vm1, %v3488_v37  ;;  %3377 = vadd.xlane.f32.xlu0 %v3376_v8  ;;  %v3159_v13 = vpop.xlane.xlu1 %3158  ;;  %v2530_v10 = vmul.f32 %v5994_v17, %v9010_v45  ;;  %v2915_v21 = vmax.f32 %v2787_v61, 0.0  ;;  %v3388_v43 = vsel %vm3072_vm0, %v3049_v34, 0.0  ;;  %v3051_v6 = vmul.f32 %v7430_v39, %v2916_v46  ;;  %v9011_v8 = vld [vmem:[#allocation13_spill] sm:$0xff] }
 0x41f   : > { %v3168_v53 = vpop.xlane.xlu0 %3167  ;;  %v3487_v55 = vadd.f32 %v7055_v63, %v3159_v13  ;;  %v2792_v26 = vadd.f32 %v7385_v59, %v2657_v15  ;;  %v2659_v47 = vadd.f32 %v2531_v5, %v7258_v40  ;;  %v2533_v54 = vmul.f32 %v5994_v17, %v6904_v36  ;;  %v9015_v5 = vld [vmem:[#allocation80_spill] sm:$0xff] }
 0x420   : > { %v3490_v14 = vadd.f32 %v7055_v63, %v3168_v53  ;;  %v2918_v28 = vmax.f32 %v2790_v12, 0.0  ;;  %v7470_v3 = vadd.f32 %v1767_v57, %v9011_v8  ;;  %v1768_v62 = vmul.f32 %v5641_v52, %v9012_v33  ;;  %v9014_v12 = vld [vmem:[#allocation204_spill] sm:$0xff] }
 0x421   : > { %3616 = vst.msk [vmem:[%s7070_s14 + $0xe0] sm:$0xff] %vm3587_vm1, %v3487_v55  ;;  %3374 = vadd.xlane.f32.xlu1 %v3373_v60  ;;  %v2532_v42 = vmul.f32 %v5994_v17, %v9013_v16  ;;  %v3385_v40 = vsel %vm3072_vm0, %v3048_v41, 0.0  ;;  %v2791_v36 = vadd.f32 %v7385_v59, %v2656_v4  ;;  %v2658_v48 = vadd.f32 %v2530_v10, %v7237_v22 }
 0x422   : > { %3619 = vst.msk [vmem:[%s7070_s14 + $0xf8] sm:$0xff] %vm3587_vm1, %v3490_v14  ;;  %3383 = vadd.xlane.f32.xlu0 %v3382_v18  ;;  %v3165_v38 = vpop.xlane.xlu1 %3164  ;;  %v3050_v25 = vmul.f32 %v7430_v39, %v2915_v21  ;;  %v2917_v23 = vmax.f32 %v2789_v2, 0.0  ;;  %v2535_v53 = vmul.f32 %v5994_v17, %v6937_v44  ;;  %v3394_v14 = vsel %vm3072_vm0, %v3051_v6, 0.0  ;;  %v9016_v21 = vld [vmem:[#allocation3_spill] sm:$0xff] }
 0x423   : > { %v3174_v51 = vpop.xlane.xlu0 %3173  ;;  %v3489_v37 = vadd.f32 %v7055_v63, %v3165_v38  ;;  %v2794_v55 = vadd.f32 %v7385_v59, %v2659_v47  ;;  %v2661_v22 = vadd.f32 %v2533_v54, %v7304_v9  ;;  %v3053_v34 = vmul.f32 %v7430_v39, %v2918_v28 }
 0x424   : > { %v3492_v7 = vadd.f32 %v7055_v63, %v3174_v51  ;;  %v2920_v46 = vmax.f32 %v2792_v26, 0.0  ;;  %v1769_v15 = vmul.f32 %v5641_v52, %v9014_v12  ;;  %v2660_v11 = vadd.f32 %v2532_v42, %v7281_v0 }
 0x425   : > { %3618 = vst.msk [vmem:[%s7070_s14 + $0xf0] sm:$0xff] %vm3587_vm1, %v3489_v37  ;;  %3380 = vadd.xlane.f32.xlu1 %v3379_v49  ;;  %v2534_v44 = vmul.f32 %v5994_v17, %v9015_v5  ;;  %v2793_v18 = vadd.f32 %v7385_v59, %v2658_v48  ;;  %v3391_v56 = vsel %vm3072_vm0, %v3050_v25, 0.0  ;;  %v3052_v57 = vmul.f32 %v7430_v39, %v2917_v23  ;;  %v9018_v48 = vld [vmem:[#allocation142_spill] sm:$0xff] }
 0x426   : > { %3621 = vst.msk [vmem:[%s7070_s14 + $0x108] sm:$0xff] %vm3587_vm1, %v3492_v7  ;;  %3389 = vadd.xlane.f32.xlu0 %v3388_v43  ;;  %v3171_v50 = vpop.xlane.xlu1 %3170  ;;  %v2919_v0 = vmax.f32 %v2791_v36, 0.0  ;;  %v2663_v49 = vadd.f32 %v2535_v53, %v7350_v30  ;;  %v2537_v41 = vmul.f32 %v5994_v17, %v6973_v20  ;;  %v2796_v45 = vadd.f32 %v7385_v59, %v2661_v22  ;;  %v9017_v20 = vld [vmem:[#allocation85_spill] sm:$0xff]  ;;  %v9020_v53 = vld [vmem:[#allocation78_spill] sm:$0xff] }
 0x427   : > { %v3180_v61 = vpop.xlane.xlu0 %3179  ;;  %v3491_v60 = vadd.f32 %v7055_v63, %v3171_v50  ;;  %v3400_v10 = vsel %vm3072_vm0, %v3053_v34, 0.0  ;;  %v3055_v51 = vmul.f32 %v7430_v39, %v2920_v46  ;;  %v2922_v38 = vmax.f32 %v2794_v55, 0.0  ;;  %v9019_v50 = vld [vmem:[#allocation205_spill] sm:$0xff] }
 0x428   : > { %v3494_v13 = vadd.f32 %v7055_v63, %v3180_v61  ;;  %v7513_v7 = vadd.f32 %v1768_v62, %v9016_v21  ;;  %v2795_v37 = vadd.f32 %v7385_v59, %v2660_v11  ;;  %v2662_v30 = vadd.f32 %v2534_v44, %v7327_v58 }
 0x429   : > { %3620 = vst.msk [vmem:[%s7070_s14 + $0x100] sm:$0xff] %vm3587_vm1, %v3491_v60  ;;  %3386 = vadd.xlane.f32.xlu1 %v3385_v40  ;;  %v2536_v43 = vmul.f32 %v5994_v17, %v9017_v20  ;;  %v3397_v47 = vsel %vm3072_vm0, %v3052_v57, 0.0  ;;  %v3054_v54 = vmul.f32 %v7430_v39, %v2919_v0  ;;  %v2921_v28 = vmax.f32 %v2793_v18, 0.0  ;;  %v9021_v18 = vld [vmem:[#allocation12_spill] sm:$0xff] }
 0x42a   : > { %3623 = vst.msk [vmem:[%s7070_s14 + $0x118] sm:$0xff] %vm3587_vm1, %v3494_v13  ;;  %3395 = vadd.xlane.f32.xlu0 %v3394_v14  ;;  %v3177_v32 = vpop.xlane.xlu1 %3176  ;;  %v2798_v58 = vadd.f32 %v7385_v59, %v2663_v49  ;;  %v2665_v8 = vadd.f32 %v2537_v41, %v7419_v29  ;;  %v2539_v16 = vmul.f32 %v5994_v17, %v7001_v1  ;;  %v3406_v42 = vsel %vm3072_vm0, %v3055_v51, 0.0  ;;  %v9023_v49 = vld [vmem:[#allocation84_spill] sm:$0xff] }
 0x42b   : > { %v3186_v9 = vpop.xlane.xlu0 %3185  ;;  %v3493_v4 = vadd.f32 %v7055_v63, %v3177_v32  ;;  %v3057_v40 = vmul.f32 %v7430_v39, %v2922_v38  ;;  %v2924_v36 = vmax.f32 %v2796_v45, 0.0  ;;  %v1897_v61 = vadd.f32 %v1769_v15, %v9018_v48  ;;  %v9022_v32 = vld [vmem:[#allocation206_spill] sm:$0xff] }
 0x42c   : > { %v3496_v2 = vadd.f32 %v7055_v63, %v3186_v9  ;;  %v1770_v25 = vmul.f32 %v5641_v52, %v9019_v50  ;;  %v2797_v23 = vadd.f32 %v7385_v59, %v2662_v30  ;;  %v2923_v29 = vmax.f32 %v2795_v37, 0.0 }
 0x42d   : > { %3622 = vst.msk [vmem:[%s7070_s14 + $0x110] sm:$0xff] %vm3587_vm1, %v3493_v4  ;;  %3392 = vadd.xlane.f32.xlu1 %v3391_v56  ;;  %v2664_v1 = vadd.f32 %v2536_v43, %v7396_v31  ;;  %v2538_v13 = vmul.f32 %v5994_v17, %v9020_v53  ;;  %v3403_v55 = vsel %vm3072_vm0, %v3054_v54, 0.0  ;;  %v3056_v22 = vmul.f32 %v7430_v39, %v2921_v28  ;;  %v9024_v43 = vld [vmem:[#allocation4_spill] sm:$0xff] }
 0x42e   : > { %3625 = vst.msk [vmem:[%s7070_s14 + $0x128] sm:$0xff] %vm3587_vm1, %v3496_v2  ;;  %3401 = vadd.xlane.f32.xlu0 %v3400_v10  ;;  %v3183_v26 = vpop.xlane.xlu1 %3182  ;;  %v2800_v34 = vadd.f32 %v7385_v59, %v2665_v8  ;;  %v2926_v15 = vmax.f32 %v2798_v58, 0.0  ;;  %v2667_v31 = vadd.f32 %v2539_v16, %v7470_v3  ;;  %v2541_v11 = vmul.f32 %v5994_v17, %v7042_v35  ;;  %v9026_v8 = vld [vmem:[#allocation213_spill] sm:$0xff] }
 0x42f   : > { %v3192_v6 = vpop.xlane.xlu0 %3191  ;;  %v3495_v62 = vadd.f32 %v7055_v63, %v3183_v26  ;;  %v3412_v5 = vsel %vm3072_vm0, %v3057_v40, 0.0  ;;  %v3059_v44 = vmul.f32 %v7430_v39, %v2924_v36  ;;  %v1898_v9 = vadd.f32 %v1770_v25, %v9021_v18  ;;  %v9025_v26 = vld [vmem:[#allocation208_spill] sm:$0xff] }
 0x430   : > { %v3498_v33 = vadd.f32 %v7055_v63, %v3192_v6  ;;  %v1771_v56 = vmul.f32 %v5641_v52, %v9022_v32  ;;  %v3058_v3 = vmul.f32 %v7430_v39, %v2923_v29  ;;  %v2925_v57 = vmax.f32 %v2797_v23, 0.0  ;;  %v9027_v29 = vld [vmem:[#allocation8_spill] sm:$0xff] }
 0x431   : > { %3624 = vst.msk [vmem:[%s7070_s14 + $0x120] sm:$0xff] %vm3587_vm1, %v3495_v62  ;;  %3398 = vadd.xlane.f32.xlu1 %v3397_v47  ;;  %v2799_v35 = vadd.f32 %v7385_v59, %v2664_v1  ;;  %v2666_v0 = vadd.f32 %v2538_v13, %v7447_v24  ;;  %v2540_v41 = vmul.f32 %v5994_v17, %v9023_v49  ;;  %v3409_v45 = vsel %vm3072_vm0, %v3056_v22, 0.0  ;;  %v9028_v1 = vld [vmem:[#allocation252_spill] sm:$0xff]  ;;  %v9029_v13 = vld [vmem:[#allocation207_spill] sm:$0xff] }
 0x432   : > { %3627 = vst.msk [vmem:[%s7070_s14 + $0x138] sm:$0xff] %vm3587_vm1, %v3498_v33  ;;  %3407 = vadd.xlane.f32.xlu0 %v3406_v42  ;;  %v3189_v14 = vpop.xlane.xlu1 %3188  ;;  %v3061_v38 = vmul.f32 %v7430_v39, %v2926_v15  ;;  %v2928_v21 = vmax.f32 %v2800_v34, 0.0  ;;  %v2802_v37 = vadd.f32 %v7385_v59, %v2667_v31  ;;  %v2669_v30 = vadd.f32 %v2541_v11, %v1897_v61  ;;  %v9031_v31 = vld [vmem:[#allocation83_spill] sm:$0xff] }
 0x433   : > { %v3198_v60 = vpop.xlane.xlu0 %3197  ;;  %v3497_v12 = vadd.f32 %v7055_v63, %v3189_v14  ;;  %v2543_v24 = vmul.f32 %v5994_v17, %v7081_v19  ;;  %v3418_v20 = vsel %vm3072_vm0, %v3059_v44, 0.0  ;;  %v1899_v6 = vadd.f32 %v1771_v56, %v9024_v43  ;;  %v9030_v14 = vld [vmem:[#allocation17_spill] sm:$0xff] }
 0x434   : > { %v3500_v46 = vadd.f32 %v7055_v63, %v3198_v60  ;;  %v1773_v47 = vmul.f32 %v5641_v52, %v9025_v26  ;;  %v3415_v54 = vsel %vm3072_vm0, %v3058_v3, 0.0  ;;  %v3060_v28 = vmul.f32 %v7430_v39, %v2925_v57 }
 0x435   : > { %3626 = vst.msk [vmem:[%s7070_s14 + $0x130] sm:$0xff] %vm3587_vm1, %v3497_v12  ;;  %3404 = vadd.xlane.f32.xlu1 %v3403_v55  ;;  %v2801_v58 = vadd.f32 %v7385_v59, %v2666_v0  ;;  %v2668_v19 = vadd.f32 %v2540_v41, %v7513_v7  ;;  %v2542_v33 = vmul.f32 %v5994_v17, %v9026_v8  ;;  %v2927_v42 = vmax.f32 %v2799_v35, 0.0 }
 0x436   : > { %3629 = vst.msk [vmem:[%s7070_s14 + $0x148] sm:$0xff] %vm3587_vm1, %v3500_v46  ;;  %3413 = vadd.xlane.f32.xlu0 %v3412_v5  ;;  %v3195_v4 = vpop.xlane.xlu1 %3194  ;;  %v3424_v48 = vsel %vm3072_vm0, %v3061_v38, 0.0  ;;  %v3063_v61 = vmul.f32 %v7430_v39, %v2928_v21  ;;  %v2804_v50 = vadd.f32 %v7385_v59, %v2669_v30  ;;  %v2671_v25 = vadd.f32 %v2543_v24, %v1899_v6 }
 0x437   : > { %v3204_v2 = vpop.xlane.xlu0 %3203  ;;  %v3499_v51 = vadd.f32 %v7055_v63, %v3195_v4  ;;  %v2545_v7 = vmul.f32 %v5994_v17, %v7115_v27  ;;  %v2930_v23 = vmax.f32 %v2802_v37, 0.0  ;;  %v1128_v53 = vmul.f32 %v9028_v1, %v9027_v29 }
 0x438   : > { %v3502_v10 = vadd.f32 %v7055_v63, %v3204_v2  ;;  %v1772_v60 = vmul.f32 %v5641_v52, %v9029_v13  ;;  %v1901_v55 = vadd.f32 %v1773_v47, %v9030_v14  ;;  %v3421_v22 = vsel %vm3072_vm0, %v3060_v28, 0.0 }
 0x439   : > { %3628 = vst.msk [vmem:[%s7070_s14 + $0x140] sm:$0xff] %vm3587_vm1, %v3499_v51  ;;  %3410 = vadd.xlane.f32.xlu1 %v3409_v45  ;;  %v2803_v27 = vadd.f32 %v7385_v59, %v2668_v19  ;;  %v2670_v34 = vadd.f32 %v2542_v33, %v1898_v9  ;;  %v3062_v15 = vmul.f32 %v7430_v39, %v2927_v42  ;;  %v2929_v52 = vmax.f32 %v2801_v58, 0.0 }
 0x43a   : > { %3631 = vst.msk [vmem:[%s7070_s14 + $0x158] sm:$0xff] %vm3587_vm1, %v3502_v10  ;;  %3419 = vadd.xlane.f32.xlu0 %v3418_v20  ;;  %v3201_v16 = vpop.xlane.xlu1 %3200  ;;  %v2544_v11 = vmul.f32 %v5994_v17, %v9031_v31  ;;  %v3430_v18 = vsel %vm3072_vm0, %v3063_v61, 0.0  ;;  %v2806_v32 = vadd.f32 %v7385_v59, %v2671_v25  ;;  %v2673_v56 = vadd.f32 %v2545_v7, %v1901_v55 }
 0x43b   : > { %v3210_v62 = vpop.xlane.xlu0 %3209  ;;  %v3501_v36 = vadd.f32 %v7055_v63, %v3201_v16  ;;  %v3065_v3 = vmul.f32 %v7430_v39, %v2930_v23  ;;  %v2932_v9 = vmax.f32 %v2804_v50, 0.0  ;;  %v1900_v57 = vadd.f32 %v1772_v60, %v1128_v53 }
 0x43c   : > { %v3504_v40 = vadd.f32 %v7055_v63, %v3210_v62  ;;  %v3427_v0 = vsel %vm3072_vm0, %v3062_v15, 0.0  ;;  %v3064_v49 = vmul.f32 %v7430_v39, %v2929_v52  ;;  %v2931_v41 = vmax.f32 %v2803_v27, 0.0 }
 0x43d   : > { %3630 = vst.msk [vmem:[%s7070_s14 + $0x150] sm:$0xff] %vm3587_vm1, %v3501_v36  ;;  %3416 = vadd.xlane.f32.xlu1 %v3415_v54  ;;  %v2805_v2 = vadd.f32 %v7385_v59, %v2670_v34  ;;  %v2672_v4 = vadd.f32 %v2544_v11, %v1900_v57  ;;  %v2808_v51 = vadd.f32 %v7385_v59, %v2673_v56  ;;  %v3436_v38 = vsel %vm3072_vm0, %v3065_v3, 0.0 }
 0x43e   : > { %3633 = vst.msk [vmem:[%s7070_s14 + $0x168] sm:$0xff] %vm3587_vm1, %v3504_v40  ;;  %3425 = vadd.xlane.f32.xlu0 %v3424_v48  ;;  %v3207_v12 = vpop.xlane.xlu1 %3206  ;;  %v3067_v21 = vmul.f32 %v7430_v39, %v2932_v9  ;;  %v2934_v37 = vmax.f32 %v2806_v32, 0.0  ;;  %v3433_v20 = vsel %vm3072_vm0, %v3064_v49, 0.0  ;;  %v3066_v26 = vmul.f32 %v7430_v39, %v2931_v41 }
 0x43f   : > { %v3216_v46 = vpop.xlane.xlu0 %3215  ;;  %v3503_v44 = vadd.f32 %v7055_v63, %v3207_v12  ;;  %v2933_v47 = vmax.f32 %v2805_v2, 0.0  ;;  %v2807_v54 = vadd.f32 %v7385_v59, %v2672_v4  ;;  %v2936_v19 = vmax.f32 %v2808_v51, 0.0 }
 0x440   : > { %v3506_v5 = vadd.f32 %v7055_v63, %v3216_v46  ;;  %v3442_v28 = vsel %vm3072_vm0, %v3067_v21, 0.0  ;;  %v3069_v58 = vmul.f32 %v7430_v39, %v2934_v37  ;;  %v3439_v59 = vsel %vm3072_vm0, %v3066_v26, 0.0 }
 0x441   : > { %3632 = vst.msk [vmem:[%s7070_s14 + $0x160] sm:$0xff] %vm3587_vm1, %v3503_v44  ;;  %3422 = vadd.xlane.f32.xlu1 %v3421_v22  ;;  %v3071_v40 = vmul.f32 %v7430_v39, %v2936_v19  ;;  %v3068_v36 = vmul.f32 %v7430_v39, %v2933_v47  ;;  %v2935_v48 = vmax.f32 %v2807_v54, 0.0 }
 0x442   : > { %3635 = vst.msk [vmem:[%s7070_s14 + $0x178] sm:$0xff] %vm3587_vm1, %v3506_v5  ;;  %3431 = vadd.xlane.f32.xlu0 %v3430_v18  ;;  %v3213_v35 = vpop.xlane.xlu1 %3212  ;;  %v3448_v42 = vsel %vm3072_vm0, %v3069_v58, 0.0 }
 0x443   : > { %v3222_v17 = vpop.xlane.xlu0 %3221  ;;  %v3505_v10 = vadd.f32 %v7055_v63, %v3213_v35  ;;  %v3454_v23 = vsel %vm3072_vm0, %v3071_v40, 0.0  ;;  %v3445_v29 = vsel %vm3072_vm0, %v3068_v36, 0.0  ;;  %v3070_v1 = vmul.f32 %v7430_v39, %v2935_v48 }
 0x444   : > { %v3508_v45 = vadd.f32 %v7055_v63, %v3222_v17 }
 0x445   : > { %3634 = vst.msk [vmem:[%s7070_s14 + $0x170] sm:$0xff] %vm3587_vm1, %v3505_v10  ;;  %3428 = vadd.xlane.f32.xlu1 %v3427_v0  ;;  %v3451_v55 = vsel %vm3072_vm0, %v3070_v1, 0.0 }
 0x446   : > { %3637 = vst.msk [vmem:[%s7070_s14 + $0x188] sm:$0xff] %vm3587_vm1, %v3508_v45  ;;  %3437 = vadd.xlane.f32.xlu0 %v3436_v38  ;;  %v3219_v24 = vpop.xlane.xlu1 %3218 }
 0x447   : > { %v3228_v30 = vpop.xlane.xlu0 %3227  ;;  %v3507_v6 = vadd.f32 %v7055_v63, %v3219_v24 }
 0x448   : > { %v3510_v43 = vadd.f32 %v7055_v63, %v3228_v30 }
 0x449   : > { %3636 = vst.msk [vmem:[%s7070_s14 + $0x180] sm:$0xff] %vm3587_vm1, %v3507_v6  ;;  %3434 = vadd.xlane.f32.xlu1 %v3433_v20 }
 0x44a   : > { %3639 = vst.msk [vmem:[%s7070_s14 + $0x198] sm:$0xff] %vm3587_vm1, %v3510_v43  ;;  %3443 = vadd.xlane.f32.xlu0 %v3442_v28  ;;  %v3225_v33 = vpop.xlane.xlu1 %3224 }
 0x44b   : > { %v3234_v8 = vpop.xlane.xlu0 %3233  ;;  %v3509_v16 = vadd.f32 %v7055_v63, %v3225_v33 }
 0x44c   : > { %v3512_v62 = vadd.f32 %v7055_v63, %v3234_v8 }
 0x44d   : > { %3638 = vst.msk [vmem:[%s7070_s14 + $0x190] sm:$0xff] %vm3587_vm1, %v3509_v16  ;;  %3440 = vadd.xlane.f32.xlu1 %v3439_v59 }
 0x44e   : > { %3641 = vst.msk [vmem:[%s7070_s14 + $0x1a8] sm:$0xff] %vm3587_vm1, %v3512_v62  ;;  %3449 = vadd.xlane.f32.xlu0 %v3448_v42  ;;  %v3231_v50 = vpop.xlane.xlu1 %3230 }
 0x44f   : > { %v3240_v61 = vpop.xlane.xlu0 %3239  ;;  %v3511_v7 = vadd.f32 %v7055_v63, %v3231_v50 }
 0x450   : > { %v3514_v25 = vadd.f32 %v7055_v63, %v3240_v61 }
 0x451   : > { %3640 = vst.msk [vmem:[%s7070_s14 + $0x1a0] sm:$0xff] %vm3587_vm1, %v3511_v7  ;;  %3446 = vadd.xlane.f32.xlu1 %v3445_v29 }
 0x452   : > { %3643 = vst.msk [vmem:[%s7070_s14 + $0x1b8] sm:$0xff] %vm3587_vm1, %v3514_v25  ;;  %3455 = vadd.xlane.f32.xlu0 %v3454_v23  ;;  %v3237_v13 = vpop.xlane.xlu1 %3236 }
 0x453   : > { %v3246_v53 = vpop.xlane.xlu0 %3245  ;;  %v3513_v14 = vadd.f32 %v7055_v63, %v3237_v13 }
 0x454   : > { %v3516_v60 = vadd.f32 %v7055_v63, %v3246_v53 }
 0x455   : > { %3642 = vst.msk [vmem:[%s7070_s14 + $0x1b0] sm:$0xff] %vm3587_vm1, %v3513_v14  ;;  %3452 = vadd.xlane.f32.xlu1 %v3451_v55 }
 0x456   : > { %3645 = vst.msk [vmem:[%s7070_s14 + $0x1c8] sm:$0xff] %vm3587_vm1, %v3516_v60  ;;  %v3243_v22 = vpop.xlane.xlu1 %3242 }
 0x457   : > { %v3252_v39 = vpop.xlane.xlu0 %3251  ;;  %v3515_v34 = vadd.f32 %v7055_v63, %v3243_v22 }
 0x458   : > { %v3518_v27 = vadd.f32 %v7055_v63, %v3252_v39 }
 0x459   : > { %3644 = vst.msk [vmem:[%s7070_s14 + $0x1c0] sm:$0xff] %vm3587_vm1, %v3515_v34 }
 0x45a   : > { %3647 = vst.msk [vmem:[%s7070_s14 + $0x1d8] sm:$0xff] %vm3587_vm1, %v3518_v27  ;;  %v3249_v12 = vpop.xlane.xlu1 %3248 }
 0x45b   : > { %v3258_v46 = vpop.xlane.xlu0 %3257  ;;  %v3517_v52 = vadd.f32 %v7055_v63, %v3249_v12 }
 0x45c   : > { %v3520_v15 = vadd.f32 %v7055_v63, %v3258_v46 }
 0x45d   : > { %3646 = vst.msk [vmem:[%s7070_s14 + $0x1d0] sm:$0xff] %vm3587_vm1, %v3517_v52 }
 0x45e   : > { %3649 = vst.msk [vmem:[%s7070_s14 + $0x1e8] sm:$0xff] %vm3587_vm1, %v3520_v15  ;;  %v3255_v11 = vpop.xlane.xlu1 %3254 }
 0x45f   : > { %v3264_v31 = vpop.xlane.xlu0 %3263  ;;  %v3519_v44 = vadd.f32 %v7055_v63, %v3255_v11 }
 0x460   : > { %v3522_v5 = vadd.f32 %v7055_v63, %v3264_v31 }
 0x461   : > { %3648 = vst.msk [vmem:[%s7070_s14 + $0x1e0] sm:$0xff] %vm3587_vm1, %v3519_v44 }
 0x462   : > { %3651 = vst.msk [vmem:[%s7070_s14 + $0x1f8] sm:$0xff] %vm3587_vm1, %v3522_v5  ;;  %v3261_v32 = vpop.xlane.xlu1 %3260 }
 0x463   : > { %v3270_v18 = vpop.xlane.xlu0 %3269  ;;  %v3521_v3 = vadd.f32 %v7055_v63, %v3261_v32 }
 0x464   : > { %v3524_v56 = vadd.f32 %v7055_v63, %v3270_v18 }
 0x465   : > { %3650 = vst.msk [vmem:[%s7070_s14 + $0x1f0] sm:$0xff] %vm3587_vm1, %v3521_v3 }
 0x466   : > { %3653 = vst.msk [vmem:[%s7070_s14 + $0x208] sm:$0xff] %vm3587_vm1, %v3524_v56  ;;  %v3267_v57 = vpop.xlane.xlu1 %3266 }
 0x467   : > { %v3276_v9 = vpop.xlane.xlu0 %3275  ;;  %v3523_v35 = vadd.f32 %v7055_v63, %v3267_v57 }
 0x468   : > { %v3526_v17 = vadd.f32 %v7055_v63, %v3276_v9 }
 0x469   : > { %3652 = vst.msk [vmem:[%s7070_s14 + $0x200] sm:$0xff] %vm3587_vm1, %v3523_v35 }
 0x46a   : > { %3655 = vst.msk [vmem:[%s7070_s14 + $0x218] sm:$0xff] %vm3587_vm1, %v3526_v17  ;;  %v3273_v49 = vpop.xlane.xlu1 %3272 }
 0x46b   : > { %v3282_v0 = vpop.xlane.xlu0 %3281  ;;  %v3525_v2 = vadd.f32 %v7055_v63, %v3273_v49 }
 0x46c   : > { %v3528_v41 = vadd.f32 %v7055_v63, %v3282_v0 }
 0x46d   : > { %3654 = vst.msk [vmem:[%s7070_s14 + $0x210] sm:$0xff] %vm3587_vm1, %v3525_v2 }
 0x46e   : > { %3657 = vst.msk [vmem:[%s7070_s14 + $0x228] sm:$0xff] %vm3587_vm1, %v3528_v41  ;;  %v3279_v45 = vpop.xlane.xlu1 %3278 }
 0x46f   : > { %v3288_v4 = vpop.xlane.xlu0 %3287  ;;  %v3527_v51 = vadd.f32 %v7055_v63, %v3279_v45 }
 0x470   : > { %v3530_v10 = vadd.f32 %v7055_v63, %v3288_v4 }
 0x471   : > { %3656 = vst.msk [vmem:[%s7070_s14 + $0x220] sm:$0xff] %vm3587_vm1, %v3527_v51 }
 0x472   : > { %3659 = vst.msk [vmem:[%s7070_s14 + $0x238] sm:$0xff] %vm3587_vm1, %v3530_v10  ;;  %v3285_v21 = vpop.xlane.xlu1 %3284 }
 0x473   : > { %v3294_v38 = vpop.xlane.xlu0 %3293  ;;  %v3529_v30 = vadd.f32 %v7055_v63, %v3285_v21 }
 0x474   : > { %v3532_v37 = vadd.f32 %v7055_v63, %v3294_v38 }
 0x475   : > { %3658 = vst.msk [vmem:[%s7070_s14 + $0x230] sm:$0xff] %vm3587_vm1, %v3529_v30 }
 0x476   : > { %3661 = vst.msk [vmem:[%s7070_s14 + $0x248] sm:$0xff] %vm3587_vm1, %v3532_v37  ;;  %v3291_v20 = vpop.xlane.xlu1 %3290 }
 0x477   : > { %v3300_v24 = vpop.xlane.xlu0 %3299  ;;  %v3531_v6 = vadd.f32 %v7055_v63, %v3291_v20 }
 0x478   : > { %v3534_v43 = vadd.f32 %v7055_v63, %v3300_v24 }
 0x479   : > { %3660 = vst.msk [vmem:[%s7070_s14 + $0x240] sm:$0xff] %vm3587_vm1, %v3531_v6 }
 0x47a   : > { %3663 = vst.msk [vmem:[%s7070_s14 + $0x258] sm:$0xff] %vm3587_vm1, %v3534_v43  ;;  %v3297_v47 = vpop.xlane.xlu1 %3296 }
 0x47b   : > { %v3306_v26 = vpop.xlane.xlu0 %3305  ;;  %v3533_v28 = vadd.f32 %v7055_v63, %v3297_v47 }
 0x47c   : > { %v3536_v54 = vadd.f32 %v7055_v63, %v3306_v26 }
 0x47d   : > { %3662 = vst.msk [vmem:[%s7070_s14 + $0x250] sm:$0xff] %vm3587_vm1, %v3533_v28 }
 0x47e   : > { %3665 = vst.msk [vmem:[%s7070_s14 + $0x268] sm:$0xff] %vm3587_vm1, %v3536_v54  ;;  %v3303_v19 = vpop.xlane.xlu1 %3302 }
 0x47f   : > { %v3312_v58 = vpop.xlane.xlu0 %3311  ;;  %v3535_v33 = vadd.f32 %v7055_v63, %v3303_v19 }
 0x480   : > { %v3538_v8 = vadd.f32 %v7055_v63, %v3312_v58 }
 0x481   : > { %3664 = vst.msk [vmem:[%s7070_s14 + $0x260] sm:$0xff] %vm3587_vm1, %v3535_v33 }
 0x482   : > { %3667 = vst.msk [vmem:[%s7070_s14 + $0x278] sm:$0xff] %vm3587_vm1, %v3538_v8  ;;  %v3309_v16 = vpop.xlane.xlu1 %3308 }
 0x483   : > { %v3318_v62 = vpop.xlane.xlu0 %3317  ;;  %v3537_v42 = vadd.f32 %v7055_v63, %v3309_v16 }
 0x484   : > { %v3540_v59 = vadd.f32 %v7055_v63, %v3318_v62 }
 0x485   : > { %3666 = vst.msk [vmem:[%s7070_s14 + $0x270] sm:$0xff] %vm3587_vm1, %v3537_v42 }
 0x486   : > { %3669 = vst.msk [vmem:[%s7070_s14 + $0x288] sm:$0xff] %vm3587_vm1, %v3540_v59  ;;  %v3315_v36 = vpop.xlane.xlu1 %3314 }
 0x487   : > { %v3324_v40 = vpop.xlane.xlu0 %3323  ;;  %v3539_v61 = vadd.f32 %v7055_v63, %v3315_v36 }
 0x488   : > { %v3542_v48 = vadd.f32 %v7055_v63, %v3324_v40 }
 0x489   : > { %3668 = vst.msk [vmem:[%s7070_s14 + $0x280] sm:$0xff] %vm3587_vm1, %v3539_v61 }
 0x48a   : > { %3671 = vst.msk [vmem:[%s7070_s14 + $0x298] sm:$0xff] %vm3587_vm1, %v3542_v48  ;;  %v3321_v25 = vpop.xlane.xlu1 %3320 }
 0x48b   : > { %v3330_v50 = vpop.xlane.xlu0 %3329  ;;  %v3541_v23 = vadd.f32 %v7055_v63, %v3321_v25 }
 0x48c   : > { %v3544_v7 = vadd.f32 %v7055_v63, %v3330_v50 }
 0x48d   : > { %3670 = vst.msk [vmem:[%s7070_s14 + $0x290] sm:$0xff] %vm3587_vm1, %v3541_v23 }
 0x48e   : > { %3673 = vst.msk [vmem:[%s7070_s14 + $0x2a8] sm:$0xff] %vm3587_vm1, %v3544_v7  ;;  %v3327_v1 = vpop.xlane.xlu1 %3326 }
 0x48f   : > { %v3336_v29 = vpop.xlane.xlu0 %3335  ;;  %v3543_v13 = vadd.f32 %v7055_v63, %v3327_v1 }
 0x490   : > { %v3546_v53 = vadd.f32 %v7055_v63, %v3336_v29 }
 0x491   : > { %3672 = vst.msk [vmem:[%s7070_s14 + $0x2a0] sm:$0xff] %vm3587_vm1, %v3543_v13 }
 0x492   : > { %3675 = vst.msk [vmem:[%s7070_s14 + $0x2b8] sm:$0xff] %vm3587_vm1, %v3546_v53  ;;  %v3333_v14 = vpop.xlane.xlu1 %3332 }
 0x493   : > { %v3342_v60 = vpop.xlane.xlu0 %3341  ;;  %v3545_v39 = vadd.f32 %v7055_v63, %v3333_v14 }
 0x494   : > { %v3548_v55 = vadd.f32 %v7055_v63, %v3342_v60 }
 0x495   : > { %3674 = vst.msk [vmem:[%s7070_s14 + $0x2b0] sm:$0xff] %vm3587_vm1, %v3545_v39 }
 0x496   : > { %3677 = vst.msk [vmem:[%s7070_s14 + $0x2c8] sm:$0xff] %vm3587_vm1, %v3548_v55  ;;  %v3339_v27 = vpop.xlane.xlu1 %3338 }
 0x497   : > { %v3348_v22 = vpop.xlane.xlu0 %3347  ;;  %v3547_v46 = vadd.f32 %v7055_v63, %v3339_v27 }
 0x498   : > { %v3550_v34 = vadd.f32 %v7055_v63, %v3348_v22 }
 0x499   : > { %3676 = vst.msk [vmem:[%s7070_s14 + $0x2c0] sm:$0xff] %vm3587_vm1, %v3547_v46 }
 0x49a   : > { %3679 = vst.msk [vmem:[%s7070_s14 + $0x2d8] sm:$0xff] %vm3587_vm1, %v3550_v34  ;;  %v3345_v15 = vpop.xlane.xlu1 %3344 }
 0x49b   : > { %v3354_v12 = vpop.xlane.xlu0 %3353  ;;  %v3549_v31 = vadd.f32 %v7055_v63, %v3345_v15 }
 0x49c   : > { %v3552_v52 = vadd.f32 %v7055_v63, %v3354_v12 }
 0x49d   : > { %3678 = vst.msk [vmem:[%s7070_s14 + $0x2d0] sm:$0xff] %vm3587_vm1, %v3549_v31 }
 0x49e   : > { %3681 = vst.msk [vmem:[%s7070_s14 + $0x2e8] sm:$0xff] %vm3587_vm1, %v3552_v52  ;;  %v3351_v5 = vpop.xlane.xlu1 %3350 }
 0x49f   : > { %v3360_v11 = vpop.xlane.xlu0 %3359  ;;  %v3551_v18 = vadd.f32 %v7055_v63, %v3351_v5 }
 0x4a0   : > { %v3554_v44 = vadd.f32 %v7055_v63, %v3360_v11 }
 0x4a1   : > { %3680 = vst.msk [vmem:[%s7070_s14 + $0x2e0] sm:$0xff] %vm3587_vm1, %v3551_v18 }
 0x4a2   : > { %3683 = vst.msk [vmem:[%s7070_s14 + $0x2f8] sm:$0xff] %vm3587_vm1, %v3554_v44  ;;  %v3357_v56 = vpop.xlane.xlu1 %3356 }
 0x4a3   : > { %v3366_v32 = vpop.xlane.xlu0 %3365  ;;  %v3553_v9 = vadd.f32 %v7055_v63, %v3357_v56 }
 0x4a4   : > { %v3556_v3 = vadd.f32 %v7055_v63, %v3366_v32 }
 0x4a5   : > { %3682 = vst.msk [vmem:[%s7070_s14 + $0x2f0] sm:$0xff] %vm3587_vm1, %v3553_v9 }
 0x4a6   : > { %3685 = vst.msk [vmem:[%s7070_s14 + $0x308] sm:$0xff] %vm3587_vm1, %v3556_v3  ;;  %v3363_v17 = vpop.xlane.xlu1 %3362 }
 0x4a7   : > { %v3372_v57 = vpop.xlane.xlu0 %3371  ;;  %v3555_v0 = vadd.f32 %v7055_v63, %v3363_v17 }
 0x4a8   : > { %v3558_v35 = vadd.f32 %v7055_v63, %v3372_v57 }
 0x4a9   : > { %3684 = vst.msk [vmem:[%s7070_s14 + $0x300] sm:$0xff] %vm3587_vm1, %v3555_v0 }
 0x4aa   : > { %3687 = vst.msk [vmem:[%s7070_s14 + $0x318] sm:$0xff] %vm3587_vm1, %v3558_v35  ;;  %v3369_v41 = vpop.xlane.xlu1 %3368 }
 0x4ab   : > { %v3378_v49 = vpop.xlane.xlu0 %3377  ;;  %v3557_v4 = vadd.f32 %v7055_v63, %v3369_v41 }
 0x4ac   : > { %v3560_v2 = vadd.f32 %v7055_v63, %v3378_v49 }
 0x4ad   : > { %3686 = vst.msk [vmem:[%s7070_s14 + $0x310] sm:$0xff] %vm3587_vm1, %v3557_v4 }
 0x4ae   : > { %3689 = vst.msk [vmem:[%s7070_s14 + $0x328] sm:$0xff] %vm3587_vm1, %v3560_v2  ;;  %v3375_v10 = vpop.xlane.xlu1 %3374 }
 0x4af   : > { %v3384_v45 = vpop.xlane.xlu0 %3383  ;;  %v3559_v38 = vadd.f32 %v7055_v63, %v3375_v10 }
 0x4b0   : > { %v3562_v51 = vadd.f32 %v7055_v63, %v3384_v45 }
 0x4b1   : > { %3688 = vst.msk [vmem:[%s7070_s14 + $0x320] sm:$0xff] %vm3587_vm1, %v3559_v38 }
 0x4b2   : > { %3691 = vst.msk [vmem:[%s7070_s14 + $0x338] sm:$0xff] %vm3587_vm1, %v3562_v51  ;;  %v3381_v37 = vpop.xlane.xlu1 %3380 }
 0x4b3   : > { %v3390_v21 = vpop.xlane.xlu0 %3389  ;;  %v3561_v24 = vadd.f32 %v7055_v63, %v3381_v37 }
 0x4b4   : > { %v3564_v30 = vadd.f32 %v7055_v63, %v3390_v21 }
 0x4b5   : > { %3690 = vst.msk [vmem:[%s7070_s14 + $0x330] sm:$0xff] %vm3587_vm1, %v3561_v24 }
 0x4b6   : > { %3693 = vst.msk [vmem:[%s7070_s14 + $0x348] sm:$0xff] %vm3587_vm1, %v3564_v30  ;;  %v3387_v43 = vpop.xlane.xlu1 %3386 }
 0x4b7   : > { %v3396_v20 = vpop.xlane.xlu0 %3395  ;;  %v3563_v26 = vadd.f32 %v7055_v63, %v3387_v43 }
 0x4b8   : > { %v3566_v6 = vadd.f32 %v7055_v63, %v3396_v20 }
 0x4b9   : > { %3692 = vst.msk [vmem:[%s7070_s14 + $0x340] sm:$0xff] %vm3587_vm1, %v3563_v26 }
 0x4ba   : > { %3695 = vst.msk [vmem:[%s7070_s14 + $0x358] sm:$0xff] %vm3587_vm1, %v3566_v6  ;;  %v3393_v54 = vpop.xlane.xlu1 %3392 }
 0x4bb   : > { %v3402_v47 = vpop.xlane.xlu0 %3401  ;;  %v3565_v58 = vadd.f32 %v7055_v63, %v3393_v54 }
 0x4bc   : > { %v3568_v28 = vadd.f32 %v7055_v63, %v3402_v47 }
 0x4bd   : > { %3694 = vst.msk [vmem:[%s7070_s14 + $0x350] sm:$0xff] %vm3587_vm1, %v3565_v58 }
 0x4be   : > { %3697 = vst.msk [vmem:[%s7070_s14 + $0x368] sm:$0xff] %vm3587_vm1, %v3568_v28  ;;  %v3399_v8 = vpop.xlane.xlu1 %3398 }
 0x4bf   : > { %v3408_v19 = vpop.xlane.xlu0 %3407  ;;  %v3567_v62 = vadd.f32 %v7055_v63, %v3399_v8 }
 0x4c0   : > { %v3570_v33 = vadd.f32 %v7055_v63, %v3408_v19 }
 0x4c1   : > { %3696 = vst.msk [vmem:[%s7070_s14 + $0x360] sm:$0xff] %vm3587_vm1, %v3567_v62 }
 0x4c2   : > { %3699 = vst.msk [vmem:[%s7070_s14 + $0x378] sm:$0xff] %vm3587_vm1, %v3570_v33  ;;  %v3405_v59 = vpop.xlane.xlu1 %3404 }
 0x4c3   : > { %v3414_v16 = vpop.xlane.xlu0 %3413  ;;  %v3569_v40 = vadd.f32 %v7055_v63, %v3405_v59 }
 0x4c4   : > { %v3572_v42 = vadd.f32 %v7055_v63, %v3414_v16 }
 0x4c5   : > { %3698 = vst.msk [vmem:[%s7070_s14 + $0x370] sm:$0xff] %vm3587_vm1, %v3569_v40 }
 0x4c6   : > { %3701 = vst.msk [vmem:[%s7070_s14 + $0x388] sm:$0xff] %vm3587_vm1, %v3572_v42  ;;  %v3411_v48 = vpop.xlane.xlu1 %3410 }
 0x4c7   : > { %v3420_v36 = vpop.xlane.xlu0 %3419  ;;  %v3571_v50 = vadd.f32 %v7055_v63, %v3411_v48 }
 0x4c8   : > { %v3574_v61 = vadd.f32 %v7055_v63, %v3420_v36 }
 0x4c9   : > { %3700 = vst.msk [vmem:[%s7070_s14 + $0x380] sm:$0xff] %vm3587_vm1, %v3571_v50 }
 0x4ca   : > { %3703 = vst.msk [vmem:[%s7070_s14 + $0x398] sm:$0xff] %vm3587_vm1, %v3574_v61  ;;  %v3417_v7 = vpop.xlane.xlu1 %3416 }
 0x4cb   : > { %v3426_v25 = vpop.xlane.xlu0 %3425  ;;  %v3573_v29 = vadd.f32 %v7055_v63, %v3417_v7 }
 0x4cc   : > { %v3576_v23 = vadd.f32 %v7055_v63, %v3426_v25 }
 0x4cd   : > { %3702 = vst.msk [vmem:[%s7070_s14 + $0x390] sm:$0xff] %vm3587_vm1, %v3573_v29 }
 0x4ce   : > { %3705 = vst.msk [vmem:[%s7070_s14 + $0x3a8] sm:$0xff] %vm3587_vm1, %v3576_v23  ;;  %v3423_v53 = vpop.xlane.xlu1 %3422 }
 0x4cf   : > { %v3432_v1 = vpop.xlane.xlu0 %3431  ;;  %v3575_v60 = vadd.f32 %v7055_v63, %v3423_v53 }
 0x4d0   : > { %v3578_v13 = vadd.f32 %v7055_v63, %v3432_v1 }
 0x4d1   : > { %3704 = vst.msk [vmem:[%s7070_s14 + $0x3a0] sm:$0xff] %vm3587_vm1, %v3575_v60 }
 0x4d2   : > { %3707 = vst.msk [vmem:[%s7070_s14 + $0x3b8] sm:$0xff] %vm3587_vm1, %v3578_v13  ;;  %v3429_v55 = vpop.xlane.xlu1 %3428 }
 0x4d3   : > { %v3438_v14 = vpop.xlane.xlu0 %3437  ;;  %v3577_v22 = vadd.f32 %v7055_v63, %v3429_v55 }
 0x4d4   : > { %v3580_v39 = vadd.f32 %v7055_v63, %v3438_v14 }
 0x4d5   : > { %3706 = vst.msk [vmem:[%s7070_s14 + $0x3b0] sm:$0xff] %vm3587_vm1, %v3577_v22 }
 0x4d6   : > { %3709 = vst.msk [vmem:[%s7070_s14 + $0x3c8] sm:$0xff] %vm3587_vm1, %v3580_v39  ;;  %v3435_v34 = vpop.xlane.xlu1 %3434 }
 0x4d7   : > { %v3444_v27 = vpop.xlane.xlu0 %3443  ;;  %v3579_v12 = vadd.f32 %v7055_v63, %v3435_v34 }
 0x4d8   : > { %v3582_v46 = vadd.f32 %v7055_v63, %v3444_v27 }
 0x4d9   : > { %3708 = vst.msk [vmem:[%s7070_s14 + $0x3c0] sm:$0xff] %vm3587_vm1, %v3579_v12 }
 0x4da   : > { %3711 = vst.msk [vmem:[%s7070_s14 + $0x3d8] sm:$0xff] %vm3587_vm1, %v3582_v46  ;;  %v3441_v52 = vpop.xlane.xlu1 %3440 }
 0x4db   : > { %v3450_v15 = vpop.xlane.xlu0 %3449  ;;  %v3581_v11 = vadd.f32 %v7055_v63, %v3441_v52 }
 0x4dc   : > { %v3584_v31 = vadd.f32 %v7055_v63, %v3450_v15 }
 0x4dd   : > { %3710 = vst.msk [vmem:[%s7070_s14 + $0x3d0] sm:$0xff] %vm3587_vm1, %v3581_v11 }
 0x4de   : > { %3713 = vst.msk [vmem:[%s7070_s14 + $0x3e8] sm:$0xff] %vm3587_vm1, %v3584_v31  ;;  %v3447_v44 = vpop.xlane.xlu1 %3446 }
 0x4df   : > { %v3456_v5 = vpop.xlane.xlu0 %3455  ;;  %v3583_v32 = vadd.f32 %v7055_v63, %v3447_v44 }
 0x4e0   : > { %v3586_v18 = vadd.f32 %v7055_v63, %v3456_v5 }
 0x4e1   : > { %3712 = vst.msk [vmem:[%s7070_s14 + $0x3e0] sm:$0xff] %vm3587_vm1, %v3583_v32 }
 0x4e2   : > { %3715 = vst.msk [vmem:[%s7070_s14 + $0x3f8] sm:$0xff] %vm3587_vm1, %v3586_v18  ;;  %v3453_v56 = vpop.xlane.xlu1 %3452 }
 0x4e3   : > { %v3585_v3 = vadd.f32 %v7055_v63, %v3453_v56 }
 0x4e5   : > { %3714 = vst.msk [vmem:[%s7070_s14 + $0x3f0] sm:$0xff] %vm3587_vm1, %v3585_v3 }
 0x4e6 PF: > { %s16_s20 = sadd.s32 1, %s3940_s20  }
 0x4e7   : > { %p13_p4 = scmp.ge.s32.totalorder %s16_s20, 4  }
 0x4e9   :  { %15 = sbr.rel (!%p13_p4) target bundleno = 2 (0x2), region = 70 }

</bundles_post_ra>
